<compile_context>
chip_gen: v6e
topology: v6e:2x2x1
jax: 0.10.0
libtpu: 0.0.40
codegen_flags: <defaults>
</compile_context>

<pallas_src>
import math
import functools

import jax
import jax.numpy as jnp
from jax import lax
from jax.experimental import pallas as pl
from jax.experimental.pallas import tpu as pltpu


def _svd_head_kernel(seT_ref, te_ref, src_ref, tgtT_ref, out_ref,
                     s_acc, ssum_acc, csum_acc, *, n_points):
    n = pl.program_id(1)
    n_last = pl.num_programs(1) - 1

    @pl.when(n == 0)
    def _():
        s_acc[...] = jnp.zeros_like(s_acc)
        ssum_acc[...] = jnp.zeros_like(ssum_acc)
        csum_acc[...] = jnp.zeros_like(csum_acc)
        out_ref[...] = jnp.zeros_like(out_ref)

    seT = seT_ref[0]     # (tN, d_k) bf16
    te = te_ref[0]       # (d_k, M)  bf16
    src = src_ref[0]     # (3, tN)   f32
    tgtT = tgtT_ref[0]   # (M, 3)    f32

    d_k = seT.shape[1]
    m_pts = tgtT.shape[0]

    # scores tile (tN, M): 1/sqrt(d_k) folded into the small LHS operand
    # (tN*d_k multiplies instead of tN*M).
    scale = jnp.asarray(1.0 / math.sqrt(d_k), dtype=seT.dtype)
    scores = lax.dot_general(
        seT * scale, te, (((1,), (0,)), ((), ())),
        preferred_element_type=jnp.float32)

    # Exact per-row softmax over the full M axis (f32).
    row_max = jnp.max(scores, axis=-1, keepdims=True)
    p = jnp.exp(scores - row_max)
    denom = jnp.sum(p, axis=-1, keepdims=True)
    attn = p * pl.reciprocal(denom, approx=True)

    # Soft correspondences (tN, 3): the big attention matrix stays the
    # natural (streamed) LHS, no transpose of (tN, M).
    corr = lax.dot_general(
        attn.astype(jnp.bfloat16), tgtT.astype(jnp.bfloat16),
        (((1,), (0,)), ((), ())),
        preferred_element_type=jnp.float32)

    # Uncentered f32 accumulators.
    s_acc[...] += lax.dot_general(
        src, corr, (((1,), (0,)), ((), ())),
        preferred_element_type=jnp.float32)                    # (3, 3)
    ssum_acc[...] += jnp.sum(src, axis=1, keepdims=True)        # (3, 1)
    csum_acc[...] += jnp.sum(corr, axis=0, keepdims=True)       # (1, 3)

    @pl.when(n == n_last)
    def _():
        inv_n = jnp.float32(1.0 / n_points)
        src_mean = ssum_acc[...] * inv_n                        # (3, 1)
        # H = sum(src * corr^T) - s_sum c_sum^T / N
        H = s_acc[...] - (ssum_acc[...] * csum_acc[...]) * inv_n  # (3, 3)
        tgt_mean_row = jnp.sum(tgtT, axis=0, keepdims=True) * jnp.float32(
            1.0 / m_pts)                                        # (1, 3)
        # Pack the three tiny results into one output block / one DMA.
        out_ref[0, 0:3, 0:3] = H
        out_ref[0, 0:3, 3:4] = src_mean
        out_ref[0, 3:4, 0:3] = tgt_mean_row


def _pick_tile_n(n):
    # Largest lane-aligned tile dividing N; full N if no multiple-of-128
    # divisor exists.  On v7x choose the tile so double-buffered
    # (tN,d_k)+(d_k,M) inputs + the (tN,M) f32 scores stay well under VMEM.
    for t in (512, 256, 128):
        if n % t == 0:
            return t
    return n


def _pallas_svd_head_core(src_embedding, tgt_embedding, src, tgt, tile_n=None):
    B, d_k, N = src_embedding.shape
    M = tgt_embedding.shape[2]
    tN = _pick_tile_n(N) if tile_n is None else tile_n
    assert N % tN == 0, "N must be divisible by the N-tile"
    nt = N // tN

    # Layout plumbing in the wrapper: bf16 embeddings (half the DMA bytes,
    # native bf16 MXU rate), contraction dims lane-major so no in-kernel
    # transposes are required.
    seT = jnp.swapaxes(src_embedding.astype(jnp.bfloat16), 1, 2)   # (B, N, d_k)
    te = tgt_embedding.astype(jnp.bfloat16)                        # (B, d_k, M)
    srcf = src.astype(jnp.float32)                                 # (B, 3, N)
    tgtT = jnp.swapaxes(tgt.astype(jnp.float32), 1, 2)             # (B, M, 3)

    packed = pl.pallas_call(
        functools.partial(_svd_head_kernel, n_points=N),
        out_shape=jax.ShapeDtypeStruct((B, 4, 8), jnp.float32),
        grid_spec=pltpu.PrefetchScalarGridSpec(
            num_scalar_prefetch=0,
            grid=(B, nt),
            in_specs=[
                pl.BlockSpec((1, tN, d_k), lambda b, n: (b, n, 0)),
                pl.BlockSpec((1, d_k, M), lambda b, n: (b, 0, 0)),
                pl.BlockSpec((1, 3, tN), lambda b, n: (b, 0, n)),
                pl.BlockSpec((1, M, 3), lambda b, n: (b, 0, 0)),
            ],
            out_specs=pl.BlockSpec((1, 4, 8), lambda b, n: (b, 0, 0)),
            scratch_shapes=[
                pltpu.VMEM((3, 3), jnp.float32),   # S accumulator
                pltpu.VMEM((3, 1), jnp.float32),   # src sum
                pltpu.VMEM((1, 3), jnp.float32),   # corr sum
            ]),
        compiler_params=pltpu.CompilerParams(
            dimension_semantics=("parallel", "arbitrary"),
            vmem_limit_bytes=48 << 20),
    )(seT, te, srcf, tgtT)

    H = packed[:, 0:3, 0:3]                              # (B, 3, 3)
    src_mean = packed[:, 0:3, 3:4]                       # (B, 3, 1)
    tgt_mean = jnp.swapaxes(packed[:, 3:4, 0:3], 1, 2)   # (B, 3, 1)
    return H, src_mean, tgt_mean


def _det3(r):
    # Analytic 3x3 determinant, batched over leading dims.
    return (r[..., 0, 0] * (r[..., 1, 1] * r[..., 2, 2] - r[..., 1, 2] * r[..., 2, 1])
            - r[..., 0, 1] * (r[..., 1, 0] * r[..., 2, 2] - r[..., 1, 2] * r[..., 2, 0])
            + r[..., 0, 2] * (r[..., 1, 0] * r[..., 2, 1] - r[..., 1, 1] * r[..., 2, 0]))


@jax.jit
def svd_head_forward(src_embedding, tgt_embedding, src, tgt, reflect):
    """Pallas-accelerated equivalent of SVDHead.forward.

    Returns (R, t) with R: (B, 3, 3), t: (B, 3)."""
    B = src.shape[0]

    H, src_mean, tgt_mean = _pallas_svd_head_core(
        src_embedding, tgt_embedding, src, tgt)

    # TODO(synk): 3x3 SVD / determinant-based reflection has no Pallas
    # equivalent; done here in plain JAX (matches torch.svd semantics:
    # A = u @ diag(s) @ v^T, i.e. v = vh^T).
    u, _, vh = jnp.linalg.svd(H)
    v = jnp.swapaxes(vh, -1, -2)
    ut = jnp.swapaxes(u, -1, -2)
    r = jnp.matmul(v, ut)
    det = _det3(r)
    r_fixed = jnp.matmul(jnp.matmul(v, reflect), ut)
    R = jnp.where(det[:, None, None] < 0.0, r_fixed, r)

    t = jnp.matmul(-R, src_mean) + tgt_mean          # (B, 3, 1)
    return R, t.reshape(B, 3)


def _jax_reference_H(src_embedding, tgt_embedding, src, tgt):
    # Mirrors the kernel's numerical recipe (bf16 matmul operands, f32
    # accumulation / softmax) so the check catches structural bugs.
    d_k = src_embedding.shape[1]
    se = jnp.swapaxes(src_embedding.astype(jnp.bfloat16), 1, 2)      # (B, N, dk)
    te = tgt_embedding.astype(jnp.bfloat16)                          # (B, dk, M)
    scale = jnp.asarray(1.0 / math.sqrt(d_k), dtype=jnp.bfloat16)
    scores = jnp.einsum('bnk,bkm->bnm', se * scale, te,
                        preferred_element_type=jnp.float32)
    attn = jax.nn.softmax(scores, axis=2)
    corr = jnp.einsum('bnm,bmc->bnc', attn.astype(jnp.bfloat16),
                      jnp.swapaxes(tgt, 1, 2).astype(jnp.bfloat16),
                      preferred_element_type=jnp.float32)            # (B, N, 3)
    src_corr = jnp.swapaxes(corr, 1, 2)                              # (B, 3, N)
    src_c = src - src.mean(axis=2, keepdims=True)
    corr_c = src_corr - src_corr.mean(axis=2, keepdims=True)
    return jnp.einsum('bcn,bdn->bcd', src_c, corr_c)


if __name__ == "__main__":
    # Deterministic "parameter" from __init__: reflect = eye(3) with [2,2] = -1.
    reflect = jnp.diag(jnp.array([1.0, 1.0, -1.0], dtype=jnp.float32))

    B, d_k, N, M = 2, 32, 256, 128
    key = jax.random.PRNGKey(0)
    k1, k2, k3, k4 = jax.random.split(key, 4)
    src_embedding = jax.random.normal(k1, (B, d_k, N), dtype=jnp.float32)
    tgt_embedding = jax.random.normal(k2, (B, d_k, M), dtype=jnp.float32)
    src = jax.random.normal(k3, (B, 3, N), dtype=jnp.float32)
    tgt = jax.random.normal(k4, (B, 3, M), dtype=jnp.float32)

    R, t = svd_head_forward(src_embedding, tgt_embedding, src, tgt, reflect)
    jax.block_until_ready((R, t))

    # Sanity checks: kernel covariance / means vs a matched pure-JAX
    # reference, and R a proper rotation.
    H_kernel, src_mean_k, tgt_mean_k = _pallas_svd_head_core(
        src_embedding, tgt_embedding, src, tgt)
    H_ref = _jax_reference_H(src_embedding, tgt_embedding, src, tgt)
    assert jnp.allclose(H_kernel, H_ref, atol=2e-2, rtol=2e-2), "H mismatch"
    assert jnp.allclose(src_mean_k, src.mean(axis=2, keepdims=True),
                        atol=1e-4), "src mean mismatch"
    assert jnp.allclose(tgt_mean_k, tgt.mean(axis=2, keepdims=True),
                        atol=1e-4), "tgt mean mismatch"
    eye = jnp.broadcast_to(jnp.eye(3, dtype=jnp.float32), (B, 3, 3))
    assert jnp.allclose(jnp.matmul(R, jnp.swapaxes(R, -1, -2)), eye,
                        atol=1e-3), "R not orthogonal"
    assert R.shape == (B, 3, 3) and t.shape == (B, 3)

    print("KERNEL_OK")
</pallas_src>

<mosaic_0001>
module attributes {stable_mosaic.version = 11 : i64} {
  func.func @_svd_head_kernel(%arg0: i32, %arg1: i32, %arg2: memref<1x256x32xbf16, #tpu.memory_space<vmem>>, %arg3: memref<1x32x128xbf16, #tpu.memory_space<vmem>>, %arg4: memref<1x3x256xf32, #tpu.memory_space<vmem>>, %arg5: memref<1x128x3xf32, #tpu.memory_space<vmem>>, %arg6: memref<1x4x8xf32, #tpu.memory_space<vmem>>, %arg7: memref<3x3xf32, #tpu.memory_space<vmem>>, %arg8: memref<3x1xf32, #tpu.memory_space<vmem>>, %arg9: memref<1x3xf32, #tpu.memory_space<vmem>>) attributes {dimension_semantics = [#tpu.dimension_semantics<parallel>, #tpu.dimension_semantics<arbitrary>], iteration_bounds = array<i64: 2, 1>, scalar_prefetch = 0 : i64, scratch_operands = 3 : i64, tpu.core_type = #tpu.core_type<tc>, window_params = [{transform_indices = @transform_0, window_bounds = array<i64: 1, 256, 32>}, {transform_indices = @transform_1, window_bounds = array<i64: 1, 32, 128>}, {transform_indices = @transform_2, window_bounds = array<i64: 1, 3, 256>}, {transform_indices = @transform_3, window_bounds = array<i64: 1, 128, 3>}, {transform_indices = @transform_4, window_bounds = array<i64: 1, 4, 8>}]} {
    %c0_i32 = arith.constant 0 : i32
    %0 = arith.cmpi eq, %arg1, %c0_i32 : i32
    %1 = arith.extui %0 : i1 to i32
    %c0_i32_0 = arith.constant 0 : i32
    %2 = arith.cmpi ne, %1, %c0_i32_0 : i32
    scf.if %2 {
      %cst_33 = arith.constant 0.000000e+00 : f32
      %44 = vector.broadcast %cst_33 : f32 to vector<3x3xf32>
      %c0_34 = arith.constant 0 : index
      %c0_35 = arith.constant 0 : index
      %45 = vector.load %arg7[%c0_34, %c0_35] : memref<3x3xf32, #tpu.memory_space<vmem>>, vector<3x3xf32>
      tpu.vector_store %arg7[%c0_34, %c0_35], %44 {strides = array<i32>} : memref<3x3xf32, #tpu.memory_space<vmem>>, vector<3x3xf32>,
      %cst_36 = arith.constant 0.000000e+00 : f32
      %46 = vector.broadcast %cst_36 : f32 to vector<3x1xf32>
      %c0_37 = arith.constant 0 : index
      %c0_38 = arith.constant 0 : index
      %47 = vector.load %arg8[%c0_37, %c0_38] : memref<3x1xf32, #tpu.memory_space<vmem>>, vector<3x1xf32>
      tpu.vector_store %arg8[%c0_37, %c0_38], %46 {strides = array<i32>} : memref<3x1xf32, #tpu.memory_space<vmem>>, vector<3x1xf32>,
      %cst_39 = arith.constant 0.000000e+00 : f32
      %48 = vector.broadcast %cst_39 : f32 to vector<1x3xf32>
      %c0_40 = arith.constant 0 : index
      %c0_41 = arith.constant 0 : index
      %49 = vector.load %arg9[%c0_40, %c0_41] : memref<1x3xf32, #tpu.memory_space<vmem>>, vector<1x3xf32>
      tpu.vector_store %arg9[%c0_40, %c0_41], %48 {strides = array<i32>} : memref<1x3xf32, #tpu.memory_space<vmem>>, vector<1x3xf32>,
      %cst_42 = arith.constant 0.000000e+00 : f32
      %50 = vector.broadcast %cst_42 : f32 to vector<1x4x8xf32>
      %c0_43 = arith.constant 0 : index
      %c0_44 = arith.constant 0 : index
      %c0_45 = arith.constant 0 : index
      %51 = vector.load %arg6[%c0_43, %c0_44, %c0_45] : memref<1x4x8xf32, #tpu.memory_space<vmem>>, vector<1x4x8xf32>
      tpu.vector_store %arg6[%c0_43, %c0_44, %c0_45], %50 {strides = array<i32>} : memref<1x4x8xf32, #tpu.memory_space<vmem>>, vector<1x4x8xf32>,
    } else {
    }
    %c0 = arith.constant 0 : index
    %c0_1 = arith.constant 0 : index
    %c0_2 = arith.constant 0 : index
    %3 = vector.load %arg2[%c0, %c0_1, %c0_2] : memref<1x256x32xbf16, #tpu.memory_space<vmem>>, vector<1x256x32xbf16>
    %4 = vector.shape_cast %3 : vector<1x256x32xbf16> to vector<256x32xbf16>
    %c0_3 = arith.constant 0 : index
    %c0_4 = arith.constant 0 : index
    %c0_5 = arith.constant 0 : index
    %5 = vector.load %arg3[%c0_3, %c0_4, %c0_5] : memref<1x32x128xbf16, #tpu.memory_space<vmem>>, vector<1x32x128xbf16>
    %6 = vector.shape_cast %5 : vector<1x32x128xbf16> to vector<32x128xbf16>
    %c0_6 = arith.constant 0 : index
    %c0_7 = arith.constant 0 : index
    %c0_8 = arith.constant 0 : index
    %7 = vector.load %arg4[%c0_6, %c0_7, %c0_8] : memref<1x3x256xf32, #tpu.memory_space<vmem>>, vector<1x3x256xf32>
    %8 = vector.shape_cast %7 : vector<1x3x256xf32> to vector<3x256xf32>
    %c0_9 = arith.constant 0 : index
    %c0_10 = arith.constant 0 : index
    %c0_11 = arith.constant 0 : index
    %9 = vector.load %arg5[%c0_9, %c0_10, %c0_11] : memref<1x128x3xf32, #tpu.memory_space<vmem>>, vector<1x128x3xf32>
    %10 = vector.shape_cast %9 : vector<1x128x3xf32> to vector<128x3xf32>
    %cst = arith.constant 1.767580e-01 : bf16
    %11 = vector.broadcast %cst : bf16 to vector<256x32xbf16>
    %12 = arith.mulf %4, %11 : vector<256x32xbf16>
    %cst_12 = arith.constant dense<0.000000e+00> : vector<256x128xf32>
    %13 = tpu.matmul %12, %6, %cst_12 {dimension_numbers = #tpu.dot_dimension_numbers<[1], [0], [0], [1], [0, 0, 1, 1], [], []>} : vector<256x32xbf16>, vector<32x128xbf16>, vector<256x128xf32> -> vector<256x128xf32>
    %cst_13 = arith.constant dense<0xFF800000> : vector<256xf32>
    %14 = vector.multi_reduction <maximumf>, %13, %cst_13 [1] : vector<256x128xf32> to vector<256xf32>
    %15 = vector.shape_cast %14 : vector<256xf32> to vector<256x1xf32>
    %16 = vector.broadcast %15 : vector<256x1xf32> to vector<256x128xf32>
    %17 = arith.subf %13, %16 : vector<256x128xf32>
    %18 = math.exp %17 : vector<256x128xf32>
    %cst_14 = arith.constant dense<0.000000e+00> : vector<256xf32>
    %19 = vector.multi_reduction <add>, %18, %cst_14 [1] : vector<256x128xf32> to vector<256xf32>
    %20 = vector.shape_cast %19 : vector<256xf32> to vector<256x1xf32>
    %21 = tpu.reciprocal %20 {approx = true} : vector<256x1xf32> -> vector<256x1xf32>
    %22 = vector.broadcast %21 : vector<256x1xf32> to vector<256x128xf32>
    %23 = arith.mulf %18, %22 : vector<256x128xf32>
    %24 = arith.truncf %23 : vector<256x128xf32> to vector<256x128xbf16>
    %25 = arith.truncf %10 : vector<128x3xf32> to vector<128x3xbf16>
    %cst_15 = arith.constant dense<0.000000e+00> : vector<256x3xf32>
    %26 = tpu.matmul %24, %25, %cst_15 {dimension_numbers = #tpu.dot_dimension_numbers<[1], [0], [0], [1], [0, 0, 1, 1], [], []>} : vector<256x128xbf16>, vector<128x3xbf16>, vector<256x3xf32> -> vector<256x3xf32>
    %c0_16 = arith.constant 0 : index
    %c0_17 = arith.constant 0 : index
    %27 = vector.load %arg7[%c0_16, %c0_17] : memref<3x3xf32, #tpu.memory_space<vmem>>, vector<3x3xf32>
    %cst_18 = arith.constant dense<0.000000e+00> : vector<3x3xf32>
    %28 = tpu.matmul %8, %26, %cst_18 {dimension_numbers = #tpu.dot_dimension_numbers<[1], [0], [0], [1], [0, 0, 1, 1], [], []>} : vector<3x256xf32>, vector<256x3xf32>, vector<3x3xf32> -> vector<3x3xf32>
    %29 = arith.addf %27, %28 : vector<3x3xf32>
    %c0_19 = arith.constant 0 : index
    %c0_20 = arith.constant 0 : index
    %30 = vector.load %arg7[%c0_19, %c0_20] : memref<3x3xf32, #tpu.memory_space<vmem>>, vector<3x3xf32>
    tpu.vector_store %arg7[%c0_19, %c0_20], %29 {strides = array<i32>} : memref<3x3xf32, #tpu.memory_space<vmem>>, vector<3x3xf32>,
    %c0_21 = arith.constant 0 : index
    %c0_22 = arith.constant 0 : index
    %31 = vector.load %arg8[%c0_21, %c0_22] : memref<3x1xf32, #tpu.memory_space<vmem>>, vector<3x1xf32>
    %cst_23 = arith.constant dense<0.000000e+00> : vector<3xf32>
    %32 = vector.multi_reduction <add>, %8, %cst_23 [1] : vector<3x256xf32> to vector<3xf32>
    %33 = vector.shape_cast %32 : vector<3xf32> to vector<3x1xf32>
    %34 = arith.addf %31, %33 : vector<3x1xf32>
    %c0_24 = arith.constant 0 : index
    %c0_25 = arith.constant 0 : index
    %35 = vector.load %arg8[%c0_24, %c0_25] : memref<3x1xf32, #tpu.memory_space<vmem>>, vector<3x1xf32>
    tpu.vector_store %arg8[%c0_24, %c0_25], %34 {strides = array<i32>} : memref<3x1xf32, #tpu.memory_space<vmem>>, vector<3x1xf32>,
    %c0_26 = arith.constant 0 : index
    %c0_27 = arith.constant 0 : index
    %36 = vector.load %arg9[%c0_26, %c0_27] : memref<1x3xf32, #tpu.memory_space<vmem>>, vector<1x3xf32>
    %cst_28 = arith.constant dense<0.000000e+00> : vector<3xf32>
    %37 = vector.multi_reduction <add>, %26, %cst_28 [0] : vector<256x3xf32> to vector<3xf32>
    %38 = vector.shape_cast %37 : vector<3xf32> to vector<1x3xf32>
    %39 = arith.addf %36, %38 : vector<1x3xf32>
    %c0_29 = arith.constant 0 : index
    %c0_30 = arith.constant 0 : index
    %40 = vector.load %arg9[%c0_29, %c0_30] : memref<1x3xf32, #tpu.memory_space<vmem>>, vector<1x3xf32>
    tpu.vector_store %arg9[%c0_29, %c0_30], %39 {strides = array<i32>} : memref<1x3xf32, #tpu.memory_space<vmem>>, vector<1x3xf32>,
    %c0_i32_31 = arith.constant 0 : i32
    %41 = arith.cmpi eq, %arg1, %c0_i32_31 : i32
    %42 = arith.extui %41 : i1 to i32
    %c0_i32_32 = arith.constant 0 : i32
    %43 = arith.cmpi ne, %42, %c0_i32_32 : i32
    scf.if %43 {
      %c0_33 = arith.constant 0 : index
      %c0_34 = arith.constant 0 : index
      %44 = vector.load %arg8[%c0_33, %c0_34] : memref<3x1xf32, #tpu.memory_space<vmem>>, vector<3x1xf32>
      %cst_35 = arith.constant 3.906250e-03 : f32
      %45 = vector.broadcast %cst_35 : f32 to vector<3x1xf32>
      %46 = arith.mulf %44, %45 : vector<3x1xf32>
      %c0_36 = arith.constant 0 : index
      %c0_37 = arith.constant 0 : index
      %47 = vector.load %arg7[%c0_36, %c0_37] : memref<3x3xf32, #tpu.memory_space<vmem>>, vector<3x3xf32>
      %c0_38 = arith.constant 0 : index
      %c0_39 = arith.constant 0 : index
      %48 = vector.load %arg8[%c0_38, %c0_39] : memref<3x1xf32, #tpu.memory_space<vmem>>, vector<3x1xf32>
      %c0_40 = arith.constant 0 : index
      %c0_41 = arith.constant 0 : index
      %49 = vector.load %arg9[%c0_40, %c0_41] : memref<1x3xf32, #tpu.memory_space<vmem>>, vector<1x3xf32>
      %50 = vector.broadcast %48 : vector<3x1xf32> to vector<3x3xf32>
      %51 = vector.broadcast %49 : vector<1x3xf32> to vector<3x3xf32>
      %52 = arith.mulf %50, %51 : vector<3x3xf32>
      %cst_42 = arith.constant 3.906250e-03 : f32
      %53 = vector.broadcast %cst_42 : f32 to vector<3x3xf32>
      %54 = arith.mulf %52, %53 : vector<3x3xf32>
      %55 = arith.subf %47, %54 : vector<3x3xf32>
      %cst_43 = arith.constant dense<0.000000e+00> : vector<3xf32>
      %56 = vector.multi_reduction <add>, %10, %cst_43 [0] : vector<128x3xf32> to vector<3xf32>
      %57 = vector.shape_cast %56 : vector<3xf32> to vector<1x3xf32>
      %cst_44 = arith.constant 7.812500e-03 : f32
      %58 = vector.broadcast %cst_44 : f32 to vector<1x3xf32>
      %59 = arith.mulf %57, %58 : vector<1x3xf32>
      %c0_45 = arith.constant 0 : index
      %c0_46 = arith.constant 0 : index
      %c0_47 = arith.constant 0 : index
      %60 = vector.load %arg6[%c0_45, %c0_46, %c0_47] : memref<1x4x8xf32, #tpu.memory_space<vmem>>, vector<1x3x3xf32>
      %61 = vector.shape_cast %60 : vector<1x3x3xf32> to vector<3x3xf32>
      %62 = vector.shape_cast %55 : vector<3x3xf32> to vector<1x3x3xf32>
      tpu.vector_store %arg6[%c0_45, %c0_46, %c0_47], %62 {strides = array<i32>} : memref<1x4x8xf32, #tpu.memory_space<vmem>>, vector<1x3x3xf32>,
      %c0_48 = arith.constant 0 : index
      %c0_49 = arith.constant 0 : index
      %c3 = arith.constant 3 : index
      %63 = vector.load %arg6[%c0_48, %c0_49, %c3] : memref<1x4x8xf32, #tpu.memory_space<vmem>>, vector<1x3x1xf32>
      %64 = vector.shape_cast %63 : vector<1x3x1xf32> to vector<3x1xf32>
      %65 = vector.shape_cast %46 : vector<3x1xf32> to vector<1x3x1xf32>
      tpu.vector_store %arg6[%c0_48, %c0_49, %c3], %65 {strides = array<i32>} : memref<1x4x8xf32, #tpu.memory_space<vmem>>, vector<1x3x1xf32>,
      %c0_50 = arith.constant 0 : index
      %c3_51 = arith.constant 3 : index
      %c0_52 = arith.constant 0 : index
      %66 = vector.load %arg6[%c0_50, %c3_51, %c0_52] : memref<1x4x8xf32, #tpu.memory_space<vmem>>, vector<1x1x3xf32>
      %67 = vector.shape_cast %66 : vector<1x1x3xf32> to vector<1x3xf32>
      %68 = vector.shape_cast %59 : vector<1x3xf32> to vector<1x1x3xf32>
      tpu.vector_store %arg6[%c0_50, %c3_51, %c0_52], %68 {strides = array<i32>} : memref<1x4x8xf32, #tpu.memory_space<vmem>>, vector<1x1x3xf32>,
    } else {
    }
    return
  }
  func.func @transform_0(%arg0: i32, %arg1: i32) -> (i32, i32, i32) {
    %c0_i32 = arith.constant 0 : i32
    %c0_i32_0 = arith.constant 0 : i32
    return %arg0, %arg1, %c0_i32 : i32, i32, i32
  }
  func.func @transform_1(%arg0: i32, %arg1: i32) -> (i32, i32, i32) {
    %c0_i32 = arith.constant 0 : i32
    %c0_i32_0 = arith.constant 0 : i32
    %c0_i32_1 = arith.constant 0 : i32
    return %arg0, %c0_i32, %c0_i32_0 : i32, i32, i32
  }
  func.func @transform_2(%arg0: i32, %arg1: i32) -> (i32, i32, i32) {
    %c0_i32 = arith.constant 0 : i32
    %c0_i32_0 = arith.constant 0 : i32
    return %arg0, %c0_i32, %arg1 : i32, i32, i32
  }
  func.func @transform_3(%arg0: i32, %arg1: i32) -> (i32, i32, i32) {
    %c0_i32 = arith.constant 0 : i32
    %c0_i32_0 = arith.constant 0 : i32
    %c0_i32_1 = arith.constant 0 : i32
    return %arg0, %c0_i32, %c0_i32_0 : i32, i32, i32
  }
  func.func @transform_4(%arg0: i32, %arg1: i32) -> (i32, i32, i32) {
    %c0_i32 = arith.constant 0 : i32
    %c0_i32_0 = arith.constant 0 : i32
    %c0_i32_1 = arith.constant 0 : i32
    return %arg0, %c0_i32, %c0_i32_0 : i32, i32, i32
  }
}

</mosaic_0001>

<bundles_post_ra>
// kernel: custom-call.57
= control target key start
LH: loop header
LB: loop body
LE: loop exit
PB: predicated region body
PF: predicated region fallthrough
CT: control target
= control target key end

     0   :  { %s651_s9 = smov 0   ;;  %s653_s10 = smov 0   ;;  %s801_s0 = inlined_call_operand.vmem [shape: f32[2,6,3], index: 0, kind: input, shape index: {}]   ;;  %s802_s1 = inlined_call_operand.vmem [shape: f32[2,6,3], index: 1, kind: output, shape index: {0}]   ;;  %s803_s2 = inlined_call_operand.vmem [shape: f32[2,3], index: 2, kind: output, shape index: {1}]  }
   0x1   :  { %s655_s11 = smov 0   ;;  %s657_s12 = smov 0  }
   0x2   :  { %s659_s13 = smov 0  }
   0x3 LB: > { %s28_s14 = sadd.s32 1, %s624_s12  ;;  %s506_s15 = sadd.s32 4294967295, %s628_s13   ;;  %s628_s13 = sphi %s659_s13, %s9_s13   ;;  %s624_s12 = sphi %s657_s12, %s810_s12   ;;  %s620_s11 = sphi %s655_s11, %s809_s11   ;;  %s616_s10 = sphi %s653_s10, %s808_s10   ;;  %s612_s9 = sphi %s651_s9, %s807_s9  }
   0x4   : > { %p30_p0 = scmp.ge.s32.totalorder %s28_s14, 2  ;;  %s33_s16 = ssub.s32 0, %s624_s12 }
   0x5   : > { %s508_s17 = smin.u32 %s624_s12, %s33_s16  ;;  %p57_p1 = scmp.ne.s32.totalorder %s616_s10, %s612_s9 }
   0x6   : > { %s812_s14 = smov (%p30_p0, %s28_s14), 0  ;;  %s35_s18 = sshrl.u32 %s508_s17, 3 }
   0x7   : > { %s39_s19 = ssub.s32 0, %s812_s14  ;;  %p58_p2 = scmp.eq.s32.totalorder %s506_s15, 1 }
   0x8   : > { %s509_s20 = smin.u32 %s39_s19, %s812_s14  ;;  %s47_s24 = sadd.s32 1, %s616_s10 }
   0x9   : > { %s41_s21 = sshrl.u32 %s509_s20, 3  ;;  %p686_p3 = por %p58_p2, %p57_p1 }
   0xa   : > { %s44_s23 = ssub.s32 %s35_s18, %s41_s21  ;;  %p511_p5 = scmp.ge.s32.totalorder %s628_s13, 2 }
   0xb   : > { %p45_p4 = scmp.eq.s32.totalorder %s44_s23, 0  ;;  %s82_s26 = sand.u32 (!%p511_p5), 1, %s628_s13  }
   0xc   : > { %80 = sbr.rel (%p511_p5) target bundleno = 19 (0x13), region = 16  ;;  %s513_s27 = sshll.u32 (!%p511_p5), %s624_s12, 3 }
   0xd   : > { %s692_s25 = scalar_select %p45_p4, %s616_s10, %s47_s24  }
   0xe   : > { %s512_s28 = sshll.u32 (!%p511_p5), %s82_s26, 3  ;;  %s88_s3 = scalar_lea.vmem (!%p511_p5), %s801_s0, %s513_s27 }
   0xf   : > { %s84_s4 = scalar_lea.vmem (!%p511_p5), [#allocation0], %s512_s28 }
  0x11   : > { %v117_v0 = vld [vmem:[%s88_s3] sm:$0xff] }
  0x12   : > { %118 = vst [vmem:[%s84_s4] sm:$0xff] %v117_v0 }
  0x13 PF: > { %p514_p6 = scmp.ge.s32.totalorder %s628_s13, 1  ;;  %p123_p7 = scmp.lt.s32.totalorder %s628_s13, 3 }
  0x15   : > { %p124_p8 = pnand %p514_p6, %p123_p7 }
  0x17   : > { %127 = sbr.rel (%p124_p8) target bundleno = 336 (0x150), region = 54 }
  0x1c   : > { %s130_s5 = sand.u32 1, %s506_s15   ;;  %s144_s6 = sand.u32 1, %s612_s9   ;;  %v634_v2 = vmov 0.0  }
  0x1d   : > { %s515_s7 = sshll.u32 %s130_s5, 3  ;;  %s703_s8 = sshll.u32 %s144_s6, 1 }
  0x1e   : > { %s153_s16 = sand.u32 7, %s620_s11   ;;  %s132_s17 = scalar_lea.vmem [#allocation0], %s515_s7 }
  0x1f   : > { %v155_v1 = vld [vmem:[%s132_s17] sm:$0xff]  ;;  %s706_s18 = scalar_lea.vmem [#allocation1], %s515_s7  ;;  %s709_s19 = scalar_lea.vmem [#allocation2], %s153_s16 }
  0x20   : > { %156 = vst [vmem:[%s706_s18] sm:$0xff] %v155_v1  ;;  %157 = vst [vmem:[%s709_s19] sm:$0x1] %v634_v2  ;;  %s146_s15 = scalar_lea.vmem [#allocation3], %s703_s8  ;;  %s713_s20 = smov 0  }
  0x21 LB: >> { %v165_v3 = vlaneseq  ;;  %v722_v5 = vstv %s632_s20  ;;  %s192_s9 = scalar_lea.vmem %s706_s18, %s632_s20 [#allocation1]  ;;  %s250_s21 = scalar_lea.vmem [#allocation4], %s632_s20  ;;  %v635_v59 = vmov 1.0   ;;  %s632_s20 = sphi %s713_s20, %s163_s20  }
  0x22   : >> { %s267_s23 = smov [#allocation4] }
  0x23   : >> { %v719_v4 = vshrl.u32 %v165_v3, 7  ;;  %v244_v48 = vand.u32 127, %v165_v3 }
  0x25   : >> { %vm169_vm0 = vcmp.gt.s32.totalorder %v719_v4, %v722_v5  ;;  %vm170_vm1 = vcmp.lt.s32.totalorder %v719_v4, 6  ;;  %v231_v4 = vmov %v719_v4  ;;  %vm740_vm12 = vcmp.eq.s32.totalorder %v244_v48, %v722_v5 }
  0x26   : >> { %vm171_vm2 = vmand %vm169_vm0, %vm170_vm1  ;;  %vm235_vm9 = vcmp.gt.s32.totalorder %v231_v4, %v722_v5  ;;  %vm236_vm10 = vcmp.lt.s32.totalorder %v231_v4, 6  ;;  %v270_v4 = vmov %v719_v4  ;;  %vm296_vm15 = vcmp.gt.s32.totalorder %v244_v48, %v722_v5 }
  0x27   : >> { %v164_v6 = vld [vmem:[%s706_s18] sm:$0xff]  ;;  %v193_v15 = vld [vmem:[%s192_s9] ss:$0 sm:$0xff]  ;;  %s228_s18 = smov %s706_s18  ;;  %vm237_vm11 = vmand %vm235_vm9, %vm236_vm10  ;;  %vm275_vm13 = vcmp.lt.s32.totalorder %v270_v4, 6  ;;  %v287_v4 = vmov %v719_v4 }
  0x28   : >> { %v172_v7 = vsel %vm171_vm2, %v164_v6, 0.0  ;;  %v194_v16 = vand.u32 2147483647, %v193_v15  ;;  %vm219_vm8 = vcmp.lt.f32.partialorder %v193_v15, 0.0  ;;  %v232_v45 = vld [vmem:[%s228_s18] sm:$0xff]  ;;  %s266_s18 = smov %s706_s18  ;;  %vm304_vm14 = vcmp.ge.s32.totalorder %v287_v4, %v722_v5 }
  0x29   : >> { %v173_v8 = vmul.f32 %v172_v7, %v172_v7  ;;  %v238_v49 = vsel %vm237_vm11, %v232_v45, 0.0  ;;  %v263_v60 = vld [vmem:[%s709_s19] ss:$0 sm:$0xff]  ;;  %vm305_vm0 = vmand %vm740_vm12, %vm304_vm14 }
  0x2a   : >> { %v195_v21 = vmax.f32 %v194_v16, 0.0  ;;  %v273_v63 = vld [vmem:[%s266_s18] sm:$0xff]  ;;  %s283_s18 = smov %s266_s18 }
  0x2b   : >> { %v174_v9 = vrot.slane %v173_v8, 4  ;;  %s308_s24 = scalar_lea.vmem %s283_s18, %s632_s20  ;;  %s163_s20 = sadd.s32 1, %s632_s20  }
  0x2c   : >> { %p160_p9 = scmp.ge.s32.totalorder %s163_s20, 3  }
  0x2d   : >> { %v175_v10 = vadd.f32 %v174_v9, %v173_v8  ;;  %s521_s26 = sshll.u32 (%p160_p9), %s620_s11, 3 }
  0x2e   : > { %s335_s29 = scalar_lea.vmem (%p160_p9), %s802_s1, %s521_s26 }
  0x2f   : >> { %v176_v11 = vrot.slane %v175_v10, 2 }
  0x31   : >> { %v177_v12 = vadd.f32 %v176_v11, %v175_v10 }
  0x33   : >> { %v178_v13 = vrot.slane %v177_v12, 1 }
  0x35   : >> { %v179_v14 = vadd.f32 %v178_v13, %v177_v12  ;;  %v294_v13 = vld [vmem:[%s283_s18] sm:$0xff] }
  0x37   : >> { %576 = vrsqrt.f32 %v179_v14  ;;  %vm182_vm3 = vcmp.eq.f32.partialorder %v179_v14, inf  ;;  %v185_v18 = vand.u32 2147483648, %v179_v14  ;;  %vm184_vm4 = vcmp.eq.f32.partialorder %v179_v14, 0.0 }
  0x44   : >> { %v577_v17 = vpop.eup %576 }
  0x45   : >> { %v181_v19 = vmul.f32 %v577_v17, %v179_v14 }
  0x47   : >> { %v183_v20 = vsel %vm182_vm3, %v179_v14, %v181_v19 }
  0x48   : >> { %v186_v22 = vsel %vm184_vm4, %v185_v18, %v183_v20 }
  0x49   : >> { %v196_v23 = vand.u32 2147483647, %v186_v22 }
  0x4b   : >> { %v197_v24 = vmax.f32 %v195_v21, %v196_v23 }
  0x4d   : >> { %578 = vrcp.f32 %v197_v24  ;;  %vm209_vm7 = vcmp.eq.f32.partialorder %v197_v24, 0.0 }
  0x5a   : >> { %v579_v25 = vpop.eup %578 }
  0x5b   : >> { %v199_v26 = vmul.f32 %v579_v25, %v194_v16  ;;  %v202_v27 = vmul.f32 0.0, %v579_v25  ;;  %v206_v28 = vmul.f32 %v579_v25, %v196_v23 }
  0x5d   : >> { %v200_v29 = vmul.f32 %v199_v26, %v199_v26  ;;  %v203_v30 = vmul.f32 %v202_v27, %v202_v27  ;;  %v207_v31 = vmul.f32 %v206_v28, %v206_v28 }
  0x5f   : >> { %v204_v32 = vadd.f32 %v203_v30, %v200_v29 }
  0x61   : >> { %v208_v33 = vadd.f32 %v207_v31, %v204_v32 }
  0x63   : >> { %580 = vrsqrt.f32 %v208_v33  ;;  %vm212_vm5 = vcmp.eq.f32.partialorder %v208_v33, inf  ;;  %v215_v35 = vand.u32 2147483648, %v208_v33  ;;  %vm214_vm6 = vcmp.eq.f32.partialorder %v208_v33, 0.0 }
  0x70   : >> { %v581_v34 = vpop.eup %580 }
  0x71   : >> { %v211_v36 = vmul.f32 %v581_v34, %v208_v33 }
  0x73   : >> { %v213_v37 = vsel %vm212_vm5, %v208_v33, %v211_v36 }
  0x74   : >> { %v216_v38 = vsel %vm214_vm6, %v215_v35, %v213_v37 }
  0x75   : >> { %v217_v39 = vmul.f32 %v216_v38, %v197_v24 }
  0x77   : >> { %v218_v40 = vsel %vm209_vm7, 0.0, %v217_v39 }
  0x78   : >> { %v220_v41 = vxor.u32 2147483648, %v218_v40 }
  0x7a   : >> { %v221_v42 = vsel %vm219_vm8, %v218_v40, %v220_v41 }
  0x7b   : >> { %v732_v43 = vsel %vm184_vm4, %v193_v15, %v221_v42  ;;  %582 = vrcp.f32 %v221_v42  ;;  %v222_v46 = vsub.f32 %v221_v42, %v193_v15 }
  0x7c   : >> { %v227_v44 = vsub.f32 %v193_v15, %v732_v43 }
  0x7e   : >> { %584 = vrcp.f32 %v227_v44 }
  0x88   : >> { %v583_v47 = vpop.eup %582 }
  0x89   : >> { %v224_v50 = vmul.f32 %v583_v47, %v222_v46 }
  0x8b   : >> { %v585_v51 = vpop.eup %584  ;;  %v226_v55 = vsel %vm184_vm4, 0.0, %v224_v50 }
  0x8c   : >> { %v240_v52 = vmul.f32 %v585_v51, %v238_v49  ;;  %v256_v57 = vsel %vm740_vm12, %v226_v55, 0.0 }
  0x8e   : >> { %v241_v54 = vsel %vm184_vm4, 0.0, %v240_v52 }
  0x8f   : >> { %v246_v56 = vsel %vm740_vm12, %v241_v54, 0.0 }
  0x90   : >> { %247 = vadd.xlane.f32.xlu0 %v246_v56 }
  0x94   : >> { %257 = vadd.xlane.f32.xlu0 %v256_v57 }
 0x119   : >> { %v248_v58 = vpop.xlane.xlu0 %247 }
 0x11a   : >> { %249 = vst [vmem:[#allocation4] sm:$0xff] %v248_v58 }
 0x11b   : >> { %251 = vst [vmem:[%s250_s21] sm:$0x1] %v635_v59 }
 0x11d   : >> { %v258_v61 = vpop.xlane.xlu0 %257 }
 0x11e   : >> { %v264_v62 = vsel %vm740_vm12, %v258_v61, %v263_v60 }
 0x11f   : >> { %265 = vst [vmem:[%s709_s19] sm:$0x1] %v264_v62 }
 0x122   : >> { %v272_v0 = vld [vmem:[%s267_s23] sm:$0xff]  ;;  %s284_s23 = smov %s267_s23 }
 0x123   : >> { %v274_v1 = vmul.f32 %v273_v63, %v272_v0  ;;  %v292_v12 = vld [vmem:[%s284_s23] sm:$0xff] }
 0x125   : >> { %v276_v2 = vsel %vm275_vm13, %v274_v1, 0.0 }
 0x126   : >> { %v277_v3 = vrot.slane %v276_v2, 4  ;;  %v320_v4 = vld [vmem:[#allocation2] sm:$0x3] (%p160_p9) }
 0x127   : > { %323 = vst [vmem:[%s146_s15] sm:$0x3] (%p160_p9), %v320_v4 }
 0x128   : >> { %v278_v6 = vadd.f32 %v277_v3, %v276_v2 }
 0x12a   : >> { %v279_v7 = vrot.slane %v278_v6, 2 }
 0x12c   : >> { %v280_v8 = vadd.f32 %v279_v7, %v278_v6 }
 0x12e   : >> { %v281_v9 = vrot.slane %v280_v8, 1 }
 0x130   : >> { %v282_v10 = vadd.f32 %v281_v9, %v280_v8 }
 0x132   : >> { %v288_v11 = vmul.f32 %v282_v10, %v258_v61 }
 0x134   : >> { %v293_v14 = vmul.f32 %v292_v12, %v288_v11 }
 0x136   : >> { %v297_v15 = vsub.f32 %v294_v13, %v293_v14 }
 0x138   : >> { %v298_v16 = vsel %vm296_vm15, %v297_v15, %v294_v13 }
 0x139   : >> { %v306_v17 = vsel %vm305_vm0, %v292_v12, %v298_v16 }
 0x13a   : >> { %307 = vst [vmem:[%s283_s18] sm:$0xff] %v306_v17 }
 0x13f   : > { %162 = sbr.rel (!%p160_p9) target bundleno = 33 (0x21), region = 175 }
 0x141   : >> { %v309_v18 = vld [vmem:[%s308_s24] ss:$0 sm:$0xff] }
 0x142   : >> { %v314_v19 = vsel %vm740_vm12, %v732_v43, %v309_v18 }
 0x143   : >> { %315 = vst [vmem:[%s308_s24] sm:$0x1] %v314_v19 }
 0x144   : > { %p372_p10 = scmp.lt.s32.totalorder (%p686_p3), %s620_s11, 0  ;;  %s373_s30 = ssub.s32 (%p686_p3), 0, %s620_s11  ;;  %v396_v20 = vld [vmem:[%s146_s15] sm:$0x3] (%p686_p3) }
 0x145   : > { %s522_s3 = smin.u32 (%p686_p3), %s620_s11, %s373_s30 }
 0x146   : > { %s375_s4 = sshrl.u32 (%p686_p3), %s522_s3, 3 }
 0x147   : > { %371 = sbr.rel (!%p686_p3) target bundleno = 336 (0x150), region = 99  ;;  %s376_s5 = ssub.s32 (%p686_p3), 0, %s375_s4 }
 0x14a   : > { %v364_v5 = vld [vmem:[%s706_s18] sm:$0xff] }
 0x14b   : > { %365 = vst [vmem:[%s335_s29] sm:$0xff] %v364_v5 }
 0x14c   : > { %s814_s5 = smov (!%p372_p10, %s376_s5), %s375_s4 }
 0x14d   : > { %s523_s6 = sshll.u32 %s814_s5, 1 }
 0x14e   : > { %s379_s17 = scalar_lea.vmem %s803_s2, %s523_s6 }
 0x14f   : > { %397 = vst [vmem:[%s379_s17] sm:$0x3] %v396_v20 }
 0x150 PF: > { %s9_s13 = sadd.s32 1, %s628_s13   ;;  %s807_s9 = smov %s616_s10 }
 0x151   : > { %p6_p11 = scmp.ge.s32.totalorder %s9_s13, 4   ;;  %s808_s10 = smov %s692_s25 }
 0x152   : > { %s809_s11 = smov %s624_s12  ;;  %s810_s12 = smov %s812_s14 }
 0x153   :  { %8 = sbr.rel (!%p6_p11) target bundleno = 3 (0x3), region = 186 }

// kernel: custom-call.58
= control target key start
LH: loop header
LB: loop body
LE: loop exit
PB: predicated region body
PF: predicated region fallthrough
CT: control target
= control target key end

     0   :  { %s243_s6 = smov 0   ;;  %s270_s0 = inlined_call_operand.vmem [shape: f32[2,3,3], index: 0, kind: input, shape index: {}]   ;;  %s271_s1 = inlined_call_operand.vmem [shape: f32[2,3,3], index: 1, kind: output, shape index: {}]  }
   0x1 LB: > { %s205_s7 = sadd.s32 4294967295, %s231_s6   ;;  %p207_p0 = scmp.ge.s32.totalorder %s231_s6, 2  ;;  %s231_s6 = sphi %s243_s6, %s7_s6  }
   0x2   : > { %s23_s8 = sand.u32 (!%p207_p0), 1, %s231_s6   ;;  %s209_s9 = sshll.u32 (!%p207_p0), %s231_s6, 2 }
   0x3   : > { %21 = sbr.rel (%p207_p0) target bundleno = 10 (0xa), region = 16  ;;  %s208_s10 = sshll.u32 (!%p207_p0), %s23_s8, 2 }
   0x4   : > { %s27_s13 = scalar_lea.vmem (!%p207_p0), %s270_s0, %s209_s9  ;;  %s25_s14 = scalar_lea.vmem (!%p207_p0), [#allocation1], %s208_s10 }
   0x8   : > { %v44_v0 = vld [vmem:[%s27_s13] sm:$0xf] }
   0x9   : > { %45 = vst [vmem:[%s25_s14] sm:$0xf] %v44_v0 }
   0xa PF: > { %p210_p1 = scmp.ge.s32.totalorder %s231_s6, 1  ;;  %p62_p2 = scmp.lt.s32.totalorder %s231_s6, 3 }
   0xc   : > { %p63_p3 = pnand %p210_p1, %p62_p2 }
   0xd   : > { %s259_s15 = sand.u32 (!%p63_p3), 1, %s205_s7   ;;  %s214_s19 = sshll.u32 (!%p63_p3), %s205_s7, 2 }
   0xe   : > { %66 = sbr.rel (%p63_p3) target bundleno = 329 (0x149), region = 50  ;;  %s211_s16 = sshll.u32 (!%p63_p3), %s259_s15, 2 }
   0xf   : > { %s75_s17 = scalar_lea.vmem (!%p63_p3), [#allocation1], %s211_s16  ;;  %s79_s18 = scalar_lea.vmem (!%p63_p3), [#allocation3], %s211_s16 }
  0x10   : > { %s133_s22 = scalar_lea.vmem (!%p63_p3), %s271_s1, %s214_s19 }
  0x13   : > { %v85_v1 = vlaneseq  ;;  %v83_v2 = vld [vmem:[%s75_s17] sm:$0xf]  ;;  %vm99_vm1 = vcmask 23552  }
  0x14   : > { %84 = vst [vmem:[#allocation0] sm:$0xf] %v83_v2 }
  0x15   : > { %v86_v3 = vand.u32 127, %v85_v1  ;;  %v88_v4 = vshrl.u32 %v85_v1, 7 }
  0x17   : > { %vm94_vm0 = vcmp.eq.s32.totalorder %v86_v3, 0  ;;  %vm90_vm2 = vcmp.eq.s32.totalorder %v86_v3, %v88_v4  ;;  %vm103_vm3 = vcmp.eq.s32.totalorder %v86_v3, 1  ;;  %vm114_vm4 = vcmp.eq.s32.totalorder %v86_v3, 2 }
  0x1b   : > { %v91_v5 = vld [vmem:[#allocation0] sm:$0xff] }
  0x1c   : > { %v98_v6 = vld [vmem:[#allocation0 + $0x1] ss:$0 sm:$0xff]  ;;  %v95_v7 = vsel %vm94_vm0, %v91_v5, 1.0  ;;  %v109_v11 = vld [vmem:[#allocation0 + $0x2] ss:$0 sm:$0xff] }
  0x1d   : > { %v100_v8 = vsel %vm99_vm1, %v98_v6, 0.0  ;;  %v96_v9 = vsel %vm90_vm2, %v95_v7, 0.0  ;;  %v111_v12 = vsel %vm99_vm1, %v109_v11, 0.0 }
  0x1e   : > { %v104_v10 = vmul.f32 %v100_v8, %v96_v9 }
  0x20   : > { %105 = vadd.xlane.f32.xlu0 %v104_v10 }
  0xa9   : > { %v106_v13 = vpop.xlane.xlu0 %105 }
  0xaa   : > { %v107_v14 = vsel %vm103_vm3, %v106_v13, %v96_v9 }
  0xab   : > { %v115_v15 = vmul.f32 %v111_v12, %v107_v14 }
  0xad   : > { %116 = vadd.xlane.f32.xlu0 %v115_v15 }
 0x136   : > { %v117_v16 = vpop.xlane.xlu0 %116 }
 0x137   : > { %v118_v17 = vsel %vm114_vm4, %v117_v16, %v107_v14 }
 0x138   : > { %119 = vst [vmem:[#allocation2] sm:$0xff] %v118_v17 }
 0x13f   : > { %v124_v18 = vld [vmem:[#allocation2] sm:$0xf] }
 0x140   : > { %127 = vst [vmem:[%s79_s18] sm:$0xf] %v124_v18 }
 0x147   : > { %v150_v19 = vld [vmem:[%s79_s18] sm:$0xf] }
 0x148   : > { %151 = vst [vmem:[%s133_s22] sm:$0xf] %v150_v19 }
 0x149 PF: > { %s7_s6 = sadd.s32 1, %s231_s6  }
 0x14a   : > { %p4_p4 = scmp.ge.s32.totalorder %s7_s6, 4  }
 0x14c   :  { %6 = sbr.rel (!%p4_p4) target bundleno = 1 (0x1), region = 112 }

// kernel: custom-call.50
= control target key start
LH: loop header
LB: loop body
LE: loop exit
PB: predicated region body
PF: predicated region fallthrough
CT: control target
= control target key end

     0   :  { %s6_s0 = inlined_call_operand.hbm [shape: pred[2], index: 0, kind: output, shape index: {}]  }

// kernel: custom-call.55
= control target key start
LH: loop header
LB: loop body
LE: loop exit
PB: predicated region body
PF: predicated region fallthrough
CT: control target
= control target key end

     0   :  { %s350_s6 = smov 0   ;;  %s352_s7 = smov 0   ;;  %s397_s0 = inlined_call_operand.vmem [shape: f32[2,3,3], index: 0, kind: input, shape index: {}]   ;;  %s398_s1 = inlined_call_operand.vmem [shape: f32[2,3,3], index: 1, kind: output, shape index: {}]  }
   0x1   :  { %s354_s8 = smov 0  }
   0x2 LB: > { %s272_s9 = sadd.s32 4294967295, %s337_s8   ;;  %s26_s10 = sadd.s32 1, %s333_s7  ;;  %s337_s8 = sphi %s354_s8, %s7_s8   ;;  %s333_s7 = sphi %s352_s7, %s400_s7   ;;  %s329_s6 = sphi %s350_s6, %s399_s6  }
   0x3   : > { %p28_p0 = scmp.ge.s32.totalorder %s26_s10, 2  ;;  %p274_p1 = scmp.ge.s32.totalorder %s337_s8, 2 }
   0x4   : > { %s42_s11 = sand.u32 (!%p274_p1), 1, %s337_s8   ;;  %s276_s12 = sshll.u32 (!%p274_p1), %s333_s7, 2 }
   0x5   : > { %s402_s10 = smov (%p28_p0, %s26_s10), 0  ;;  %40 = sbr.rel (%p274_p1) target bundleno = 12 (0xc), region = 16 }
   0x6   : > { %s275_s13 = sshll.u32 (!%p274_p1), %s42_s11, 2  ;;  %s48_s16 = scalar_lea.vmem (!%p274_p1), %s397_s0, %s276_s12 }
   0x7   : > { %s44_s17 = scalar_lea.vmem (!%p274_p1), [#allocation1], %s275_s13 }
   0xa   : > { %v65_v0 = vld [vmem:[%s48_s16] sm:$0xf] }
   0xb   : > { %66 = vst [vmem:[%s44_s17] sm:$0xf] %v65_v0 }
   0xc PF: > { %p277_p2 = scmp.ge.s32.totalorder %s337_s8, 1  ;;  %p83_p3 = scmp.lt.s32.totalorder %s337_s8, 3 }
   0xe   : > { %p84_p4 = pnand %p277_p2, %p83_p3 }
   0xf   : > { %s377_s18 = sand.u32 (!%p84_p4), 1, %s272_s9   ;;  %s281_s22 = sshll.u32 (!%p84_p4), %s329_s6, 2 }
  0x10   : > { %87 = sbr.rel (%p84_p4) target bundleno = 544 (0x220), region = 50  ;;  %s278_s19 = sshll.u32 (!%p84_p4), %s377_s18, 2 }
  0x11   : > { %s96_s20 = scalar_lea.vmem (!%p84_p4), [#allocation1], %s278_s19  ;;  %s100_s21 = scalar_lea.vmem (!%p84_p4), [#allocation3], %s278_s19 }
  0x12   : > { %s184_s25 = scalar_lea.vmem (!%p84_p4), %s398_s1, %s281_s22 }
  0x15   : > { %v339_v1 = vmov 0.0   ;;  %v104_v5 = vld [vmem:[%s96_s20] sm:$0xf]  ;;  %vm107_vm0 = vcmask 7168   ;;  %vm125_vm1 = vcmask 15368   ;;  %vm142_vm2 = vcmask 1047553  }
  0x16   : > { %106 = vst [vmem:[#allocation2] sm:$0xff] %v339_v1  ;;  %105 = vst [vmem:[#allocation0] sm:$0xf] %v104_v5  ;;  %vm147_vm4 = vcmask 23568   ;;  %vm164_vm5 = vcmask 1047554  }
  0x17   : > { %vm143_vm3 = vmand %vm125_vm1, %vm142_vm2 }
  0x18   : > { %vm165_vm6 = vmand %vm147_vm4, %vm164_vm5 }
  0x1d   : > { %v108_v2 = vld [vmem:[#allocation2] ss:$0 sm:$0xff]  ;;  %v109_v6 = vld [vmem:[#allocation0] ss:$0 sm:$0xff]  ;;  %v129_v18 = vld [vmem:[#allocation0 + $0x1] ss:$0 sm:$0xff] }
  0x1e   : > { %v110_v3 = vmul.f32 %v108_v2, %v108_v2  ;;  %v117_v4 = vmul.f32 0.0, %v108_v2  ;;  %v115_v10 = vld [vmem:[#allocation0] sm:$0xff] }
  0x1f   : > { %v151_v30 = vld [vmem:[#allocation0 + $0x2] ss:$0 sm:$0xff] }
  0x20   : > { %111 = vadd.xlane.f32.xlu0 %v110_v3 }
  0x24   : > { %118 = vadd.xlane.f32.xlu0 %v117_v4 }
  0xa9   : > { %v112_v7 = vpop.xlane.xlu0 %111 }
  0xaa   : > { %v113_v8 = vsub.f32 %v109_v6, %v112_v7 }
  0xac   : > { %309 = vrsqrt.f32 %v113_v8 }
  0xad   : > { %v119_v9 = vpop.xlane.xlu0 %118 }
  0xae   : > { %v120_v11 = vsub.f32 %v115_v10, %v119_v9 }
  0xb9   : > { %v310_v12 = vpop.eup %309 }
  0xba   : > { %v121_v13 = vmul.f32 %v310_v12, %v120_v11 }
  0xbc   : > { %v122_v14 = vsel %vm107_vm0, %v121_v13, 0.0 }
  0xbd   : > { %124 = vst [vmem:[#allocation2] sm:$0xff] %v122_v14 }
  0xc4   : > { %v127_v15 = vld [vmem:[#allocation2 + $0x1] ss:$0 sm:$0xff] }
  0xc5   : > { %v130_v16 = vmul.f32 %v127_v15, %v127_v15  ;;  %v137_v17 = vmul.f32 %v127_v15, %v122_v14 }
  0xc7   : > { %131 = vadd.xlane.f32.xlu1 %v130_v16 }
  0xcb   : > { %138 = vadd.xlane.f32.xlu1 %v137_v17 }
 0x150   : > { %v132_v19 = vpop.xlane.xlu1 %131 }
 0x151   : > { %v133_v20 = vsub.f32 %v129_v18, %v132_v19 }
 0x153   : > { %311 = vrsqrt.f32 %v133_v20 }
 0x154   : > { %v139_v21 = vpop.xlane.xlu1 %138 }
 0x155   : > { %v140_v22 = vsub.f32 %v115_v10, %v139_v21 }
 0x160   : > { %v312_v23 = vpop.eup %311 }
 0x161   : > { %v141_v24 = vmul.f32 %v312_v23, %v140_v22 }
 0x163   : > { %v144_v25 = vsel %vm143_vm3, %v141_v24, 0.0 }
 0x164   : > { %v145_v26 = vadd.f32 %v144_v25, %v122_v14 }
 0x166   : > { %146 = vst [vmem:[#allocation2] sm:$0xff] %v145_v26 }
 0x16d   : > { %v149_v27 = vld [vmem:[#allocation2 + $0x2] ss:$0 sm:$0xff] }
 0x16e   : > { %v159_v28 = vmul.f32 %v149_v27, %v145_v26  ;;  %v152_v29 = vmul.f32 %v149_v27, %v149_v27 }
 0x170   : > { %160 = vadd.xlane.f32.xlu1 %v159_v28  ;;  %153 = vadd.xlane.f32.xlu0 %v152_v29 }
 0x1f9   : > { %v154_v31 = vpop.xlane.xlu0 %153  ;;  %v161_v33 = vpop.xlane.xlu1 %160 }
 0x1fa   : > { %v155_v32 = vsub.f32 %v151_v30, %v154_v31  ;;  %v162_v34 = vsub.f32 %v115_v10, %v161_v33 }
 0x1fc   : > { %313 = vrsqrt.f32 %v155_v32 }
 0x209   : > { %v314_v35 = vpop.eup %313 }
 0x20a   : > { %v163_v36 = vmul.f32 %v314_v35, %v162_v34 }
 0x20c   : > { %v166_v37 = vsel %vm165_vm6, %v163_v36, 0.0 }
 0x20d   : > { %v167_v38 = vadd.f32 %v166_v37, %v145_v26 }
 0x20f   : > { %168 = vst [vmem:[#allocation2] sm:$0xff] %v167_v38 }
 0x216   : > { %v173_v39 = vld [vmem:[#allocation2] sm:$0xf] }
 0x217   : > { %176 = vst [vmem:[%s100_s21] sm:$0xf] %v173_v39 }
 0x21e   : > { %v201_v40 = vld [vmem:[%s100_s21] sm:$0xf] }
 0x21f   : > { %202 = vst [vmem:[%s184_s25] sm:$0xf] %v201_v40 }
 0x220 PF: > { %s7_s8 = sadd.s32 1, %s337_s8   ;;  %s399_s6 = smov %s333_s7 }
 0x221   : > { %p4_p5 = scmp.ge.s32.totalorder %s7_s8, 4   ;;  %s400_s7 = smov %s402_s10 }
 0x223   :  { %6 = sbr.rel (!%p4_p5) target bundleno = 2 (0x2), region = 114 }

// kernel: custom-call.56
= control target key start
LH: loop header
LB: loop body
LE: loop exit
PB: predicated region body
PF: predicated region fallthrough
CT: control target
= control target key end

     0   :  { %s350_s6 = smov 0   ;;  %s352_s7 = smov 0   ;;  %s397_s0 = inlined_call_operand.vmem [shape: f32[2,1,3,3], index: 0, kind: input, shape index: {}]   ;;  %s398_s1 = inlined_call_operand.vmem [shape: f32[2,1,3,3], index: 1, kind: output, shape index: {}]  }
   0x1   :  { %s354_s8 = smov 0  }
   0x2 LB: > { %s276_s9 = sadd.s32 4294967295, %s337_s8   ;;  %s33_s10 = sadd.s32 1, %s333_s7  ;;  %s337_s8 = sphi %s354_s8, %s7_s8   ;;  %s333_s7 = sphi %s352_s7, %s400_s7   ;;  %s329_s6 = sphi %s350_s6, %s399_s6  }
   0x3   : > { %p35_p0 = scmp.ge.s32.totalorder %s33_s10, 2  ;;  %p278_p1 = scmp.ge.s32.totalorder %s337_s8, 2 }
   0x4   : > { %s49_s11 = sand.u32 (!%p278_p1), 1, %s337_s8   ;;  %s280_s12 = sshll.u32 (!%p278_p1), %s333_s7, 2 }
   0x5   : > { %s402_s10 = smov (%p35_p0, %s33_s10), 0  ;;  %47 = sbr.rel (%p278_p1) target bundleno = 12 (0xc), region = 16 }
   0x6   : > { %s279_s13 = sshll.u32 (!%p278_p1), %s49_s11, 2  ;;  %s56_s16 = scalar_lea.vmem (!%p278_p1), %s397_s0, %s280_s12 }
   0x7   : > { %s51_s17 = scalar_lea.vmem (!%p278_p1), [#allocation1], %s279_s13 }
   0xa   : > { %v73_v0 = vld [vmem:[%s56_s16] sm:$0xf] }
   0xb   : > { %74 = vst [vmem:[%s51_s17] sm:$0xf] %v73_v0 }
   0xc PF: > { %p281_p2 = scmp.ge.s32.totalorder %s337_s8, 1  ;;  %p91_p3 = scmp.lt.s32.totalorder %s337_s8, 3 }
   0xe   : > { %p92_p4 = pnand %p281_p2, %p91_p3 }
  0x10   : > { %95 = sbr.rel (%p92_p4) target bundleno = 500 (0x1f4), region = 50 }
  0x15   : > { %s377_s18 = sand.u32 1, %s276_s9   ;;  %v114_v1 = vlaneseq  ;;  %v339_v11 = vmov -1.0   ;;  %s285_s22 = sshll.u32 %s329_s6, 2 }
  0x16   : > { %s282_s19 = sshll.u32 %s377_s18, 2  ;;  %s183_s25 = scalar_lea.vmem %s398_s1, %s285_s22 }
  0x17   : > { %s104_s20 = scalar_lea.vmem [#allocation1], %s282_s19  ;;  %v115_v3 = vand.u32 127, %v114_v1  ;;  %v118_v4 = vshrl.u32 %v114_v1, 7  ;;  %s108_s21 = scalar_lea.vmem [#allocation3], %s282_s19 }
  0x18   : > { %v112_v2 = vld [vmem:[%s104_s20] sm:$0xf] }
  0x19   : > { %113 = vst [vmem:[#allocation0] sm:$0xf] %v112_v2  ;;  %vm116_vm0 = vcmp.lt.s32.totalorder %v115_v3, 3  ;;  %vm125_vm1 = vcmp.ge.s32.totalorder %v118_v4, %v115_v3  ;;  %vm120_vm2 = vcmp.eq.s32.totalorder %v118_v4, %v115_v3  ;;  %vm139_vm4 = vcmp.eq.s32.totalorder %v115_v3, 0 }
  0x1a   : > { %vm126_vm3 = vmand %vm125_vm1, %vm116_vm0  ;;  %vm136_vm5 = vcmp.eq.s32.totalorder %v115_v3, %v118_v4  ;;  %v140_v12 = vsel %vm139_vm4, 1.0, %v339_v11  ;;  %vm147_vm6 = vcmp.eq.s32.totalorder %v115_v3, 1  ;;  %vm157_vm7 = vcmp.eq.s32.totalorder %v115_v3, 2 }
  0x1b   : > { %v141_v13 = vsel %vm136_vm5, %v140_v12, 0.0 }
  0x20   : > { %v121_v5 = vld [vmem:[#allocation0] sm:$0xff] }
  0x21   : > { %v122_v6 = vsel %vm120_vm2, %v121_v5, 0.0  ;;  %v127_v7 = vsel %vm126_vm3, %v121_v5, 0.0 }
  0x22   : > { %123 = vadd.xlane.f32.xlu0 %v122_v6 }
  0xab   : > { %v124_v8 = vpop.xlane.xlu0 %123 }
  0xac   : > { %313 = vrcp.f32 %v124_v8  ;;  %vm164_vm8 = vweird.f32 %v124_v8 }
  0xb9   : > { %v314_v9 = vpop.eup %313 }
  0xba   : > { %v129_v10 = vmul.f32 %v314_v9, %v127_v7 }
  0xbc   : > { %130 = vst [vmem:[#allocation4] sm:$0xff] %v129_v10 }
  0xc3   : > { %v143_v14 = vld [vmem:[#allocation4 + $0x1] ss:$0 sm:$0xff]  ;;  %v153_v17 = vld [vmem:[#allocation4 + $0x2] ss:$0 sm:$0xff] }
  0xc4   : > { %v144_v15 = vxor.u32 2147483648, %v143_v14  ;;  %v154_v19 = vxor.u32 2147483648, %v153_v17 }
  0xc6   : > { %v148_v16 = vmul.f32 %v144_v15, %v141_v13 }
  0xc8   : > { %149 = vadd.xlane.f32.xlu0 %v148_v16 }
 0x151   : > { %v150_v18 = vpop.xlane.xlu0 %149 }
 0x152   : > { %v151_v20 = vsel %vm147_vm6, %v150_v18, %v141_v13 }
 0x153   : > { %v158_v21 = vmul.f32 %v154_v19, %v151_v20 }
 0x155   : > { %159 = vadd.xlane.f32.xlu1 %v158_v21 }
 0x1de   : > { %v160_v22 = vpop.xlane.xlu1 %159 }
 0x1df   : > { %v161_v23 = vsel %vm157_vm7, %v160_v22, %v151_v20 }
 0x1e0   : > { %v163_v24 = vmul.f32 %v314_v9, %v161_v23 }
 0x1e2   : > { %v165_v25 = vsel %vm164_vm8, %v161_v23, %v163_v24 }
 0x1e3   : > { %166 = vst [vmem:[#allocation2] sm:$0xff] %v165_v25 }
 0x1ea   : > { %v171_v26 = vld [vmem:[#allocation2] sm:$0xf] }
 0x1eb   : > { %174 = vst [vmem:[%s108_s21] sm:$0xf] %v171_v26 }
 0x1f2   : > { %v200_v27 = vld [vmem:[%s108_s21] sm:$0xf] }
 0x1f3   : > { %201 = vst [vmem:[%s183_s25] sm:$0xf] %v200_v27 }
 0x1f4 PF: > { %s7_s8 = sadd.s32 1, %s337_s8   ;;  %s399_s6 = smov %s333_s7 }
 0x1f5   : > { %p4_p5 = scmp.ge.s32.totalorder %s7_s8, 4   ;;  %s400_s7 = smov %s402_s10 }
 0x1f7   :  { %6 = sbr.rel (!%p4_p5) target bundleno = 2 (0x2), region = 112 }

// kernel: svd_head_forward.1
= control target key start
LH: loop header
LB: loop body
LE: loop exit
PB: predicated region body
PF: predicated region fallthrough
CT: control target
= control target key end

     0   :  { %s1939_s15 = smov 0   ;;  %s1941_s16 = smov 0   ;;  %s2513_s0 = inlined_call_operand.vmem [shape: bf16[2,256,32], index: 0, kind: input, shape index: {}]   ;;  %s2514_s1 = inlined_call_operand.vmem [shape: bf16[2,32,128], index: 1, kind: input, shape index: {}]   ;;  %s2515_s2 = inlined_call_operand.vmem [shape: f32[2,3,256], index: 2, kind: input, shape index: {}]   ;;  %s2516_s3 = inlined_call_operand.vmem [shape: f32[2,128,3], index: 3, kind: input, shape index: {}]   ;;  %s2517_s4 = inlined_call_operand.vmem [shape: f32[2,4,8], index: 4, kind: output, shape index: {}]  }
   0x1   :  { %s1943_s17 = smov 0  }
   0x2 LB: > { %s26_s18 = sadd.s32 1, %s1905_s16  ;;  %p1515_p0 = scmp.ge.s32.totalorder %s1909_s17, 1  ;;  %s1909_s17 = sphi %s1943_s17, %s14_s17   ;;  %s1905_s16 = sphi %s1941_s16, %s2519_s16   ;;  %s1901_s15 = sphi %s1939_s15, %s2518_s15  }
   0x3   : > { %p28_p1 = scmp.ge.s32.totalorder %s26_s18, 2  ;;  %p218_p2 = scmp.lt.s32.totalorder %s1909_s17, 3 }
   0x5   : > { %s2521_s18 = smov (%p28_p1, %s26_s18), 0  ;;  %p219_p3 = pnand %p1515_p0, %p218_p2 }
   0x6   : > { %p267_p4 = scmp.lt.s32.totalorder (!%p219_p3), %s1901_s15, 1  ;;  %s1913_s8 = smov (!%p219_p3), 3  }
   0x7   : > { %222 = sbr.rel (%p219_p3) target bundleno = 1036 (0x40c), region = 36 }
   0xc   : > { %s2523_s15 = smov (!%p267_p4, %s1901_s15), 1  ;;  %vm491_vm0 = vcmask 261120   ;;  %vm1262_vm1 = vcmask 23552   ;;  %vm1252_vm2 = vcmask 1042432   ;;  %vm308_vm3 = vcmask 2048  }
   0xd   : > { %s1562_s19 = sshll.u32 %s2523_s15, 7  ;;  %s1563_s20 = sshll.u32 %s2523_s15, 4  ;;  %vm310_vm4 = vcmask 16384   ;;  %vm306_vm5 = vcmask 18432   ;;  %vm312_vm6 = vcmask 60416   ;;  %vm1399_vm7 = vcmask 26648  }
   0xe   : > { %s1966_s23 = scalar_lea.vmem %s2513_s0, %s1562_s19  ;;  %s280_s26 = scalar_lea.vmem %s2514_s1, %s1563_s20 }
   0xf   : > { %v1756_v0 = vld [vmem:[%s280_s26 + $0x8] sm:$0xff]   ;;  %v1757_v1 = vld [vmem:[%s280_s26] sm:$0xff]   ;;  %v318_v10 = vld [vmem:[%s1966_s23 + $0x10] sm:$0xf]  ;;  %s2120_s29 = scalar_lea.vmem %s2516_s3, %s1562_s19  ;;  %s1564_s30 = sshll.u32 %s2523_s15, 3 }
  0x10   : > { %1643 = vmatprep.subr.bf16.mxu0 %v1756_v0  ;;  %v314_v2 = vld [vmem:[%s1966_s23] sm:$0xf]  ;;  %v315_v3 = vld [vmem:[%s1966_s23 + $0x4] sm:$0xf]  ;;  %v316_v4 = vld [vmem:[%s1966_s23 + $0x8] sm:$0xf]  ;;  %s289_s7 = scalar_lea.vmem %s2515_s2, %s1564_s30 }
  0x11   : > { %1644 = vmatpush3.bf16.msra.mxu0 %v1756_v0  ;;  %v367_v5 = vmul.bf16 1043676725, %v314_v2  ;;  %v368_v6 = vmul.bf16 1043676725, %v315_v3  ;;  %v317_v7 = vld [vmem:[%s1966_s23 + $0xc] sm:$0xf] }
  0x12   : > { %1645 = vmatprep.subr.bf16.mxu0 %v1757_v1  ;;  %v369_v8 = vmul.bf16 1043676725, %v316_v4  ;;  %v370_v9 = vmul.bf16 1043676725, %v317_v7  ;;  %v319_v12 = vld [vmem:[%s1966_s23 + $0x14] sm:$0xf] }
  0x13   : > { %v1525_v11 = vcombine.low %v367_v5, %v368_v6  ;;  %v371_v13 = vmul.bf16 1043676725, %v318_v10  ;;  %v372_v15 = vmul.bf16 1043676725, %v319_v12  ;;  %v320_v16 = vld [vmem:[%s1966_s23 + $0x18] sm:$0xf] }
  0x14   : > { %v1526_v14 = vcombine.low %v369_v8, %v370_v9  ;;  %v321_v17 = vld [vmem:[%s1966_s23 + $0x1c] sm:$0xf]  ;;  %v322_v19 = vld [vmem:[%s1966_s23 + $0x20] sm:$0xf]  ;;  %v323_v20 = vld [vmem:[%s1966_s23 + $0x24] sm:$0xf] }
  0x15   : > { %1646 = vmatpush3.bf16.msra.mxu0 %v1757_v1  ;;  %1647 = vmatprep.mubr.msk.bf16.mxu0 %vm491_vm0, %v1525_v11  ;;  %v1527_v18 = vcombine.low %v371_v13, %v372_v15  ;;  %v373_v21 = vmul.bf16 1043676725, %v320_v16  ;;  %v374_v22 = vmul.bf16 1043676725, %v321_v17  ;;  %v375_v23 = vmul.bf16 1043676725, %v322_v19 }
  0x16   : > { %v376_v24 = vmul.bf16 1043676725, %v323_v20  ;;  %v324_v27 = vld [vmem:[%s1966_s23 + $0x28] sm:$0xf]  ;;  %v325_v28 = vld [vmem:[%s1966_s23 + $0x2c] sm:$0xf] }
  0x17   : > { %v1528_v25 = vcombine.low %v373_v21, %v374_v22  ;;  %v326_v29 = vld [vmem:[%s1966_s23 + $0x30] sm:$0xf]  ;;  %v327_v30 = vld [vmem:[%s1966_s23 + $0x34] sm:$0xf]  ;;  %v377_v31 = vmul.bf16 1043676725, %v324_v27 }
  0x18   : > { %1648 = vmatmul.mubr.msk.bf16.vlgmr.msra.gmra.mxu0 %vm491_vm0, %v1526_v14  ;;  %v1529_v26 = vcombine.low %v375_v23, %v376_v24  ;;  %v378_v32 = vmul.bf16 1043676725, %v325_v28  ;;  %v379_v33 = vmul.bf16 1043676725, %v326_v29  ;;  %v380_v34 = vmul.bf16 1043676725, %v327_v30 }
  0x19   : > { %1651 = vmatprep.mubr.msk.bf16.mxu0 %vm491_vm0, %v1527_v18  ;;  %v328_v37 = vld [vmem:[%s1966_s23 + $0x38] sm:$0xf]  ;;  %v329_v38 = vld [vmem:[%s1966_s23 + $0x3c] sm:$0xf]  ;;  %v330_v39 = vld [vmem:[%s1966_s23 + $0x40] sm:$0xf] }
  0x1a   : > { %v1530_v35 = vcombine.low %v377_v31, %v378_v32  ;;  %v1531_v36 = vcombine.low %v379_v33, %v380_v34  ;;  %v331_v40 = vld [vmem:[%s1966_s23 + $0x44] sm:$0xf]  ;;  %v381_v41 = vmul.bf16 1043676725, %v328_v37  ;;  %v382_v42 = vmul.bf16 1043676725, %v329_v38 }
  0x1b   : > { %v383_v43 = vmul.bf16 1043676725, %v330_v39  ;;  %v384_v44 = vmul.bf16 1043676725, %v331_v40  ;;  %v332_v47 = vld [vmem:[%s1966_s23 + $0x48] sm:$0xf] }
  0x1c   : > { %v1532_v45 = vcombine.low %v381_v41, %v382_v42  ;;  %v333_v48 = vld [vmem:[%s1966_s23 + $0x4c] sm:$0xf]  ;;  %v334_v49 = vld [vmem:[%s1966_s23 + $0x50] sm:$0xf]  ;;  %v335_v50 = vld [vmem:[%s1966_s23 + $0x54] sm:$0xf] }
  0x1d   : > { %v1533_v46 = vcombine.low %v383_v43, %v384_v44  ;;  %v385_v51 = vmul.bf16 1043676725, %v332_v47  ;;  %v386_v52 = vmul.bf16 1043676725, %v333_v48  ;;  %v387_v53 = vmul.bf16 1043676725, %v334_v49 }
  0x1e   : > { %v388_v54 = vmul.bf16 1043676725, %v335_v50  ;;  %v336_v57 = vld [vmem:[%s1966_s23 + $0x58] sm:$0xf]  ;;  %v337_v58 = vld [vmem:[%s1966_s23 + $0x5c] sm:$0xf] }
  0x1f   : > { %v1534_v55 = vcombine.low %v385_v51, %v386_v52  ;;  %v338_v59 = vld [vmem:[%s1966_s23 + $0x60] sm:$0xf]  ;;  %v339_v60 = vld [vmem:[%s1966_s23 + $0x64] sm:$0xf]  ;;  %v389_v61 = vmul.bf16 1043676725, %v336_v57 }
  0x20   : > { %1652 = vmatmul.mubr.msk.bf16.gmra.mxu0 %vm491_vm0, %v1528_v25  ;;  %v1535_v56 = vcombine.low %v387_v53, %v388_v54  ;;  %v390_v62 = vmul.bf16 1043676725, %v337_v58  ;;  %v391_v63 = vmul.bf16 1043676725, %v338_v59  ;;  %v392_v0 = vmul.bf16 1043676725, %v339_v60 }
  0x21   : > { %1655 = vmatprep.mubr.msk.bf16.mxu0 %vm491_vm0, %v1529_v26  ;;  %v340_v3 = vld [vmem:[%s1966_s23 + $0x68] sm:$0xf]  ;;  %v341_v4 = vld [vmem:[%s1966_s23 + $0x6c] sm:$0xf]  ;;  %v342_v5 = vld [vmem:[%s1966_s23 + $0x70] sm:$0xf] }
  0x22   : > { %v1536_v1 = vcombine.low %v389_v61, %v390_v62  ;;  %v1537_v2 = vcombine.low %v391_v63, %v392_v0  ;;  %v343_v6 = vld [vmem:[%s1966_s23 + $0x74] sm:$0xf]  ;;  %v393_v7 = vmul.bf16 1043676725, %v340_v3  ;;  %v394_v8 = vmul.bf16 1043676725, %v341_v4 }
  0x23   : > { %v395_v9 = vmul.bf16 1043676725, %v342_v5  ;;  %v396_v10 = vmul.bf16 1043676725, %v343_v6  ;;  %v344_v13 = vld [vmem:[%s1966_s23 + $0x78] sm:$0xf] }
  0x24   : > { %v1538_v11 = vcombine.low %v393_v7, %v394_v8  ;;  %v345_v14 = vld [vmem:[%s1966_s23 + $0x7c] sm:$0xf]  ;;  %v397_v15 = vmul.bf16 1043676725, %v344_v13  ;;  %v2123_v50 = vld [vmem:[%s2120_s29] sm:$0xff]  ;;  %v2126_v51 = vld [vmem:[%s2120_s29 + $0x8] sm:$0xff] }
  0x25   : > { %v1539_v12 = vcombine.low %v395_v9, %v396_v10  ;;  %v398_v16 = vmul.bf16 1043676725, %v345_v14  ;;  %v2129_v52 = vld [vmem:[%s2120_s29 + $0x10] sm:$0xff]  ;;  %v1356_v53 = vsel %vm1262_vm1, %v2123_v50, 0.0  ;;  %v1357_v54 = vsel %vm1262_vm1, %v2126_v51, 0.0  ;;  %v2141_v58 = vld [vmem:[%s2120_s29 + $0x20] sm:$0xff] }
  0x26   : > { %v1358_v57 = vadd.f32 %v1357_v54, %v1356_v53  ;;  %v363_v60 = vld [vmem:[%s2120_s29 + $0x60] sm:$0xff]  ;;  %v364_v61 = vld [vmem:[%s2120_s29 + $0x68] sm:$0xff]  ;;  %v365_v62 = vld [vmem:[%s2120_s29 + $0x70] sm:$0xff]  ;;  %s1524_s9 = sshll.u32 %s2523_s15, 2 }
  0x27   : > { %v1540_v17 = vcombine.low %v397_v15, %v398_v16  ;;  %v366_v0 = vld [vmem:[%s2120_s29 + $0x78] sm:$0xff]  ;;  %v1011_v5 = vpack.c.bf16 %v364_v61, %v363_v60  ;;  %v2157_v7 = vld [vmem:[%s2120_s29 + $0x30] sm:$0xff]  ;;  %v2167_v13 = vld [vmem:[%s2120_s29 + $0x40] sm:$0xff]  ;;  %s299_s12 = scalar_lea.vmem %s2517_s4, %s1524_s9 }
  0x28   : > { %1656 = vmatmul.mubr.msk.bf16.gmra.mxu0 %vm491_vm0, %v1530_v35  ;;  %v1012_v3 = vpack.c.bf16 %v366_v0, %v365_v62  ;;  %v1367_v9 = vsel %vm1262_vm1, %v2157_v7, 0.0  ;;  %v2162_v10 = vld [vmem:[%s2120_s29 + $0x38] sm:$0xff]  ;;  %v1371_v15 = vsel %vm1262_vm1, %v2167_v13, 0.0  ;;  %v2172_v16 = vld [vmem:[%s2120_s29 + $0x48] sm:$0xff]  ;;  %v2177_v54 = vld [vmem:[%s2120_s29 + $0x50] sm:$0xff] }
  0x29   : > { %1659 = vmatprep.mubr.msk.bf16.mxu0 %vm491_vm0, %v1531_v36  ;;  %v1373_v53 = vsel %vm1262_vm1, %v2172_v16, 0.0 }
  0x2a   : > { %1679 = vmatprep.subr.bf16.mxu1 %v1012_v3 }
  0x2b   : > { %1680 = vmatpush3.bf16.msra.mxu1 %v1012_v3 }
  0x2c   : > { %1681 = vmatprep.subr.bf16.mxu1 %v1011_v5 }
  0x2f   : > { %1682 = vmatpush3.bf16.msra.mxu1 %v1011_v5 }
  0x30   : > { %1660 = vmatmul.mubr.msk.bf16.gmra.mxu0 %vm491_vm0, %v1532_v45 }
  0x31   : > { %1663 = vmatprep.mubr.msk.bf16.mxu0 %vm491_vm0, %v1533_v46 }
  0x38   : > { %1664 = vmatmul.mubr.msk.bf16.gmra.mxu0 %vm491_vm0, %v1534_v55  ;;  %v1359_v55 = vsel %vm1262_vm1, %v2129_v52, 0.0 }
  0x39   : > { %1667 = vmatprep.mubr.msk.bf16.mxu0 %vm491_vm0, %v1535_v56  ;;  %v2138_v56 = vld [vmem:[%s2120_s29 + $0x18] sm:$0xff]  ;;  %v1360_v63 = vadd.f32 %v1359_v55, %v1358_v57  ;;  %v1375_v57 = vsel %vm1262_vm1, %v2177_v54, 0.0 }
  0x3a   : > { %v1361_v59 = vsel %vm1262_vm1, %v2138_v56, 0.0 }
  0x3b   : > { %v1362_v4 = vadd.f32 %v1361_v59, %v1360_v63  ;;  %v2182_v59 = vld [vmem:[%s2120_s29 + $0x58] sm:$0xff] }
  0x40   : > { %1668 = vmatmul.mubr.msk.bf16.gmra.mxu0 %vm491_vm0, %v1536_v1  ;;  %v1363_v1 = vsel %vm1262_vm1, %v2141_v58, 0.0 }
  0x41   : > { %1671 = vmatprep.mubr.msk.bf16.mxu0 %vm491_vm0, %v1537_v2  ;;  %v2152_v2 = vld [vmem:[%s2120_s29 + $0x28] sm:$0xff]  ;;  %v1364_v8 = vadd.f32 %v1363_v1, %v1362_v4  ;;  %v1377_v1 = vsel %vm1262_vm1, %v2182_v59, 0.0  ;;  %v1379_v4 = vsel %vm1262_vm1, %v363_v60, 0.0 }
  0x42   : > { %v1365_v6 = vsel %vm1262_vm1, %v2152_v2, 0.0 }
  0x48   : > { %1672 = vmatmul.mubr.msk.bf16.gmra.mxu0 %vm491_vm0, %v1538_v11  ;;  %v1366_v11 = vadd.f32 %v1365_v6, %v1364_v8  ;;  %v1381_v6 = vsel %vm1262_vm1, %v364_v61, 0.0 }
  0x49   : > { %1675 = vmatprep.mubr.msk.bf16.mxu0 %vm491_vm0, %v1539_v12  ;;  %v1369_v12 = vsel %vm1262_vm1, %v2162_v10, 0.0 }
  0x4a   : > { %v1368_v14 = vadd.f32 %v1367_v9, %v1366_v11  ;;  %v1383_v9 = vsel %vm1262_vm1, %v365_v62, 0.0 }
  0x50   : > { %1676 = vmatmul.mubr.msk.bf16.gmra.mxu0 %vm491_vm0, %v1540_v17  ;;  %v1370_v17 = vadd.f32 %v1369_v12, %v1368_v14  ;;  %v1385_v12 = vsel %vm1262_vm1, %v366_v0, 0.0 }
  0x52   : > { %v1372_v55 = vadd.f32 %v1371_v15, %v1370_v17 }
  0x54   : > { %v1374_v63 = vadd.f32 %v1373_v53, %v1372_v55 }
  0x56   : > { %v1376_v3 = vadd.f32 %v1375_v57, %v1374_v63 }
  0x58   : > { %v1378_v5 = vadd.f32 %v1377_v1, %v1376_v3 }
  0x5a   : > { %v1380_v8 = vadd.f32 %v1379_v4, %v1378_v5 }
  0x5c   : > { %v1382_v11 = vadd.f32 %v1381_v6, %v1380_v8 }
  0x5e   : > { %v1384_v14 = vadd.f32 %v1383_v9, %v1382_v11 }
  0x60   : > { %v2190_v15 = vadd.f32 %v1385_v12, %v1384_v14 }
  0xd8   : > { %v2019_v18 = vpop.f32.mrf.mxu0 }
  0xd9   : > { %705 = vmax.xlane.f32.xlu1 %v2019_v18 }
  0xda   : > { %v2022_v19 = vpop.f32.mrf.mxu0 }
  0xdb   : > { %701 = vmax.xlane.f32.xlu0 %v2022_v19 }
  0xdc   : > { %v2025_v20 = vpop.f32.mrf.mxu0 }
  0xdd   : > { %707 = vmax.xlane.f32.xlu1 %v2025_v20 }
  0xde   : > { %v2028_v21 = vpop.f32.mrf.mxu0 }
  0xdf   : > { %703 = vmax.xlane.f32.xlu0 %v2028_v21 }
  0xe0   : > { %v2031_v22 = vpop.f32.mrf.mxu0 }
  0xe2   : > { %v2033_v23 = vpop.f32.mrf.mxu0 }
  0xe3   : > { %709 = vmax.xlane.f32.xlu0 %v2033_v23 }
  0xe4   : > { %v2036_v24 = vpop.f32.mrf.mxu0 }
  0xe6   : > { %v2038_v25 = vpop.f32.mrf.mxu0 }
  0xe7   : > { %713 = vmax.xlane.f32.xlu0 %v2031_v22  ;;  %711 = vmax.xlane.f32.xlu1 %v2038_v25 }
  0xe8   : > { %v2042_v26 = vpop.f32.mrf.mxu0 }
  0xea   : > { %v2044_v27 = vpop.f32.mrf.mxu0 }
  0xeb   : > { %715 = vmax.xlane.f32.xlu1 %v2036_v24  ;;  %717 = vmax.xlane.f32.xlu0 %v2044_v27 }
  0xec   : > { %v2048_v28 = vpop.f32.mrf.mxu0 }
  0xee   : > { %v2050_v29 = vpop.f32.mrf.mxu0 }
  0xef   : > { %721 = vmax.xlane.f32.xlu0 %v2042_v26  ;;  %719 = vmax.xlane.f32.xlu1 %v2050_v29 }
  0xf0   : > { %v2054_v30 = vpop.f32.mrf.mxu0 }
  0xf2   : > { %v2056_v31 = vpop.f32.mrf.mxu0 }
  0xf3   : > { %723 = vmax.xlane.f32.xlu1 %v2048_v28  ;;  %725 = vmax.xlane.f32.xlu0 %v2056_v31 }
  0xf4   : > { %v2060_v32 = vpop.f32.mrf.mxu0 }
  0xf6   : > { %v2062_v33 = vpop.f32.mrf.mxu0 }
  0xf7   : > { %729 = vmax.xlane.f32.xlu0 %v2054_v30  ;;  %727 = vmax.xlane.f32.xlu1 %v2062_v33 }
  0xf8   : > { %v2066_v34 = vpop.f32.mrf.mxu0 }
  0xfa   : > { %v2068_v35 = vpop.f32.mrf.mxu0 }
  0xfb   : > { %731 = vmax.xlane.f32.xlu1 %v2060_v32  ;;  %733 = vmax.xlane.f32.xlu0 %v2068_v35 }
  0xfc   : > { %v2072_v36 = vpop.f32.mrf.mxu0 }
  0xfe   : > { %v2074_v37 = vpop.f32.mrf.mxu0 }
  0xff   : > { %737 = vmax.xlane.f32.xlu0 %v2066_v34  ;;  %735 = vmax.xlane.f32.xlu1 %v2074_v37 }
 0x100   : > { %v2078_v38 = vpop.f32.mrf.mxu0 }
 0x102   : > { %v2080_v39 = vpop.f32.mrf.mxu0 }
 0x103   : > { %739 = vmax.xlane.f32.xlu1 %v2072_v36  ;;  %741 = vmax.xlane.f32.xlu0 %v2080_v39 }
 0x104   : > { %v2084_v40 = vpop.f32.mrf.mxu0 }
 0x106   : > { %v2086_v41 = vpop.f32.mrf.mxu0 }
 0x107   : > { %745 = vmax.xlane.f32.xlu0 %v2078_v38  ;;  %743 = vmax.xlane.f32.xlu1 %v2086_v41 }
 0x108   : > { %v2090_v42 = vpop.f32.mrf.mxu0 }
 0x10a   : > { %v2092_v43 = vpop.f32.mrf.mxu0 }
 0x10b   : > { %747 = vmax.xlane.f32.xlu1 %v2084_v40  ;;  %749 = vmax.xlane.f32.xlu0 %v2092_v43 }
 0x10c   : > { %v2096_v44 = vpop.f32.mrf.mxu0 }
 0x10e   : > { %v2098_v45 = vpop.f32.mrf.mxu0 }
 0x10f   : > { %753 = vmax.xlane.f32.xlu0 %v2090_v42  ;;  %751 = vmax.xlane.f32.xlu1 %v2098_v45 }
 0x110   : > { %v2102_v46 = vpop.f32.mrf.mxu0 }
 0x112   : > { %v2104_v47 = vpop.f32.mrf.mxu0 }
 0x113   : > { %755 = vmax.xlane.f32.xlu1 %v2096_v44  ;;  %757 = vmax.xlane.f32.xlu0 %v2104_v47 }
 0x114   : > { %v2108_v48 = vpop.f32.mrf.mxu0 }
 0x116   : > { %v2110_v49 = vpop.f32.mrf.mxu0 }
 0x117   : > { %761 = vmax.xlane.f32.xlu0 %v2102_v46  ;;  %759 = vmax.xlane.f32.xlu1 %v2110_v49 }
 0x11b   : > { %763 = vmax.xlane.f32.xlu1 %v2108_v48 }
 0x162   : > { %v706_v17 = vpop.xlane.xlu1 %705 }
 0x163   : > { %v767_v53 = vsub.f32 %v2019_v18, %v706_v17 }
 0x164   : > { %v702_v55 = vpop.xlane.xlu0 %701 }
 0x165   : > { %v765_v57 = vsub.f32 %v2022_v19, %v702_v55  ;;  %v801_v1 = vmul.f32 1.442695, %v767_v53 }
 0x166   : > { %v708_v63 = vpop.xlane.xlu1 %707 }
 0x167   : > { %v797_v60 = vmul.f32 1.442695, %v765_v57  ;;  %v768_v61 = vsub.f32 %v2025_v20, %v708_v63 }
 0x168   : > { %v704_v3 = vpop.xlane.xlu0 %703 }
 0x169   : > { %1759 = vpow2.f32 %v797_v60  ;;  %v766_v62 = vsub.f32 %v2028_v21, %v704_v3  ;;  %v803_v0 = vmul.f32 1.442695, %v768_v61 }
 0x16a   : > { %1761 = vpow2.f32 %v801_v1 }
 0x16b   : > { %v799_v4 = vmul.f32 1.442695, %v766_v62 }
 0x16c   : > { %v710_v5 = vpop.xlane.xlu0 %709 }
 0x16d   : > { %1763 = vpow2.f32 %v799_v4  ;;  %v769_v6 = vsub.f32 %v2033_v23, %v710_v5 }
 0x16e   : > { %1765 = vpow2.f32 %v803_v0 }
 0x16f   : > { %v805_v18 = vmul.f32 1.442695, %v769_v6 }
 0x170   : > { %v714_v8 = vpop.xlane.xlu0 %713  ;;  %v712_v19 = vpop.xlane.xlu1 %711 }
 0x171   : > { %1767 = vpow2.f32 %v805_v18  ;;  %v771_v9 = vsub.f32 %v2031_v22, %v714_v8  ;;  %v770_v20 = vsub.f32 %v2038_v25, %v712_v19 }
 0x173   : > { %v809_v11 = vmul.f32 1.442695, %v771_v9  ;;  %v807_v12 = vmul.f32 1.442695, %v770_v20 }
 0x174   : > { %v716_v14 = vpop.xlane.xlu1 %715  ;;  %v718_v21 = vpop.xlane.xlu0 %717 }
 0x175   : > { %1769 = vpow2.f32 %v809_v11  ;;  %v772_v17 = vsub.f32 %v2036_v24, %v716_v14  ;;  %v773_v53 = vsub.f32 %v2044_v27, %v718_v21 }
 0x176   : > { %v2201_v55 = vpop.eup %1759  ;;  %1771 = vpow2.f32 %v807_v12 }
 0x177   : > { %v811_v23 = vmul.f32 1.442695, %v772_v17  ;;  %v813_v57 = vmul.f32 1.442695, %v773_v53  ;;  %861 = vadd.xlane.f32.xlu0 %v2201_v55  ;;  %v2204_v60 = vpop.eup %1761 }
 0x178   : > { %v722_v63 = vpop.xlane.xlu0 %721  ;;  %v720_v22 = vpop.xlane.xlu1 %719 }
 0x179   : > { %1773 = vpow2.f32 %v811_v23  ;;  %v775_v25 = vsub.f32 %v2042_v26, %v722_v63  ;;  %v774_v1 = vsub.f32 %v2050_v29, %v720_v22 }
 0x17a   : > { %v2208_v61 = vpop.eup %1763  ;;  %1775 = vpow2.f32 %v813_v57 }
 0x17b   : > { %v817_v24 = vmul.f32 1.442695, %v775_v25  ;;  %v815_v27 = vmul.f32 1.442695, %v774_v1  ;;  %865 = vadd.xlane.f32.xlu0 %v2204_v60  ;;  %863 = vadd.xlane.f32.xlu1 %v2208_v61  ;;  %v2212_v4 = vpop.eup %1765 }
 0x17c   : > { %v724_v3 = vpop.xlane.xlu1 %723  ;;  %v726_v62 = vpop.xlane.xlu0 %725 }
 0x17d   : > { %1777 = vpow2.f32 %v817_v24  ;;  %v776_v0 = vsub.f32 %v2048_v28, %v724_v3  ;;  %v777_v26 = vsub.f32 %v2056_v31, %v726_v62  ;;  %v1010_v28 = vpack.c.bf16 %v2182_v59, %v2177_v54 }
 0x17e   : > { %v2216_v5 = vpop.eup %1767  ;;  %1779 = vpow2.f32 %v815_v27  ;;  %v1009_v59 = vpack.c.bf16 %v2172_v16, %v2167_v13  ;;  %v1008_v13 = vpack.c.bf16 %v2162_v10, %v2157_v7  ;;  %v1007_v7 = vpack.c.bf16 %v2152_v2, %v2141_v58 }
 0x17f   : > { %v819_v29 = vmul.f32 1.442695, %v776_v0  ;;  %v821_v6 = vmul.f32 1.442695, %v777_v26  ;;  %869 = vadd.xlane.f32.xlu0 %v2216_v5  ;;  %867 = vadd.xlane.f32.xlu1 %v2212_v4 }
 0x180   : > { %v730_v18 = vpop.xlane.xlu0 %729  ;;  %v728_v8 = vpop.xlane.xlu1 %727  ;;  %1683 = vmatprep.subr.bf16.mxu1 %v1010_v28 }
 0x181   : > { %1781 = vpow2.f32 %v819_v29  ;;  %v779_v19 = vsub.f32 %v2054_v30, %v730_v18  ;;  %v778_v9 = vsub.f32 %v2062_v33, %v728_v8  ;;  %1684 = vmatpush3.bf16.msra.mxu1 %v1010_v28  ;;  %v1006_v8 = vpack.c.bf16 %v2138_v56, %v2129_v52 }
 0x182   : > { %v2224_v31 = vpop.eup %1769  ;;  %1783 = vpow2.f32 %v821_v6  ;;  %1685 = vmatprep.subr.bf16.mxu1 %v1009_v59  ;;  %v1005_v56 = vpack.c.bf16 %v2126_v51, %v2123_v50 }
 0x183   : > { %v2226_v20 = vpop.eup %1771  ;;  %v825_v11 = vmul.f32 1.442695, %v779_v19  ;;  %v823_v12 = vmul.f32 1.442695, %v778_v9  ;;  %873 = vadd.xlane.f32.xlu0 %v2224_v31 }
 0x184   : > { %871 = vadd.xlane.f32.xlu1 %v2226_v20  ;;  %v732_v14 = vpop.xlane.xlu1 %731  ;;  %v734_v21 = vpop.xlane.xlu0 %733 }
 0x185   : > { %1785 = vpow2.f32 %v825_v11  ;;  %v780_v30 = vsub.f32 %v2060_v32, %v732_v14  ;;  %v781_v33 = vsub.f32 %v2068_v35, %v734_v21  ;;  %1686 = vmatpush3.bf16.msra.mxu1 %v1009_v59 }
 0x186   : > { %v2232_v54 = vpop.eup %1773  ;;  %1787 = vpow2.f32 %v823_v12  ;;  %1687 = vmatprep.subr.bf16.mxu1 %v1008_v13 }
 0x187   : > { %v2236_v17 = vpop.eup %1775  ;;  %v827_v53 = vmul.f32 1.442695, %v780_v30  ;;  %v829_v23 = vmul.f32 1.442695, %v781_v33 }
 0x188   : > { %877 = vadd.xlane.f32.xlu0 %v2236_v17  ;;  %875 = vadd.xlane.f32.xlu1 %v2232_v54  ;;  %v738_v57 = vpop.xlane.xlu0 %737  ;;  %v736_v63 = vpop.xlane.xlu1 %735 }
 0x189   : > { %1789 = vpow2.f32 %v827_v53  ;;  %v783_v32 = vsub.f32 %v2066_v34, %v738_v57  ;;  %v782_v35 = vsub.f32 %v2074_v37, %v736_v63  ;;  %1688 = vmatpush3.bf16.msra.mxu1 %v1008_v13 }
 0x18a   : > { %v2242_v22 = vpop.eup %1777  ;;  %1791 = vpow2.f32 %v829_v23  ;;  %1689 = vmatprep.subr.bf16.mxu1 %v1007_v7 }
 0x18b   : > { %v2246_v16 = vpop.eup %1779  ;;  %v833_v25 = vmul.f32 1.442695, %v783_v32  ;;  %v831_v1 = vmul.f32 1.442695, %v782_v35 }
 0x18c   : > { %881 = vadd.xlane.f32.xlu0 %v2242_v22  ;;  %879 = vadd.xlane.f32.xlu1 %v2246_v16  ;;  %v740_v24 = vpop.xlane.xlu1 %739  ;;  %v742_v34 = vpop.xlane.xlu0 %741 }
 0x18d   : > { %1793 = vpow2.f32 %v833_v25  ;;  %v784_v37 = vsub.f32 %v2072_v36, %v740_v24  ;;  %v785_v27 = vsub.f32 %v2080_v39, %v742_v34  ;;  %1690 = vmatpush3.bf16.msra.mxu1 %v1007_v7 }
 0x18e   : > { %v2252_v3 = vpop.eup %1781  ;;  %1795 = vpow2.f32 %v831_v1  ;;  %1691 = vmatprep.subr.bf16.mxu1 %v1006_v8 }
 0x18f   : > { %v2256_v10 = vpop.eup %1783  ;;  %v835_v62 = vmul.f32 1.442695, %v784_v37  ;;  %v837_v0 = vmul.f32 1.442695, %v785_v27  ;;  %v2306_v37 = vld [vmem:[%s289_s7] sm:$0x77] }
 0x190   : > { %885 = vadd.xlane.f32.xlu0 %v2256_v10  ;;  %883 = vadd.xlane.f32.xlu1 %v2252_v3  ;;  %v746_v26 = vpop.xlane.xlu0 %745  ;;  %v744_v36 = vpop.xlane.xlu1 %743 }
 0x191   : > { %1797 = vpow2.f32 %v835_v62  ;;  %v787_v39 = vsub.f32 %v2078_v38, %v746_v26  ;;  %v786_v29 = vsub.f32 %v2086_v41, %v744_v36  ;;  %1692 = vmatpush3.bf16.msra.mxu1 %v1006_v8 }
 0x192   : > { %v2262_v6 = vpop.eup %1785  ;;  %1799 = vpow2.f32 %v837_v0  ;;  %1693 = vmatprep.subr.bf16.mxu1 %v1005_v56 }
 0x193   : > { %v2264_v58 = vpop.eup %1787  ;;  %v841_v2 = vmul.f32 1.442695, %v787_v39  ;;  %v839_v18 = vmul.f32 1.442695, %v786_v29  ;;  %v1253_v29 = vsel %vm1252_vm2, %v2306_v37, 0.0 }
 0x194   : > { %889 = vadd.xlane.f32.xlu0 %v2262_v6  ;;  %887 = vadd.xlane.f32.xlu1 %v2264_v58  ;;  %v748_v19 = vpop.xlane.xlu1 %747  ;;  %v750_v38 = vpop.xlane.xlu0 %749 }
 0x195   : > { %1801 = vpow2.f32 %v841_v2  ;;  %v788_v41 = vsub.f32 %v2084_v40, %v748_v19  ;;  %v789_v9 = vsub.f32 %v2092_v43, %v750_v38  ;;  %1694 = vmatpush3.bf16.msra.mxu1 %v1005_v56 }
 0x196   : > { %v2272_v28 = vpop.eup %1789  ;;  %1803 = vpow2.f32 %v839_v18 }
 0x197   : > { %v2274_v11 = vpop.eup %1791  ;;  %v843_v12 = vmul.f32 1.442695, %v788_v41  ;;  %v845_v52 = vmul.f32 1.442695, %v789_v9  ;;  %v1911_v41 = vmov 0.0   ;;  %v1912_v9 = vmov 0  }
 0x198   : > { %893 = vadd.xlane.f32.xlu0 %v2274_v11  ;;  %891 = vadd.xlane.f32.xlu1 %v2272_v28  ;;  %v754_v14 = vpop.xlane.xlu0 %753  ;;  %v752_v40 = vpop.xlane.xlu1 %751  ;;  %309 = vst.msk [vmem:[#allocation3] sm:$0x7] %vm308_vm3, %v1911_v41 }
 0x199   : > { %1805 = vpow2.f32 %v843_v12  ;;  %v791_v43 = vsub.f32 %v2090_v42, %v754_v14  ;;  %v790_v21 = vsub.f32 %v2098_v45, %v752_v40  ;;  %311 = vst.msk [vmem:[#allocation4] sm:$0x1] %vm310_vm4, %v1911_v41  ;;  %1754 = vset.pattern.permute.xlu1 %v1912_v9  ;;  %1755 = vset.pattern.permute.xlu0 %v1912_v9 }
 0x19a   : > { %v2282_v30 = vpop.eup %1793  ;;  %1807 = vpow2.f32 %v845_v52  ;;  %307 = vst.msk [vmem:[#allocation2] sm:$0x7] %vm306_vm5, %v1911_v41 }
 0x19b   : > { %v2284_v33 = vpop.eup %1795  ;;  %v849_v59 = vmul.f32 1.442695, %v791_v43  ;;  %v847_v50 = vmul.f32 1.442695, %v790_v21  ;;  %313 = vst.msk [vmem:[%s299_s12] sm:$0xf] %vm312_vm6, %v1911_v41 }
 0x19c   : > { %897 = vadd.xlane.f32.xlu0 %v2282_v30  ;;  %895 = vadd.xlane.f32.xlu1 %v2284_v33  ;;  %v756_v51 = vpop.xlane.xlu1 %755  ;;  %v758_v53 = vpop.xlane.xlu0 %757 }
 0x19d   : > { %1809 = vpow2.f32 %v849_v59  ;;  %v792_v42 = vsub.f32 %v2096_v44, %v756_v51  ;;  %v793_v45 = vsub.f32 %v2104_v47, %v758_v53 }
 0x19e   : > { %v2290_v23 = vpop.eup %1797  ;;  %1811 = vpow2.f32 %v847_v50 }
 0x19f   : > { %v2292_v57 = vpop.eup %1799  ;;  %v851_v63 = vmul.f32 1.442695, %v792_v42  ;;  %v853_v32 = vmul.f32 1.442695, %v793_v45 }
 0x1a0   : > { %901 = vadd.xlane.f32.xlu0 %v2292_v57  ;;  %899 = vadd.xlane.f32.xlu1 %v2290_v23  ;;  %v762_v35 = vpop.xlane.xlu0 %761  ;;  %v760_v13 = vpop.xlane.xlu1 %759 }
 0x1a1   : > { %1813 = vpow2.f32 %v851_v63  ;;  %v795_v25 = vsub.f32 %v2102_v46, %v762_v35  ;;  %v794_v44 = vsub.f32 %v2110_v49, %v760_v13  ;;  %v1176_v49 = vcombine.high %v2306_v37, %v2306_v37 }
 0x1a2   : > { %v2299_v47 = vpop.eup %1801  ;;  %1815 = vpow2.f32 %v853_v32 }
 0x1a3   : > { %v2304_v1 = vpop.eup %1803  ;;  %v857_v24 = vmul.f32 1.442695, %v795_v25  ;;  %v855_v34 = vmul.f32 1.442695, %v794_v44  ;;  %1242 = vmatprep.mubr.f32.mxu0 %v1176_v49  ;;  %v1254_v2 = vsel %vm1252_vm2, %v1176_v49, 0.0 }
 0x1a4   : > { %905 = vadd.xlane.f32.xlu0 %v2299_v47  ;;  %903 = vadd.xlane.f32.xlu1 %v2304_v1  ;;  %v764_v46 = vpop.xlane.xlu1 %763  ;;  %v1255_v19 = vadd.f32 %v1254_v2, %v1253_v29 }
 0x1a5   : > { %1817 = vpow2.f32 %v857_v24  ;;  %v796_v27 = vsub.f32 %v2108_v48, %v764_v46 }
 0x1a6   : > { %v2313_v7 = vpop.eup %1805  ;;  %1819 = vpow2.f32 %v855_v34 }
 0x1a7   : > { %v2315_v62 = vpop.eup %1807  ;;  %v859_v0 = vmul.f32 1.442695, %v796_v27 }
 0x1a8   : > { %909 = vadd.xlane.f32.xlu0 %v2315_v62  ;;  %907 = vadd.xlane.f32.xlu1 %v2313_v7 }
 0x1a9   : > { %1821 = vpow2.f32 %v859_v0 }
 0x1aa   : > { %v2319_v26 = vpop.eup %1809 }
 0x1ab   : > { %v2321_v36 = vpop.eup %1811 }
 0x1ac   : > { %913 = vadd.xlane.f32.xlu0 %v2319_v26  ;;  %911 = vadd.xlane.f32.xlu1 %v2321_v36 }
 0x1ae   : > { %v2325_v48 = vpop.eup %1813 }
 0x1af   : > { %v2327_v39 = vpop.eup %1815 }
 0x1b0   : > { %917 = vadd.xlane.f32.xlu0 %v2327_v39  ;;  %915 = vadd.xlane.f32.xlu1 %v2325_v48 }
 0x1b2   : > { %v2332_v18 = vpop.eup %1817 }
 0x1b3   : > { %v2334_v8 = vpop.eup %1819 }
 0x1b4   : > { %921 = vadd.xlane.f32.xlu0 %v2332_v18  ;;  %919 = vadd.xlane.f32.xlu1 %v2334_v8 }
 0x1b6   : > { %v2338_v38 = vpop.eup %1821 }
 0x1b8   : > { %923 = vadd.xlane.f32.xlu1 %v2338_v38  ;;  %1256 = vadd.xlane.f32.xlu0 %v1255_v19 }
 0x200   : > { %v862_v12 = vpop.xlane.xlu0 %861 }
 0x201   : > { %1823 = vrcp.f32 %v862_v12 }
 0x204   : > { %v866_v52 = vpop.xlane.xlu0 %865  ;;  %v864_v56 = vpop.xlane.xlu1 %863 }
 0x205   : > { %1825 = vrcp.f32 %v864_v56 }
 0x206   : > { %1827 = vrcp.f32 %v866_v52 }
 0x208   : > { %v870_v14 = vpop.xlane.xlu0 %869  ;;  %v868_v40 = vpop.xlane.xlu1 %867 }
 0x209   : > { %1829 = vrcp.f32 %v868_v40 }
 0x20a   : > { %1831 = vrcp.f32 %v870_v14 }
 0x20c   : > { %v874_v43 = vpop.xlane.xlu0 %873 }
 0x20d   : > { %v872_v21 = vpop.xlane.xlu1 %871 }
 0x20e   : > { %1833 = vrcp.f32 %v872_v21  ;;  %v1824_v59 = vpop.eup %1823 }
 0x20f   : > { %1835 = vrcp.f32 %v874_v43  ;;  %v957_v42 = vmul.f32 %v1824_v59, %v2201_v55 }
 0x211   : > { %v878_v50 = vpop.xlane.xlu0 %877  ;;  %v876_v51 = vpop.xlane.xlu1 %875 }
 0x212   : > { %v1826_v53 = vpop.eup %1825  ;;  %1837 = vrcp.f32 %v876_v51 }
 0x213   : > { %v958_v45 = vmul.f32 %v1826_v53, %v2208_v61  ;;  %v1828_v63 = vpop.eup %1827  ;;  %1839 = vrcp.f32 %v878_v50 }
 0x214   : > { %v959_v44 = vmul.f32 %v1828_v63, %v2204_v60 }
 0x215   : > { %v882_v32 = vpop.xlane.xlu0 %881  ;;  %v880_v35 = vpop.xlane.xlu1 %879  ;;  %v989_v13 = vpack.c.bf16 %v958_v45, %v957_v42 }
 0x216   : > { %v1830_v25 = vpop.eup %1829  ;;  %1841 = vrcp.f32 %v880_v35 }
 0x217   : > { %1695 = vmatprep.mubr.bf16.mxu1 %v989_v13  ;;  %v960_v24 = vmul.f32 %v1830_v25, %v2212_v4  ;;  %v1832_v34 = vpop.eup %1831  ;;  %1843 = vrcp.f32 %v882_v32 }
 0x218   : > { %v961_v61 = vmul.f32 %v1832_v34, %v2216_v5 }
 0x219   : > { %v886_v46 = vpop.xlane.xlu0 %885  ;;  %v884_v49 = vpop.xlane.xlu1 %883  ;;  %v990_v27 = vpack.c.bf16 %v960_v24, %v959_v44 }
 0x21a   : > { %1845 = vrcp.f32 %v884_v49 }
 0x21b   : > { %v1834_v55 = vpop.eup %1833  ;;  %1696 = vmatmul.mubr.bf16.vlgmr.msra.gmra.mxu1 %v990_v27  ;;  %1847 = vrcp.f32 %v886_v46 }
 0x21c   : > { %v962_v0 = vmul.f32 %v1834_v55, %v2226_v20  ;;  %v1836_v19 = vpop.eup %1835 }
 0x21d   : > { %v890_v29 = vpop.xlane.xlu0 %889  ;;  %v888_v2 = vpop.xlane.xlu1 %887  ;;  %v963_v52 = vmul.f32 %v1836_v19, %v2224_v31 }
 0x21e   : > { %v991_v9 = vpack.c.bf16 %v962_v0, %v961_v61  ;;  %1849 = vrcp.f32 %v888_v2 }
 0x21f   : > { %v1838_v60 = vpop.eup %1837  ;;  %1851 = vrcp.f32 %v890_v29 }
 0x220   : > { %1699 = vmatprep.mubr.bf16.mxu1 %v991_v9  ;;  %v964_v56 = vmul.f32 %v1838_v60, %v2232_v54  ;;  %v1840_v14 = vpop.eup %1839 }
 0x221   : > { %v894_v4 = vpop.xlane.xlu0 %893  ;;  %v892_v12 = vpop.xlane.xlu1 %891  ;;  %v965_v21 = vmul.f32 %v1840_v14, %v2236_v17 }
 0x222   : > { %1853 = vrcp.f32 %v892_v12  ;;  %v992_v5 = vpack.c.bf16 %v964_v56, %v963_v52 }
 0x223   : > { %v1842_v40 = vpop.eup %1841  ;;  %1855 = vrcp.f32 %v894_v4 }
 0x224   : > { %1700 = vmatmul.mubr.bf16.gmra.mxu1 %v992_v5  ;;  %v966_v59 = vmul.f32 %v1842_v40, %v2246_v16  ;;  %v1844_v50 = vpop.eup %1843 }
 0x225   : > { %v898_v20 = vpop.xlane.xlu0 %897  ;;  %v896_v43 = vpop.xlane.xlu1 %895  ;;  %v967_v42 = vmul.f32 %v1844_v50, %v2242_v22 }
 0x226   : > { %1857 = vrcp.f32 %v896_v43  ;;  %v993_v51 = vpack.c.bf16 %v966_v59, %v965_v21  ;;  %v1251_v43 = vld [vmem:[#allocation3] sm:$0x7] }
 0x227   : > { %v1846_v53 = vpop.eup %1845  ;;  %1859 = vrcp.f32 %v898_v20 }
 0x228   : > { %1703 = vmatprep.mubr.bf16.mxu1 %v993_v51  ;;  %v968_v45 = vmul.f32 %v1846_v53, %v2252_v3  ;;  %v1848_v63 = vpop.eup %1847 }
 0x229   : > { %v902_v31 = vpop.xlane.xlu0 %901  ;;  %v900_v54 = vpop.xlane.xlu1 %899  ;;  %v969_v13 = vmul.f32 %v1848_v63, %v2256_v10 }
 0x22a   : > { %1861 = vrcp.f32 %v900_v54  ;;  %v994_v32 = vpack.c.bf16 %v968_v45, %v967_v42 }
 0x22b   : > { %v1850_v35 = vpop.eup %1849  ;;  %1863 = vrcp.f32 %v902_v31 }
 0x22c   : > { %1704 = vmatmul.mubr.bf16.gmra.mxu1 %v994_v32  ;;  %v970_v25 = vmul.f32 %v1850_v35, %v2264_v58  ;;  %v1852_v44 = vpop.eup %1851 }
 0x22d   : > { %v906_v17 = vpop.xlane.xlu0 %905  ;;  %v904_v16 = vpop.xlane.xlu1 %903  ;;  %v971_v46 = vmul.f32 %v1852_v44, %v2262_v6 }
 0x22e   : > { %1865 = vrcp.f32 %v904_v16  ;;  %v995_v24 = vpack.c.bf16 %v970_v25, %v969_v13 }
 0x22f   : > { %v1854_v34 = vpop.eup %1853  ;;  %1867 = vrcp.f32 %v906_v17 }
 0x230   : > { %1707 = vmatprep.mubr.bf16.mxu1 %v995_v24  ;;  %v972_v49 = vmul.f32 %v1854_v34, %v2272_v28  ;;  %v1856_v27 = vpop.eup %1855 }
 0x231   : > { %v910_v22 = vpop.xlane.xlu0 %909  ;;  %v908_v3 = vpop.xlane.xlu1 %907  ;;  %v973_v0 = vmul.f32 %v1856_v27, %v2274_v11 }
 0x232   : > { %1869 = vrcp.f32 %v908_v3  ;;  %v996_v55 = vpack.c.bf16 %v972_v49, %v971_v46 }
 0x233   : > { %v1858_v61 = vpop.eup %1857  ;;  %1871 = vrcp.f32 %v910_v22 }
 0x234   : > { %1708 = vmatmul.mubr.bf16.gmra.mxu1 %v996_v55  ;;  %v974_v29 = vmul.f32 %v1858_v61, %v2284_v33  ;;  %v1860_v2 = vpop.eup %1859 }
 0x235   : > { %v914_v10 = vpop.xlane.xlu0 %913  ;;  %v912_v58 = vpop.xlane.xlu1 %911  ;;  %v975_v60 = vmul.f32 %v1860_v2, %v2282_v30 }
 0x236   : > { %1873 = vrcp.f32 %v912_v58  ;;  %v997_v19 = vpack.c.bf16 %v974_v29, %v973_v0 }
 0x237   : > { %v1862_v9 = vpop.eup %1861  ;;  %1875 = vrcp.f32 %v914_v10 }
 0x238   : > { %1711 = vmatprep.mubr.bf16.mxu1 %v997_v19  ;;  %v976_v4 = vmul.f32 %v1862_v9, %v2290_v23  ;;  %v1864_v12 = vpop.eup %1863 }
 0x239   : > { %v918_v6 = vpop.xlane.xlu0 %917  ;;  %v916_v28 = vpop.xlane.xlu1 %915  ;;  %v977_v14 = vmul.f32 %v1864_v12, %v2292_v57 }
 0x23a   : > { %1877 = vrcp.f32 %v916_v28  ;;  %v998_v52 = vpack.c.bf16 %v976_v4, %v975_v60 }
 0x23b   : > { %v1866_v56 = vpop.eup %1865  ;;  %1879 = vrcp.f32 %v918_v6 }
 0x23c   : > { %1712 = vmatmul.mubr.bf16.gmra.mxu1 %v998_v52  ;;  %v978_v5 = vmul.f32 %v1866_v56, %v2304_v1  ;;  %v1868_v40 = vpop.eup %1867 }
 0x23d   : > { %v922_v11 = vpop.xlane.xlu0 %921  ;;  %v920_v33 = vpop.xlane.xlu1 %919  ;;  %v979_v23 = vmul.f32 %v1868_v40, %v2299_v47 }
 0x23e   : > { %1881 = vrcp.f32 %v920_v33  ;;  %v999_v20 = vpack.c.bf16 %v978_v5, %v977_v14 }
 0x23f   : > { %v1870_v21 = vpop.eup %1869  ;;  %1883 = vrcp.f32 %v922_v11 }
 0x240   : > { %1715 = vmatprep.mubr.bf16.mxu1 %v999_v20  ;;  %v980_v59 = vmul.f32 %v1870_v21, %v2313_v7  ;;  %v1872_v51 = vpop.eup %1871 }
 0x241   : > { %v924_v30 = vpop.xlane.xlu1 %923  ;;  %v1257_v50 = vpop.xlane.xlu0 %1256  ;;  %v981_v1 = vmul.f32 %v1872_v51, %v2315_v62 }
 0x242   : > { %1885 = vrcp.f32 %v924_v30  ;;  %v1258_v53 = vadd.f32 %v1257_v50, %v1251_v43  ;;  %v1000_v31 = vpack.c.bf16 %v980_v59, %v979_v23 }
 0x243   : > { %v1874_v57 = vpop.eup %1873 }
 0x244   : > { %1260 = vst.msk [vmem:[#allocation3] sm:$0x7] %vm308_vm3, %v1258_v53  ;;  %1716 = vmatmul.mubr.bf16.gmra.mxu1 %v1000_v31  ;;  %v982_v54 = vmul.f32 %v1874_v57, %v2321_v36  ;;  %v1876_v42 = vpop.eup %1875 }
 0x245   : > { %v983_v47 = vmul.f32 %v1876_v42, %v2319_v26 }
 0x246   : > { %v1001_v45 = vpack.c.bf16 %v982_v54, %v981_v1 }
 0x247   : > { %v1878_v63 = vpop.eup %1877 }
 0x248   : > { %1719 = vmatprep.mubr.bf16.mxu1 %v1001_v45  ;;  %v984_v7 = vmul.f32 %v1878_v63, %v2325_v48  ;;  %v1880_v32 = vpop.eup %1879 }
 0x249   : > { %v985_v25 = vmul.f32 %v1880_v32, %v2327_v39 }
 0x24a   : > { %v1002_v35 = vpack.c.bf16 %v984_v7, %v983_v47 }
 0x24b   : > { %v1338_v17 = vld [vmem:[#allocation3] sm:$0x7]  ;;  %v1882_v16 = vpop.eup %1881 }
 0x24c   : > { %1344 = vperm.xlu1 %1754, %v1338_v17   ;;  %v1884_v13 = vpop.eup %1883  ;;  %1720 = vmatmul.mubr.bf16.gmra.mxu1 %v1002_v35  ;;  %v986_v62 = vmul.f32 %v1882_v16, %v2334_v8  ;;  %v1339_v48 = vmul.f32 0.00390625, %v1338_v17 }
 0x24d   : > { %v987_v24 = vmul.f32 %v1884_v13, %v2332_v18 }
 0x24e   : > { %v1003_v44 = vpack.c.bf16 %v986_v62, %v985_v25  ;;  %1396 = vrot.lane.b32.xlu0 %v1339_v48, %s1913_s8 }
 0x24f   : > { %v1886_v36 = vpop.eup %1885 }
 0x250   : > { %v988_v34 = vmul.f32 %v1886_v36, %v2338_v38  ;;  %1723 = vmatprep.mubr.bf16.mxu1 %v1003_v44 }
 0x252   : > { %v1004_v26 = vpack.c.bf16 %v988_v34, %v987_v24 }
 0x254   : > { %1724 = vmatmul.mubr.bf16.gmra.mxu1 %v1004_v26 }
 0x2db   : > { %v2378_v22 = vpop.f32.mrf.mxu1 }
 0x2dc   : > { %v1266_v49 = vsel %vm1262_vm1, %v2378_v22, 0.0 }
 0x2dd   : > { %v2380_v3 = vpop.f32.mrf.mxu1 }
 0x2de   : > { %v1263_v8 = vsel %vm1262_vm1, %v2380_v3, 0.0 }
 0x2df   : > { %v2382_v46 = vpop.f32.mrf.mxu1 }
 0x2e0   : > { %v1268_v61 = vsel %vm1262_vm1, %v2382_v46, 0.0 }
 0x2e1   : > { %v2384_v39 = vpop.f32.mrf.mxu1 }
 0x2e2   : > { %v1264_v18 = vsel %vm1262_vm1, %v2384_v39, 0.0 }
 0x2e3   : > { %v1265_v38 = vadd.f32 %v1264_v18, %v1263_v8 }
 0x2e4   : > { %v2392_v27 = vpop.f32.mrf.mxu1 }
 0x2e5   : > { %v1267_v55 = vadd.f32 %v1266_v49, %v1265_v38  ;;  %v1274_v60 = vsel %vm1262_vm1, %v2392_v27, 0.0 }
 0x2e6   : > { %v2396_v10 = vpop.f32.mrf.mxu1 }
 0x2e7   : > { %v1269_v58 = vadd.f32 %v1268_v61, %v1267_v55  ;;  %v1270_v0 = vsel %vm1262_vm1, %v2396_v10, 0.0 }
 0x2e8   : > { %v2400_v29 = vpop.f32.mrf.mxu1 }
 0x2e9   : > { %v1271_v2 = vadd.f32 %v1270_v0, %v1269_v58  ;;  %v1276_v52 = vsel %vm1262_vm1, %v2400_v29, 0.0 }
 0x2ea   : > { %v2402_v19 = vpop.f32.mrf.mxu1 }
 0x2eb   : > { %v1272_v9 = vsel %vm1262_vm1, %v2402_v19, 0.0 }
 0x2ec   : > { %v1273_v6 = vadd.f32 %v1272_v9, %v1271_v2  ;;  %v2406_v28 = vpop.f32.mrf.mxu1 }
 0x2ed   : > { %v1282_v21 = vsel %vm1262_vm1, %v2406_v28, 0.0 }
 0x2ee   : > { %v1275_v4 = vadd.f32 %v1274_v60, %v1273_v6  ;;  %v2410_v12 = vpop.f32.mrf.mxu1 }
 0x2ef   : > { %v1278_v33 = vsel %vm1262_vm1, %v2410_v12, 0.0 }
 0x2f0   : > { %v1277_v56 = vadd.f32 %v1276_v52, %v1275_v4  ;;  %v2414_v11 = vpop.f32.mrf.mxu1 }
 0x2f1   : > { %v1284_v59 = vsel %vm1262_vm1, %v2414_v11, 0.0 }
 0x2f2   : > { %v1279_v14 = vadd.f32 %v1278_v33, %v1277_v56  ;;  %v2418_v5 = vpop.f32.mrf.mxu1 }
 0x2f3   : > { %v1280_v40 = vsel %vm1262_vm1, %v2418_v5, 0.0 }
 0x2f4   : > { %v1281_v20 = vadd.f32 %v1280_v40, %v1279_v14  ;;  %v2422_v43 = vpop.f32.mrf.mxu1 }
 0x2f5   : > { %v1290_v45 = vsel %vm1262_vm1, %v2422_v43, 0.0 }
 0x2f6   : > { %v1283_v30 = vadd.f32 %v1282_v21, %v1281_v20  ;;  %v2426_v23 = vpop.f32.mrf.mxu1 }
 0x2f7   : > { %v1286_v53 = vsel %vm1262_vm1, %v2426_v23, 0.0 }
 0x2f8   : > { %v1285_v50 = vadd.f32 %v1284_v59, %v1283_v30  ;;  %v1710_v51 = vpop.f32.mrf.mxu1 }
 0x2f9   : > { %v1292_v7 = vsel %vm1262_vm1, %v1710_v51, 0.0 }
 0x2fa   : > { %v1287_v31 = vadd.f32 %v1286_v53, %v1285_v50  ;;  %v1098_v57 = vpop.f32.mrf.mxu1 }
 0x2fb   : > { %v1288_v1 = vsel %vm1262_vm1, %v1098_v57, 0.0 }
 0x2fc   : > { %v1289_v54 = vadd.f32 %v1288_v1, %v1287_v31  ;;  %v2433_v42 = vpop.f32.mrf.mxu1 }
 0x2fd   : > { %v1298_v44 = vsel %vm1262_vm1, %v2433_v42, 0.0 }
 0x2fe   : > { %v1291_v63 = vadd.f32 %v1290_v45, %v1289_v54  ;;  %v2437_v47 = vpop.f32.mrf.mxu1 }
 0x2ff   : > { %v1294_v17 = vsel %vm1262_vm1, %v2437_v47, 0.0 }
 0x300   : > { %v1293_v32 = vadd.f32 %v1292_v7, %v1291_v63  ;;  %v2440_v35 = vpop.f32.mrf.mxu1 }
 0x301   : > { %v1300_v26 = vsel %vm1262_vm1, %v2440_v35, 0.0 }
 0x302   : > { %v1295_v16 = vadd.f32 %v1294_v17, %v1293_v32  ;;  %v2444_v13 = vpop.f32.mrf.mxu1 }
 0x303   : > { %v1296_v25 = vsel %vm1262_vm1, %v2444_v13, 0.0 }
 0x304   : > { %v1297_v62 = vadd.f32 %v1296_v25, %v1295_v16  ;;  %v2448_v36 = vpop.f32.mrf.mxu1 }
 0x305   : > { %v1306_v0 = vsel %vm1262_vm1, %v2448_v36, 0.0 }
 0x306   : > { %v1299_v24 = vadd.f32 %v1298_v44, %v1297_v62  ;;  %v2452_v34 = vpop.f32.mrf.mxu1 }
 0x307   : > { %v1302_v18 = vsel %vm1262_vm1, %v2452_v34, 0.0 }
 0x308   : > { %v1301_v48 = vadd.f32 %v1300_v26, %v1299_v24  ;;  %v1718_v8 = vpop.f32.mrf.mxu1 }
 0x309   : > { %v1308_v6 = vsel %vm1262_vm1, %v1718_v8, 0.0 }
 0x30a   : > { %v1303_v38 = vadd.f32 %v1302_v18, %v1301_v48  ;;  %v1130_v49 = vpop.f32.mrf.mxu1 }
 0x30b   : > { %v1304_v55 = vsel %vm1262_vm1, %v1130_v49, 0.0 }
 0x30c   : > { %v1305_v61 = vadd.f32 %v1304_v55, %v1303_v38  ;;  %v1721_v58 = vpop.f32.mrf.mxu1 }
 0x30d   : > { %v1314_v21 = vsel %vm1262_vm1, %v1721_v58, 0.0 }
 0x30e   : > { %v1307_v2 = vadd.f32 %v1306_v0, %v1305_v61  ;;  %v1143_v9 = vpop.f32.mrf.mxu1 }
 0x30f   : > { %v1310_v52 = vsel %vm1262_vm1, %v1143_v9, 0.0 }
 0x310   : > { %v1309_v60 = vadd.f32 %v1308_v6, %v1307_v2  ;;  %v1722_v4 = vpop.f32.mrf.mxu1 }
 0x311   : > { %v1316_v50 = vsel %vm1262_vm1, %v1722_v4, 0.0 }
 0x312   : > { %v1311_v56 = vadd.f32 %v1310_v52, %v1309_v60  ;;  %v1146_v33 = vpop.f32.mrf.mxu1 }
 0x313   : > { %v1312_v14 = vsel %vm1262_vm1, %v1146_v33, 0.0 }
 0x314   : > { %v1313_v40 = vadd.f32 %v1312_v14, %v1311_v56  ;;  %v1725_v20 = vpop.f32.mrf.mxu1 }
 0x315   : > { %v1322_v32 = vsel %vm1262_vm1, %v1725_v20, 0.0 }
 0x316   : > { %v1315_v30 = vadd.f32 %v1314_v21, %v1313_v40  ;;  %v1159_v59 = vpop.f32.mrf.mxu1 }
 0x317   : > { %v1318_v1 = vsel %vm1262_vm1, %v1159_v59, 0.0 }
 0x318   : > { %v1317_v53 = vadd.f32 %v1316_v50, %v1315_v30  ;;  %v1726_v31 = vpop.f32.mrf.mxu1 }
 0x319   : > { %1608 = vmatprep.subr.mxu0 %v1726_v31  ;;  %v1324_v16 = vsel %vm1262_vm1, %v1726_v31, 0.0 }
 0x31a   : > { %v1319_v54 = vadd.f32 %v1318_v1, %v1317_v53  ;;  %v1162_v45 = vpop.f32.mrf.mxu1  ;;  %1609 = vmatpush3.msra.mxu0 %v1710_v51 }
 0x31b   : > { %v1320_v63 = vsel %vm1262_vm1, %v1162_v45, 0.0  ;;  %1610 = vmatprep.subr.mxu0 %v1725_v20 }
 0x31c   : > { %v1321_v7 = vadd.f32 %v1320_v63, %v1319_v54  ;;  %1611 = vmatpush3.msra.mxu0 %v2422_v43 }
 0x31d   : > { %1612 = vmatprep.subr.mxu0 %v1162_v45 }
 0x31e   : > { %v1323_v17 = vadd.f32 %v1322_v32, %v1321_v7  ;;  %1613 = vmatpush3.msra.mxu0 %v1098_v57 }
 0x31f   : > { %1614 = vmatprep.subr.mxu0 %v1159_v59 }
 0x320   : > { %v1325_v25 = vadd.f32 %v1324_v16, %v1323_v17  ;;  %1615 = vmatpush3.msra.mxu0 %v2426_v23  ;;  %v1261_v23 = vld [vmem:[#allocation4] sm:$0x1] }
 0x321   : > { %1616 = vmatprep.subr.mxu0 %v1722_v4 }
 0x322   : > { %v1326_v62 = vrot.slane %v1325_v25, 4  ;;  %1617 = vmatpush3.msra.mxu0 %v2414_v11 }
 0x323   : > { %1618 = vmatprep.subr.mxu0 %v1721_v58 }
 0x324   : > { %v1327_v51 = vadd.f32 %v1326_v62, %v1325_v25  ;;  %1619 = vmatpush3.msra.mxu0 %v2406_v28 }
 0x325   : > { %1620 = vmatprep.subr.mxu0 %v1146_v33 }
 0x326   : > { %v1328_v43 = vrot.slane %v1327_v51, 2  ;;  %1621 = vmatpush3.msra.mxu0 %v2418_v5 }
 0x327   : > { %1622 = vmatprep.subr.mxu0 %v1143_v9 }
 0x328   : > { %v1329_v57 = vadd.f32 %v1328_v43, %v1327_v51  ;;  %1623 = vmatpush3.msra.mxu0 %v2410_v12 }
 0x329   : > { %1624 = vmatprep.subr.mxu0 %v1718_v8 }
 0x32a   : > { %v1330_v44 = vrot.slane %v1329_v57, 1  ;;  %1625 = vmatpush3.msra.mxu0 %v2400_v29 }
 0x32b   : > { %1626 = vmatprep.subr.mxu0 %v2448_v36 }
 0x32c   : > { %v1331_v11 = vadd.f32 %v1330_v44, %v1329_v57  ;;  %1627 = vmatpush3.msra.mxu0 %v2392_v27  ;;  %v1387_v27 = vrot.slane %v2190_v15, 4 }
 0x32d   : > { %1628 = vmatprep.subr.mxu0 %v1130_v49 }
 0x32e   : > { %v1332_v28 = vadd.f32 %v1331_v11, %v1261_v23  ;;  %1629 = vmatpush3.msra.mxu0 %v2402_v19 }
 0x32f   : > { %1630 = vmatprep.subr.mxu0 %v2452_v34  ;;  %v1397_v34 = vpop.permute.xlu0 %1396 }
 0x330   : > { %1334 = vst.msk [vmem:[#allocation4] sm:$0x1] %vm310_vm4, %v1332_v28  ;;  %1631 = vmatpush3.msra.mxu0 %v2396_v10  ;;  %v1388_v10 = vadd.f32 %v1387_v27, %v2190_v15 }
 0x331   : > { %1632 = vmatprep.subr.mxu0 %v2440_v35 }
 0x332   : > { %1633 = vmatpush3.msra.mxu0 %v2382_v46  ;;  %v1389_v46 = vrot.slane %v1388_v10, 2 }
 0x333   : > { %1634 = vmatprep.subr.mxu0 %v2433_v42 }
 0x334   : > { %1635 = vmatpush3.msra.mxu0 %v2378_v22  ;;  %v1390_v29 = vadd.f32 %v1389_v46, %v1388_v10 }
 0x335   : > { %1636 = vmatprep.subr.mxu0 %v2444_v13 }
 0x336   : > { %1637 = vmatpush3.msra.mxu0 %v2384_v39  ;;  %v1391_v22 = vrot.slane %v1390_v29, 1 }
 0x337   : > { %1638 = vmatprep.subr.mxu0 %v2437_v47  ;;  %v1559_v42 = vld [vmem:[#allocation4] ss:$0 sm:$0xff]  ;;  %v1345_v47 = vpop.permute.xlu1 %1344 }
 0x338   : > { %1639 = vmatpush3.msra.mxu0 %v2380_v3  ;;  %v1392_v19 = vadd.f32 %v1391_v22, %v1390_v29  ;;  %v1353_v35 = vmul.f32 %v1559_v42, %v1345_v47 }
 0x339   : > { %1243 = vmatmul.mubr.f32.vlgmr.msra.gmra.mxu0 %v2306_v37  ;;  %v1174_v37 = vld [vmem:[#allocation2] sm:$0x7] }
 0x33a   : > { %v1393_v12 = vmul.f32 0.0078125, %v1392_v19  ;;  %v1354_v13 = vmul.f32 0.00390625, %v1353_v35 }
 0x33c   : > { %1401 = vst.msk [vmem:[%s299_s12 + $0x3] sm:$0x1] %vm310_vm4, %v1393_v12 }
 0x3f9   : > { %v1640_v15 = vpop.f32.mrf.mxu0 }
 0x3fb   : > { %v1641_v3 = vpop.f32.mrf.mxu0 }
 0x3fc   : > { %v1642_v39 = vadd.f32 %v1641_v3, %v1640_v15 }
 0x3fe   : > { %v1248_v5 = vadd.f32 %v1642_v39, %v1174_v37 }
 0x400   : > { %1250 = vst.msk [vmem:[#allocation2] sm:$0x7] %vm306_vm5, %v1248_v5 }
 0x407   : > { %v1340_v36 = vld [vmem:[#allocation2] sm:$0x7] }
 0x408   : > { %v1355_v24 = vsub.f32 %v1340_v36, %v1354_v13 }
 0x40a   : > { %1394 = vst.msk [vmem:[%s299_s12] sm:$0x7] %vm306_vm5, %v1355_v24 }
 0x40b   : > { %1400 = vst.msk [vmem:[%s299_s12] sm:$0x7] %vm1399_vm7, %v1397_v34 }
 0x40c PF: > { %s14_s17 = sadd.s32 1, %s1909_s17   ;;  %s2518_s15 = smov %s1905_s16 }
 0x40d   : > { %p11_p5 = scmp.ge.s32.totalorder %s14_s17, 4   ;;  %s2519_s16 = smov %s2521_s18 }
 0x40f   :  { %13 = sbr.rel (!%p11_p5) target bundleno = 2 (0x2), region = 83 }

// kernel: custom-call.22
= control target key start
LH: loop header
LB: loop body
LE: loop exit
PB: predicated region body
PF: predicated region fallthrough
CT: control target
= control target key end

     0   :  { %s1740_s30 = smov 0   ;;  %s1742_s10 = smov 0   ;;  %s2066_s0 = inlined_call_operand.vmem [shape: f32[2,2,2], index: 0, kind: input, shape index: {}]   ;;  %s2067_s1 = inlined_call_operand.vmem [shape: f32[2,2,2], index: 1, kind: input, shape index: {}]   ;;  %s2068_s2 = inlined_call_operand.vmem [shape: f32[2,2,2], index: 2, kind: input, shape index: {}]   ;;  %s2069_s3 = inlined_call_operand.vmem [shape: f32[2,2,2], index: 3, kind: input, shape index: {}]   ;;  %s2070_s4 = inlined_call_operand.vmem [shape: f32[2,2], index: 4, kind: output, shape index: {0}]   ;;  %s2071_s5 = inlined_call_operand.vmem [shape: f32[2,2], index: 5, kind: output, shape index: {1}]   ;;  %s2072_s6 = inlined_call_operand.vmem [shape: f32[2,2,2], index: 6, kind: output, shape index: {2}]   ;;  %s2073_s7 = inlined_call_operand.vmem [shape: f32[2,2,2], index: 7, kind: output, shape index: {3}]   ;;  %s2074_s8 = inlined_call_operand.vmem [shape: f32[2,2,2], index: 8, kind: output, shape index: {4}]   ;;  %s2075_s9 = inlined_call_operand.vmem [shape: f32[2,2,2], index: 9, kind: output, shape index: {5}]  }
   0x1   :  { %s1744_s11 = smov 0  }
   0x2 LB: > { %s1756_s12 = sadd.s32 4294967295, %s1677_s11   ;;  %s1759_s13 = sadd.s32 1, %s1677_s11   ;;  %s1677_s11 = sphi %s1744_s11, %s2094_s11   ;;  %s1673_s10 = sphi %s1742_s10, %s2093_s10   ;;  %s1669_s30 = sphi %s1740_s30, %s2092_s30  }
   0x3   : > { %s20_s14 = sshrl.u32 %s1677_s11, 3  ;;  %s21_s15 = sshrl.u32 %s1759_s13, 3 }
   0x4   : > { %s22_s16 = ssub.s32 %s20_s14, %s21_s15  ;;  %s25_s17 = sadd.s32 1, %s1673_s10 }
   0x5   : > { %p23_p0 = scmp.eq.s32.totalorder %s22_s16, 0  ;;  %p35_p1 = scmp.ne.s32.totalorder %s1673_s10, %s1669_s30 }
   0x6   : > { %p36_p2 = scmp.eq.s32.totalorder %s1756_s12, 1  ;;  %p1538_p4 = scmp.ge.s32.totalorder %s1677_s11, 2 }
   0x7   : > { %s1768_s18 = scalar_select %p23_p0, %s1673_s10, %s25_s17  }
   0x8   : > { %p1770_p3 = por %p36_p2, %p35_p1  ;;  %86 = sbr.rel (%p1538_p4) target bundleno = 18 (0x12), region = 16 }
   0x9   : > { %2076 = sst [smem:[#allocation33_spill]] %s1768_s18  ;;  %s88_s20 = sand.u32 (!%p1538_p4), 1, %s1677_s11  }
   0xa   : > { %s1540_s21 = sshll.u32 (!%p1538_p4), %s1677_s11, 1  ;;  %s1539_s22 = sshll.u32 (!%p1538_p4), %s88_s20, 1 }
   0xb   : > { %s92_s25 = scalar_lea.vmem (!%p1538_p4), %s2066_s0, %s1540_s21  ;;  %s90_s26 = scalar_lea.vmem (!%p1538_p4), [#allocation1], %s1539_s22 }
   0xc   : > { %s131_s29 = scalar_lea.vmem (!%p1538_p4), %s2067_s1, %s1540_s21  ;;  %s170_s16 = scalar_lea.vmem (!%p1538_p4), %s2068_s2, %s1540_s21 }
   0xd   : > { %v109_v0 = vld [vmem:[%s92_s25] sm:$0x3]  ;;  %s129_s17 = scalar_lea.vmem [#allocation3], %s1539_s22  ;;  %s209_s23 = scalar_lea.vmem %s2069_s3, %s1540_s21 }
   0xe   : > { %110 = vst [vmem:[%s90_s26] sm:$0x3] %v109_v0  ;;  %v148_v1 = vld [vmem:[%s131_s29] sm:$0x3]  ;;  %s168_s24 = scalar_lea.vmem [#allocation5], %s1539_s22  ;;  %s207_s25 = scalar_lea.vmem [#allocation7], %s1539_s22 }
   0xf   : > { %149 = vst [vmem:[%s129_s17] sm:$0x3] %v148_v1  ;;  %v187_v2 = vld [vmem:[%s170_s16] sm:$0x3] }
  0x10   : > { %188 = vst [vmem:[%s168_s24] sm:$0x3] %v187_v2  ;;  %v226_v3 = vld [vmem:[%s209_s23] sm:$0x3] }
  0x11   : > { %227 = vst [vmem:[%s207_s25] sm:$0x3] %v226_v3 }
  0x12 PF: > { %p1547_p5 = scmp.ge.s32.totalorder %s1677_s11, 1  ;;  %p244_p6 = scmp.lt.s32.totalorder %s1677_s11, 3 }
  0x14   : > { %p245_p7 = pnand %p1547_p5, %p244_p6 }
  0x16   : > { %248 = sbr.rel (%p245_p7) target bundleno = 994 (0x3e2), region = 140 }
  0x1b   : > { %s267_s26 = sand.u32 1, %s1756_s12   ;;  %s285_s27 = sand.u32 1, %s1669_s30   ;;  %v349_v4 = vlaneseq  ;;  %v1687_v5 = vmov 0.0  }
  0x1c   : > { %s1793_s28 = sshll.u32 %s267_s26, 1  ;;  %s1795_s18 = sshll.u32 %s285_s27, 1  ;;  %344 = vst [vmem:[#allocation12] sm:$0xff] %v1687_v5  ;;  %345 = vst [vmem:[#allocation14] sm:$0xff] %v1687_v5 }
  0x1d   : > { %346 = vst [vmem:[#allocation16] sm:$0xff] %v1687_v5  ;;  %347 = vst [vmem:[#allocation18] sm:$0xff] %v1687_v5  ;;  %v1797_v6 = vand.u32 127, %v349_v4  ;;  %v1799_v7 = vshrl.u32 %v349_v4, 7  ;;  %s269_s11 = scalar_lea.vmem [#allocation1], %s1793_s28  ;;  %s273_s30 = scalar_lea.vmem [#allocation3], %s1793_s28 }
  0x1e   : > { %v313_v8 = vld [vmem:[%s269_s11] sm:$0x3]  ;;  %v318_v9 = vld [vmem:[%s273_s30] sm:$0x3]  ;;  %s277_s21 = scalar_lea.vmem [#allocation5], %s1793_s28  ;;  %s281_s22 = scalar_lea.vmem [#allocation7], %s1793_s28 }
  0x1f   : > { %314 = vst [vmem:[#allocation0] sm:$0x3] %v313_v8  ;;  %319 = vst [vmem:[#allocation2] sm:$0x3] %v318_v9  ;;  %v323_v10 = vld [vmem:[%s277_s21] sm:$0x3]  ;;  %v351_v6 = vmov %v1797_v6  ;;  %v354_v7 = vmov %v1799_v7 }
  0x20   : > { %v328_v11 = vld [vmem:[%s281_s22] sm:$0x3]  ;;  %324 = vst [vmem:[#allocation4] sm:$0x3] %v323_v10  ;;  %v364_v6 = vmov %v1797_v6  ;;  %v367_v7 = vmov %v1799_v7  ;;  %s332_s29 = smov [#allocation20]  ;;  %s335_s14 = smov [#allocation21]  ;;  %vm358_vm0 = vcmp.eq.s32.totalorder %v354_v7, %v351_v6 }
  0x21   : > { %329 = vst [vmem:[#allocation6] sm:$0x3] %v328_v11  ;;  %vm371_vm1 = vcmp.eq.s32.totalorder %v367_v7, %v364_v6  ;;  %s348_s15 = smov [#allocation12]  ;;  %s361_s16 = smov [#allocation18]  ;;  %vm1427_vm2 = vcmp.lt.s32.totalorder %v1797_v6, 2  ;;  %v1419_v6 = vmov %v1797_v6  ;;  %v1422_v7 = vmov %v1799_v7 }
  0x22   : > { %s338_s17 = smov [#allocation22]  ;;  %s341_s20 = smov [#allocation23]  ;;  %vm1432_vm3 = vcmp.eq.s32.totalorder %v1422_v7, %v1419_v6  ;;  %v1470_v6 = vmov %v1797_v6  ;;  %v1439_v7 = vmov %v1799_v7 }
  0x23   : > { %v355_v12 = vld [vmem:[%s348_s15] sm:$0x3]  ;;  %s1423_s30 = smov [#allocation20]  ;;  %s1440_s21 = smov [#allocation21]  ;;  %v1436_v6 = vmov %v1797_v6  ;;  %v1473_v7 = vmov %v1799_v7 }
  0x24   : > { %v368_v13 = vld [vmem:[%s361_s16] sm:$0x3]  ;;  %v359_v16 = vsel %vm358_vm0, 1.0, %v355_v12  ;;  %s1457_s22 = smov [#allocation22]  ;;  %v1453_v6 = vmov %v1797_v6  ;;  %v1456_v7 = vmov %v1799_v7  ;;  %vm1483_vm4 = vcmp.eq.s32.totalorder %v1473_v7, %v1470_v6 }
  0x25   : > { %v372_v17 = vsel %vm371_vm1, 1.0, %v368_v13  ;;  %360 = vst [vmem:[%s348_s15] sm:$0x3] %v359_v16 }
  0x26   : > { %v333_v14 = vld [vmem:[#allocation0] sm:$0xff]  ;;  %v336_v15 = vld [vmem:[#allocation2] sm:$0xff]  ;;  %373 = vst [vmem:[%s361_s16] sm:$0x3] %v372_v17 }
  0x27   : > { %334 = vst [vmem:[%s332_s29] sm:$0xff] %v333_v14  ;;  %337 = vst [vmem:[%s335_s14] sm:$0xff] %v336_v15  ;;  %v339_v18 = vld [vmem:[#allocation4] sm:$0xff]  ;;  %s1474_s29 = smov [#allocation23] }
  0x28   : > { %v342_v19 = vld [vmem:[#allocation6] sm:$0xff]  ;;  %340 = vst [vmem:[%s338_s17] sm:$0xff] %v339_v18 }
  0x29   : > { %343 = vst [vmem:[%s341_s20] sm:$0xff] %v342_v19 }
  0x2e   : > { %v1429_v20 = vld [vmem:[%s1423_s30] sm:$0x3] }
  0x2f   : > { %v1446_v21 = vld [vmem:[%s1440_s21] sm:$0x3]  ;;  %v1430_v22 = vsel %vm1427_vm2, %v1429_v20, 0.0 }
  0x30   : > { %v1447_v23 = vsel %vm1427_vm2, %v1446_v21, 0.0  ;;  %v1463_v24 = vld [vmem:[%s1457_s22] sm:$0x3]  ;;  %v1431_v26 = vmul.f32 %v1430_v22, %v1430_v22 }
  0x31   : > { %v1480_v25 = vld [vmem:[%s1474_s29] sm:$0x3]  ;;  %v1448_v27 = vmul.f32 %v1447_v23, %v1447_v23  ;;  %v1464_v28 = vsel %vm1427_vm2, %v1463_v24, 0.0 }
  0x32   : > { %v1481_v29 = vsel %vm1427_vm2, %v1480_v25, 0.0  ;;  %v1465_v30 = vmul.f32 %v1464_v28, %v1464_v28  ;;  %v1433_v33 = vsel %vm1432_vm3, 0.0, %v1431_v26 }
  0x33   : > { %v1450_v31 = vadd.f32 %v1448_v27, %v1431_v26  ;;  %v1482_v32 = vmul.f32 %v1481_v29, %v1481_v29  ;;  %v1449_v34 = vadd.f32 %v1448_v27, %v1433_v33 }
  0x35   : > { %v1467_v35 = vadd.f32 %v1465_v30, %v1450_v31  ;;  %v1466_v36 = vadd.f32 %v1465_v30, %v1449_v34  ;;  %v1484_v37 = vsel %vm1483_vm4, 0.0, %v1482_v32 }
  0x37   : > { %v1486_v38 = vadd.f32 %v1482_v32, %v1467_v35  ;;  %v1485_v39 = vadd.f32 %v1484_v37, %v1466_v36 }
  0x39   : > { %1487 = vadd.xlane.f32.xlu0 %v1486_v38 }
  0x3d   : > { %1495 = vadd.xlane.f32.xlu0 %v1485_v39 }
  0xc2   : > { %v1488_v40 = vpop.xlane.xlu0 %1487 }
  0xc3   : > { %v1489_v41 = vrot.slane %v1488_v40, 4 }
  0xc5   : > { %v1490_v42 = vadd.f32 %v1489_v41, %v1488_v40 }
  0xc6   : > { %v1496_v43 = vpop.xlane.xlu0 %1495 }
  0xc7   : > { %v1491_v44 = vrot.slane %v1490_v42, 2  ;;  %v1497_v45 = vrot.slane %v1496_v43, 4 }
  0xc9   : > { %v1498_v46 = vadd.f32 %v1497_v45, %v1496_v43  ;;  %v1492_v47 = vadd.f32 %v1491_v44, %v1490_v42 }
  0xcb   : > { %v1499_v48 = vrot.slane %v1498_v46, 2  ;;  %v1493_v50 = vrot.slane %v1492_v47, 1 }
  0xcd   : > { %v1500_v49 = vadd.f32 %v1499_v48, %v1498_v46  ;;  %v1494_v53 = vadd.f32 %v1493_v50, %v1492_v47 }
  0xcf   : > { %v1501_v51 = vrot.slane %v1500_v49, 1 }
  0xd1   : > { %v1502_v52 = vadd.f32 %v1501_v51, %v1500_v49 }
  0xd3   : > { %1588 = vpush %v1502_v52 }
  0xd4   : > { %1590 = vpush %v1494_v53 }
 0x104   : > { %s1589_s14 = spop %1588 }
 0x105   : > { %s1591_s15 = spop %1590 }
 0x106   : > { %s1505_s16 = smul.f32 1e-10, %s1591_s15 }
 0x108   : > { %p1506_p8 = scmp.le.f32.partialorder %s1589_s14, %s1505_s16 }
 0x109   : > { %s1833_s17 = smov (!%p1506_p8), 0  }
 0x10a   : > { %1509 = sbr.rel (%p1506_p8) target bundleno = 948 (0x3b4), region = 467 }
 0x10f LB: >> { %s1838_s20 = smov 0   ;;  %s1681_s17 = sphi %s1833_s17, %s2078_s17  }
 0x110 LB: >>> { %s478_s30 = smov [#allocation20]  ;;  %v482_v6 = vmov %v1797_v6  ;;  %v485_v7 = vmov %v1799_v7  ;;  %s498_s21 = smov [#allocation21]  ;;  %vm801_vm14 = vcmp.eq.s32.totalorder %v1799_v7, 0  ;;  %vm813_vm15 = vcmp.eq.s32.totalorder %v1799_v7, 1  ;;  %s1685_s20 = sphi %s1838_s20, %s477_s20  }
 0x111   : >>> { %v502_v6 = vmov %v1797_v6  ;;  %v505_v7 = vmov %v1799_v7  ;;  %v486_v54 = vld [vmem:[%s478_s30] sm:$0x3]  ;;  %vm489_vm5 = vcmp.eq.s32.totalorder %v485_v7, %v482_v6  ;;  %s518_s22 = smov [#allocation23]  ;;  %s479_s29 = smov [#allocation24] }
 0x112   : >>> { %vm509_vm6 = vcmp.eq.s32.totalorder %v505_v7, %v502_v6  ;;  %v522_v6 = vmov %v1797_v6  ;;  %v525_v7 = vmov %v1799_v7  ;;  %v490_v55 = vsel %vm489_vm5, %v486_v54, 0.0  ;;  %v506_v56 = vld [vmem:[%s498_s21] sm:$0x3]  ;;  %s499_s14 = smov [#allocation25]  ;;  %s519_s15 = smov [#allocation26] }
 0x113   : >>> { %vm529_vm7 = vcmp.eq.s32.totalorder %v525_v7, %v522_v6  ;;  %v491_v57 = vrot.slane %v490_v55, 4  ;;  %v510_v58 = vsel %vm509_vm6, %v506_v56, 0.0  ;;  %v526_v59 = vld [vmem:[%s518_s22] sm:$0x3]  ;;  %s542_s16 = smov [#allocation25]  ;;  %s540_s30 = smov [#allocation24]  ;;  %v591_v6 = vmov %v1797_v6 }
 0x114   : >>> { %v511_v60 = vrot.slane %v510_v58, 4  ;;  %v530_v61 = vsel %vm529_vm7, %v526_v59, 0.0  ;;  %s544_s21 = smov [#allocation26]  ;;  %s579_s22 = smov [#allocation27]  ;;  %v594_v7 = vmov %v1799_v7  ;;  %v606_v6 = vmov %v1797_v6 }
 0x115   : >>> { %v492_v62 = vadd.f32 %v491_v57, %v490_v55  ;;  %v531_v63 = vrot.slane %v530_v61, 4  ;;  %v609_v7 = vmov %v1799_v7  ;;  %vm596_vm12 = vcmp.eq.s32.totalorder %v594_v7, %v591_v6  ;;  %s1857_s24 = smov [#allocation22]  ;;  %s1863_s23 = smov [#allocation14] }
 0x116   : >>> { %v512_v0 = vadd.f32 %v511_v60, %v510_v58  ;;  %vm611_vm13 = vcmp.eq.s32.totalorder %v609_v7, %v606_v6  ;;  %s841_s11 = smov [#allocation31]  ;;  %s1869_s27 = smov [#allocation18]  ;;  %v627_v55 = vld [vmem:[%s1857_s24] sm:$0x3]  ;;  %v704_v6 = vmov %v1797_v6  ;;  %v707_v7 = vmov %v1799_v7 }
 0x117   : >>> { %v493_v1 = vrot.slane %v492_v62, 2  ;;  %v532_v2 = vadd.f32 %v531_v63, %v530_v61  ;;  %v850_v58 = vld [vmem:[%s1863_s23] sm:$0x3]  ;;  %s619_s26 = smov [#allocation32]  ;;  %s843_s25 = smov [#allocation32]  ;;  %v718_v6 = vmov %v1797_v6  ;;  %v721_v7 = vmov %v1799_v7 }
 0x118   : >>> { %v513_v3 = vrot.slane %v512_v0, 2  ;;  %v852_v61 = vld [vmem:[%s1869_s27] sm:$0x3]  ;;  %vm711_vm0 = vcmp.eq.s32.totalorder %v707_v7, %v704_v6  ;;  %v677_v6 = vmov %v1797_v6  ;;  %v680_v7 = vmov %v1799_v7  ;;  %s477_s20 = sadd.s32 1, %s1685_s20  }
 0x119   : >>> { %v494_v4 = vadd.f32 %v493_v1, %v492_v62  ;;  %v533_v5 = vrot.slane %v532_v2, 2  ;;  %v691_v6 = vmov %v1797_v6  ;;  %v694_v7 = vmov %v1799_v7  ;;  %p474_p9 = scmp.ge.s32.totalorder %s477_s20, 3  }
 0x11a   : >>> { %v514_v8 = vadd.f32 %v513_v3, %v512_v0  ;;  %vm726_vm1 = vcmp.eq.s32.totalorder %v721_v7, %v718_v6  ;;  %vm685_vm3 = vcmp.eq.s32.totalorder %v680_v7, %v677_v6  ;;  %vm698_vm4 = vcmp.eq.s32.totalorder %v694_v7, %v691_v6 }
 0x11b   : >>> { %v495_v9 = vrot.slane %v494_v4, 1  ;;  %v534_v10 = vadd.f32 %v533_v5, %v532_v2  ;;  %vm740_vm5 = vcmp.eq.s32.totalorder %v1797_v6, 0  ;;  %vm744_vm6 = vcmp.eq.s32.totalorder %v1797_v6, 1 }
 0x11c   : >>> { %v515_v11 = vrot.slane %v514_v8, 1  ;;  %v378_v6 = vmov (%p474_p9), %v1797_v6  ;;  %v381_v7 = vmov (%p474_p9), %v1799_v7 }
 0x11d   : >>> { %v496_v12 = vadd.f32 %v495_v9, %v494_v4  ;;  %v535_v13 = vrot.slane %v534_v10, 1  ;;  %v431_v6 = vmov (%p474_p9), %v1797_v6  ;;  %vm393_vm7 = vcmp.eq.s32.totalorder (%p474_p9), %v381_v7, %v378_v6 }
 0x11e   : >>> { %v516_v14 = vadd.f32 %v515_v11, %v514_v8  ;;  %v434_v7 = vmov (%p474_p9), %v1799_v7  ;;  %v397_v6 = vmov (%p474_p9), %v1797_v6 }
 0x11f   : >>> { %497 = vst [vmem:[%s479_s29] sm:$0x1] %v496_v12  ;;  %v536_v15 = vadd.f32 %v535_v13, %v534_v10  ;;  %s581_s29 = smov [#allocation28]  ;;  %v400_v7 = vmov (%p474_p9), %v1799_v7  ;;  %v414_v6 = vmov (%p474_p9), %v1797_v6 }
 0x120   : >>> { %517 = vst [vmem:[%s499_s14] sm:$0x1] %v516_v14  ;;  %s538_s14 = smov [#allocation29]  ;;  %v417_v7 = vmov (%p474_p9), %v1799_v7 }
 0x121   : >>> { %537 = vst [vmem:[%s519_s15] sm:$0x1] %v536_v15  ;;  %s539_s15 = smov [#allocation30]  ;;  %s583_s14 = smov %s538_s14 }
 0x122   : >>> { %s585_s15 = smov %s539_s15 }
 0x126   : >>> { %v541_v18 = vld [vmem:[%s540_s30] sm:$0xff]  ;;  %s602_s30 = smov [#allocation30] }
 0x127   : >>> { %v543_v16 = vld [vmem:[%s542_s16] sm:$0xff]  ;;  %v564_v33 = vand.u32 2147483647, %v541_v18  ;;  %s587_s16 = smov [#allocation29] }
 0x128   : >>> { %v547_v17 = vmul.f32 2.0, %v543_v16  ;;  %v545_v19 = vld [vmem:[%s544_s21] sm:$0xff]  ;;  %v565_v36 = vand.u32 2147483647, %v543_v16  ;;  %s600_s21 = smov [#allocation31] }
 0x129   : >>> { %v546_v20 = vsub.f32 %v545_v19, %v541_v18  ;;  %v566_v34 = vand.u32 2147483647, %v545_v19 }
 0x12a   : >>> { %1639 = vrcp.f32 %v547_v17 }
 0x12b   : >>> { %v567_v35 = vmin.f32 %v564_v33, %v566_v34 }
 0x12d   : >>> { %v568_v37 = vmul.f32 1.1920929e-08, %v567_v35 }
 0x12f   : >>> { %vm569_vm11 = vcmp.le.f32.partialorder %v565_v36, %v568_v37 }
 0x137   : >>> { %v1640_v21 = vpop.eup %1639 }
 0x138   : >>> { %v549_v22 = vmul.f32 %v1640_v21, %v546_v20 }
 0x13a   : >>> { %v551_v23 = vmul.f32 %v549_v22, %v549_v22  ;;  %vm550_vm10 = vcmp.ge.f32.partialorder %v549_v22, 0.0 }
 0x13c   : >>> { %v552_v24 = vadd.f32 1.0, %v551_v23 }
 0x13e   : >>> { %1641 = vrsqrt.f32 %v552_v24  ;;  %vm555_vm8 = vcmp.eq.f32.partialorder %v552_v24, inf  ;;  %v558_v26 = vand.u32 2147483648, %v552_v24  ;;  %vm557_vm9 = vcmp.eq.f32.partialorder %v552_v24, 0.0 }
 0x14b   : >>> { %v1642_v25 = vpop.eup %1641 }
 0x14c   : >>> { %v554_v27 = vmul.f32 %v1642_v25, %v552_v24 }
 0x14e   : >>> { %v556_v28 = vsel %vm555_vm8, %v552_v24, %v554_v27  ;;  %vm446_vm8 = vcmp.eq.s32.totalorder (%p474_p9), %v434_v7, %v431_v6 }
 0x14f   : >>> { %v559_v29 = vsel %vm557_vm9, %v558_v26, %v556_v28 }
 0x150   : >>> { %v560_v30 = vxor.u32 2147483648, %v559_v29 }
 0x152   : >>> { %v561_v31 = vsel %vm550_vm10, %v559_v29, %v560_v30 }
 0x153   : >>> { %v562_v32 = vadd.f32 %v561_v31, %v549_v22 }
 0x155   : >>> { %1643 = vrcp.f32 %v562_v32 }
 0x162   : >>> { %v1644_v38 = vpop.eup %1643 }
 0x163   : >>> { %v570_v39 = vsel %vm569_vm11, 0.0, %v1644_v38 }
 0x164   : >>> { %v571_v40 = vmul.f32 %v570_v39, %v570_v39  ;;  %v575_v41 = vmul.f32 %v570_v39, %v543_v16 }
 0x166   : >>> { %v572_v42 = vadd.f32 1.0, %v571_v40  ;;  %v576_v43 = vsub.f32 %v541_v18, %v575_v41  ;;  %v578_v44 = vadd.f32 %v575_v41, %v545_v19 }
 0x168   : >>> { %1645 = vrsqrt.f32 %v572_v42  ;;  %580 = vst [vmem:[%s579_s22] sm:$0xff] %v576_v43  ;;  %582 = vst [vmem:[%s581_s29] sm:$0xff] %v578_v44  ;;  %s617_s22 = smov [#allocation31]  ;;  %s1853_s29 = smov [#allocation20] }
 0x169   : >>> { %v625_v53 = vld [vmem:[%s1853_s29] sm:$0x3] }
 0x175   : >>> { %v1646_v45 = vpop.eup %1645 }
 0x176   : >>> { %584 = vst [vmem:[%s583_s14] sm:$0xff] %v1646_v45  ;;  %v574_v46 = vmul.f32 %v1646_v45, %v570_v39  ;;  %s615_s14 = smov [#allocation32] }
 0x178   : >>> { %586 = vst [vmem:[%s585_s15] sm:$0xff] %v574_v46  ;;  %s1855_s15 = smov [#allocation21] }
 0x179   : >>> { %v626_v54 = vld [vmem:[%s1855_s15] sm:$0x3] }
 0x17d   : >>> { %v588_v47 = vld [vmem:[%s587_s16] ss:$0 sm:$0xff]  ;;  %s1859_s16 = smov [#allocation23] }
 0x17e   : >>> { %v597_v48 = vsel %vm596_vm12, %v588_v47, 0.0  ;;  %v628_v56 = vld [vmem:[%s1859_s16] sm:$0x3] }
 0x17f   : >>> { %598 = vadd.xlane.f32.xlu0 %v597_v48  ;;  %v603_v49 = vld [vmem:[%s602_s30] ss:$0 sm:$0xff]  ;;  %s1861_s30 = smov [#allocation12] }
 0x180   : >>> { %v612_v50 = vsel %vm611_vm13, %v603_v49, 0.0  ;;  %v849_v57 = vld [vmem:[%s1861_s30] sm:$0x3] }
 0x183   : >>> { %613 = vadd.xlane.f32.xlu0 %v612_v50 }
 0x208   : >>> { %v599_v51 = vpop.xlane.xlu0 %598 }
 0x209   : >>> { %601 = vst [vmem:[%s600_s21] sm:$0xff] %v599_v51  ;;  %s1865_s21 = smov [#allocation16] }
 0x20a   : >>> { %v851_v59 = vld [vmem:[%s1865_s21] sm:$0x3] }
 0x20c   : >>> { %v614_v52 = vpop.xlane.xlu0 %613 }
 0x20d   : >>> { %616 = vst [vmem:[%s615_s14] sm:$0xff] %v614_v52  ;;  %s1889_s14 = smov [#allocation23] }
 0x210   : >>> { %v618_v60 = vld [vmem:[%s617_s22] sm:$0xff]  ;;  %s1887_s22 = smov [#allocation22] }
 0x211   : >>> { %v842_v62 = vld [vmem:[%s841_s11] sm:$0xff]  ;;  %v629_v63 = vmul.f32 %v625_v53, %v618_v60  ;;  %v632_v0 = vmul.f32 %v626_v54, %v618_v60  ;;  %v636_v1 = vmul.f32 %v627_v55, %v618_v60  ;;  %v639_v2 = vmul.f32 %v628_v56, %v618_v60  ;;  %s1885_s11 = smov [#allocation12] }
 0x212   : >>> { %v853_v3 = vmul.f32 %v849_v57, %v842_v62  ;;  %v856_v4 = vmul.f32 %v850_v58, %v842_v62  ;;  %v860_v5 = vmul.f32 %v851_v59, %v842_v62  ;;  %v863_v8 = vmul.f32 %v852_v61, %v842_v62 }
 0x214   : >>> { %v620_v9 = vld [vmem:[%s619_s26] sm:$0xff]  ;;  %s647_s26 = smov [#allocation30] }
 0x215   : >>> { %v844_v10 = vld [vmem:[%s843_s25] sm:$0xff]  ;;  %v630_v11 = vmul.f32 %v627_v55, %v620_v9  ;;  %v633_v12 = vmul.f32 %v628_v56, %v620_v9  ;;  %v635_v13 = vmul.f32 %v625_v53, %v620_v9  ;;  %v638_v14 = vmul.f32 %v626_v54, %v620_v9  ;;  %s645_s25 = smov [#allocation29] }
 0x216   : >>> { %v854_v15 = vmul.f32 %v851_v59, %v844_v10  ;;  %v857_v16 = vmul.f32 %v852_v61, %v844_v10  ;;  %v859_v17 = vmul.f32 %v849_v57, %v844_v10  ;;  %v862_v18 = vmul.f32 %v850_v58, %v844_v10  ;;  %v646_v27 = vld [vmem:[%s645_s25] ss:$0 sm:$0xff]  ;;  %s674_s25 = smov [#allocation27] }
 0x217   : >>> { %v631_v19 = vsub.f32 %v629_v63, %v630_v11  ;;  %v634_v20 = vsub.f32 %v632_v0, %v633_v12  ;;  %v637_v21 = vadd.f32 %v636_v1, %v635_v13  ;;  %v640_v22 = vadd.f32 %v639_v2, %v638_v14  ;;  %v648_v28 = vld [vmem:[%s647_s26] ss:$0 sm:$0xff]  ;;  %s673_s26 = smov [#allocation20] }
 0x218   : >>> { %v855_v23 = vsub.f32 %v853_v3, %v854_v15  ;;  %v858_v24 = vsub.f32 %v856_v4, %v857_v16  ;;  %v861_v25 = vadd.f32 %v860_v5, %v859_v17  ;;  %v864_v26 = vadd.f32 %v863_v8, %v862_v18  ;;  %v681_v63 = vld [vmem:[%s674_s25] ss:$0 sm:$0xff]  ;;  %s917_s25 = sadd.s32 (%p474_p9), 1, %s1681_s17  }
 0x219   : >>> { %642 = vst [vmem:[%s1855_s15] sm:$0x3] %v634_v20  ;;  %644 = vst [vmem:[%s1859_s16] sm:$0x3] %v640_v22  ;;  %s1891_s15 = smov [#allocation20]  ;;  %s715_s16 = smov [#allocation28] }
 0x21a   : >>> { %641 = vst [vmem:[%s1853_s29] sm:$0x3] %v631_v19  ;;  %643 = vst [vmem:[%s1857_s24] sm:$0x3] %v637_v21  ;;  %s1893_s24 = smov [#allocation16]  ;;  %s1901_s29 = smov [#allocation21]  ;;  %v722_v59 = vld [vmem:[%s715_s16] ss:$0 sm:$0xff] }
 0x21b   : >>> { %865 = vst [vmem:[%s1861_s30] sm:$0x3] %v855_v23  ;;  %866 = vst [vmem:[%s1863_s23] sm:$0x3] %v858_v24  ;;  %s1895_s23 = smov [#allocation14]  ;;  %s701_s30 = smov [#allocation22] }
 0x21c   : >>> { %867 = vst [vmem:[%s1865_s21] sm:$0x3] %v861_v25  ;;  %868 = vst [vmem:[%s1869_s27] sm:$0x3] %v864_v26  ;;  %s1899_s27 = smov [#allocation18]  ;;  %s714_s21 = smov [#allocation23] }
 0x21d   : >>> { %s817_s16 = smov [#allocation21]  ;;  %p470_p10 = scmp.ge.s32.totalorder (%p474_p9), %s917_s25, 15 }
 0x21e   : >> { %s2078_s17 = smov (%p474_p9), %s917_s25 }
 0x220   : >>> { %v656_v30 = vld [vmem:[%s1889_s14] sm:$0x3] }
 0x221   : >>> { %v655_v29 = vld [vmem:[%s1887_s22] sm:$0x3]  ;;  %v664_v36 = vmul.f32 %v656_v30, %v648_v28  ;;  %v667_v42 = vmul.f32 %v656_v30, %v646_v27 }
 0x222   : >>> { %v653_v31 = vld [vmem:[%s1891_s15] sm:$0x3]  ;;  %v663_v35 = vmul.f32 %v655_v29, %v646_v27  ;;  %v666_v37 = vmul.f32 %v655_v29, %v648_v28 }
 0x223   : >>> { %v871_v32 = vld [vmem:[%s1885_s11] ss:$0 sm:$0xff]  ;;  %v1567_v34 = vld [vmem:[%s1885_s11 + $0x1] ss:$0 sm:$0xff]  ;;  %v657_v48 = vmul.f32 %v653_v31, %v646_v27  ;;  %v660_v49 = vmul.f32 %v653_v31, %v648_v28 }
 0x224   : >>> { %v1566_v33 = vld [vmem:[%s1885_s11 - $0x1] sm:$0x2]  ;;  %v1569_v40 = vld [vmem:[%s1893_s24 + $0x1] sm:$0x1]  ;;  %v665_v47 = vsub.f32 %v663_v35, %v664_v36  ;;  %v668_v53 = vadd.f32 %v667_v42, %v666_v37 }
 0x225   : >>> { %v878_v38 = vsel %vm801_vm14, %v871_v32, %v1566_v33  ;;  %v882_v39 = vld [vmem:[%s1893_s24] ss:$0 sm:$0xff]  ;;  %v890_v43 = vsel %vm813_vm15, %v1567_v34, %v1569_v40  ;;  %v1571_v45 = vld [vmem:[%s1895_s23 + $0x1] ss:$0 sm:$0xff] }
 0x226   : >>> { %v895_v41 = vld [vmem:[%s1895_s23] ss:$0 sm:$0xff]  ;;  %881 = vst [vmem:[%s1885_s11] sm:$0x3] %v878_v38  ;;  %892 = vst [vmem:[%s1893_s24] sm:$0x3] %v890_v43  ;;  %v1573_v51 = vld [vmem:[%s1899_s27 + $0x1] sm:$0x1] }
 0x227   : >>> { %v1570_v44 = vld [vmem:[%s1895_s23 - $0x1] sm:$0x2]  ;;  %1568 = vst [vmem:[%s1885_s11 + $0x1] sm:$0x1] %v882_v39  ;;  %v914_v54 = vsel %vm813_vm15, %v1571_v45, %v1573_v51  ;;  %671 = vst [vmem:[%s1887_s22] sm:$0x3] %v665_v47  ;;  %s688_s11 = smov [#allocation21] }
 0x228   : >>> { %v906_v46 = vld [vmem:[%s1899_s27] ss:$0 sm:$0xff]  ;;  %v902_v50 = vsel %vm801_vm14, %v895_v41, %v1570_v44  ;;  %672 = vst [vmem:[%s1889_s14] sm:$0x3] %v668_v53  ;;  %s1943_s22 = smov [#allocation22]  ;;  %s1688_s14 = smov 1  }
 0x229   : >>> { %v654_v52 = vld [vmem:[%s1901_s29] sm:$0x3]  ;;  %905 = vst [vmem:[%s1895_s23] sm:$0x3] %v902_v50  ;;  %916 = vst [vmem:[%s1899_s27] sm:$0x3] %v914_v54  ;;  %s730_s24 = smov [#allocation21]  ;;  %s1946_s27 = smov [#allocation23] }
 0x22a   : >>> { %v658_v55 = vmul.f32 %v654_v52, %v648_v28  ;;  %v661_v56 = vmul.f32 %v654_v52, %v646_v27  ;;  %1572 = vst [vmem:[%s1895_s23 + $0x1] sm:$0x1] %v906_v46  ;;  %s1689_s23 = smov 127  }
 0x22c   : >>> { %v659_v57 = vsub.f32 %v657_v48, %v658_v55  ;;  %v662_v58 = vadd.f32 %v661_v56, %v660_v49 }
 0x22e   : >>> { %669 = vst [vmem:[%s1891_s15] sm:$0x3] %v659_v57  ;;  %670 = vst [vmem:[%s1901_s29] sm:$0x3] %v662_v58  ;;  %v708_v60 = vld [vmem:[%s701_s30] sm:$0x3]  ;;  %s729_s15 = smov [#allocation20]  ;;  %s793_s29 = smov [#allocation20] }
 0x22f   : >>> { %v712_v61 = vsel %vm711_vm0, 0.0, %v708_v60  ;;  %v723_v62 = vld [vmem:[%s714_s21] sm:$0x3] }
 0x230   : >>> { %713 = vst [vmem:[%s701_s30] sm:$0x3] %v712_v61  ;;  %v727_v0 = vsel %vm726_vm1, %v722_v59, %v723_v62  ;;  %s794_s30 = smov [#allocation22] }
 0x231   : >>> { %728 = vst [vmem:[%s714_s21] sm:$0x3] %v727_v0  ;;  %s818_s21 = smov [#allocation23] }
 0x235   : >>> { %v682_v1 = vld [vmem:[%s673_s26] sm:$0x3] }
 0x236   : >>> { %v695_v2 = vld [vmem:[%s688_s11] sm:$0x3]  ;;  %v686_v3 = vsel %vm685_vm3, %v681_v63, %v682_v1 }
 0x237   : >>> { %v699_v4 = vsel %vm698_vm4, 0.0, %v695_v2  ;;  %687 = vst [vmem:[%s673_s26] sm:$0x3] %v686_v3  ;;  %v767_v5 = vld [vmem:[%s1943_s22] sm:$0x3]  ;;  %s382_s26 = smov (%p474_p9), [#allocation20] }
 0x238   : >>> { %700 = vst [vmem:[%s688_s11] sm:$0x3] %v699_v4  ;;  %768 = vrot.lane.b32.xlu0 %v767_v5, %s1688_s14  ;;  %v763_v11 = vld [vmem:[%s1946_s27] sm:$0x3]  ;;  %s401_s11 = smov (%p474_p9), [#allocation21] }
 0x239   : >>> { %v784_v12 = vld [vmem:[%s1946_s27] sm:$0x3] }
 0x23a   : >>> { %v766_v30 = vld [vmem:[%s1943_s22] sm:$0x3] }
 0x23e   : >>> { %v735_v8 = vld [vmem:[%s729_s15] sm:$0x3] }
 0x23f   : >>> { %736 = vrot.lane.b32.xlu1 %v735_v8, %s1688_s14  ;;  %v731_v9 = vld [vmem:[%s730_s24] sm:$0x3] }
 0x240   : >>> { %v752_v10 = vld [vmem:[%s730_s24] sm:$0x3] }
 0x241   : >>> { %v734_v18 = vld [vmem:[%s729_s15] sm:$0x3] }
 0x243   : >>> { %732 = vrot.lane.b32.xlu1 %v731_v9, %s1688_s14 }
 0x247   : >>> { %753 = vrot.lane.b32.xlu1 %v752_v10, %s1689_s23 }
 0x24b   : >>> { %764 = vrot.lane.b32.xlu1 %v763_v11, %s1688_s14  ;;  %s435_s14 = smov (%p474_p9), [#allocation23] }
 0x24f   : >>> { %785 = vrot.lane.b32.xlu1 %v784_v12, %s1689_s23 }
 0x2aa   : >>> { %v769_v20 = vpop.permute.xlu0 %768 }
 0x2ab   : >>> { %v773_v22 = vsel %vm740_vm5, %v767_v5, %v769_v20 }
 0x2b1   : >>> { %v737_v13 = vpop.permute.xlu1 %736 }
 0x2b2   : >>> { %v741_v14 = vsel %vm740_vm5, %v735_v8, %v737_v13 }
 0x2b5   : >>> { %v733_v15 = vpop.permute.xlu1 %732 }
 0x2b6   : >>> { %v745_v16 = vsel %vm744_vm6, %v733_v15, %v741_v14 }
 0x2b7   : >>> { %v751_v17 = vsel %vm1427_vm2, %v745_v16, 0.0 }
 0x2b8   : >>> { %759 = vst [vmem:[%s729_s15] sm:$0x3] %v751_v17 }
 0x2b9   : >>> { %v754_v19 = vpop.permute.xlu1 %753 }
 0x2ba   : >>> { %v758_v21 = vsel %vm744_vm6, %v734_v18, %v754_v19 }
 0x2bb   : >>> { %760 = vst [vmem:[%s730_s24] sm:$0x3] %v758_v21 }
 0x2bd   : >>> { %v765_v23 = vpop.permute.xlu1 %764 }
 0x2be   : >>> { %v777_v24 = vsel %vm744_vm6, %v765_v23, %v773_v22 }
 0x2bf   : >>> { %v795_v25 = vld [vmem:[%s793_s29] ss:$0 sm:$0xff]  ;;  %v1559_v27 = vld [vmem:[%s793_s29 + $0x1] ss:$0 sm:$0xff]  ;;  %v783_v29 = vsel %vm1427_vm2, %v777_v24, 0.0 }
 0x2c0   : >>> { %v1558_v26 = vld [vmem:[%s793_s29 - $0x1] sm:$0x2]  ;;  %791 = vst [vmem:[%s1943_s22] sm:$0x3] %v783_v29  ;;  %s418_s22 = smov (%p474_p9), [#allocation22] }
 0x2c1   : >>> { %v802_v28 = vsel %vm801_vm14, %v795_v25, %v1558_v26  ;;  %v786_v31 = vpop.permute.xlu1 %785 }
 0x2c2   : >>> { %805 = vst [vmem:[%s793_s29] sm:$0x3] %v802_v28  ;;  %v819_v32 = vld [vmem:[%s817_s16] ss:$0 sm:$0xff]  ;;  %v1563_v34 = vld [vmem:[%s817_s16 + $0x1] ss:$0 sm:$0xff]  ;;  %v790_v35 = vsel %vm744_vm6, %v766_v30, %v786_v31 }
 0x2c3   : >>> { %v1562_v33 = vld [vmem:[%s817_s16 - $0x1] sm:$0x2]  ;;  %792 = vst [vmem:[%s1946_s27] sm:$0x3] %v790_v35 }
 0x2c4   : >>> { %v826_v36 = vsel %vm801_vm14, %v819_v32, %v1562_v33 }
 0x2c5   : >>> { %829 = vst [vmem:[%s817_s16] sm:$0x3] %v826_v36 }
 0x2c7   : >>> { %v806_v37 = vld [vmem:[%s794_s30] ss:$0 sm:$0xff]  ;;  %v1561_v38 = vld [vmem:[%s794_s30 + $0x1] sm:$0x1] }
 0x2c8   : >>> { %1560 = vst [vmem:[%s793_s29 + $0x1] sm:$0x1] %v806_v37  ;;  %v814_v39 = vsel %vm813_vm15, %v1559_v27, %v1561_v38 }
 0x2c9   : >>> { %816 = vst [vmem:[%s794_s30] sm:$0x3] %v814_v39 }
 0x2ca   : >>> { %v830_v40 = vld [vmem:[%s818_s21] ss:$0 sm:$0xff]  ;;  %v1565_v41 = vld [vmem:[%s818_s21 + $0x1] sm:$0x1] }
 0x2cb   : >>> { %1564 = vst [vmem:[%s817_s16 + $0x1] sm:$0x1] %v830_v40  ;;  %v838_v42 = vsel %vm813_vm15, %v1563_v34, %v1565_v41 }
 0x2cc   : >>> { %840 = vst [vmem:[%s818_s21] sm:$0x3] %v838_v42  ;;  %476 = sbr.rel (!%p474_p9) target bundleno = 272 (0x110), region = 462 }
 0x2cf   : >> { %v388_v43 = vld [vmem:[%s382_s26] sm:$0x3] (%p474_p9) }
 0x2d0   : >> { %v389_v45 = vsel (%p474_p9), %vm1427_vm2, %v388_v43, 0.0  ;;  %v424_v47 = vld [vmem:[%s418_s22] sm:$0x3] (%p474_p9) }
 0x2d1   : >> { %v390_v49 = vmul.f32 %v389_v45, %v389_v45  ;;  %v425_v51 = vsel %vm1427_vm2, %v424_v47, 0.0 }
 0x2d2   : >> { %v407_v44 = vld [vmem:[%s401_s11] sm:$0x3]  ;;  %v426_v53 = vmul.f32 %v425_v51, %v425_v51 }
 0x2d3   : >> { %v408_v46 = vsel %vm1427_vm2, %v407_v44, 0.0  ;;  %v441_v48 = vld [vmem:[%s435_s14] sm:$0x3]  ;;  %v394_v56 = vsel %vm393_vm7, 0.0, %v390_v49 }
 0x2d4   : >> { %v409_v50 = vmul.f32 %v408_v46, %v408_v46  ;;  %v442_v52 = vsel %vm1427_vm2, %v441_v48, 0.0 }
 0x2d5   : >> { %v443_v55 = vmul.f32 %v442_v52, %v442_v52 }
 0x2d6   : >> { %v411_v54 = vadd.f32 %v409_v50, %v390_v49  ;;  %v410_v57 = vadd.f32 %v409_v50, %v394_v56 }
 0x2d7   : >> { %v447_v60 = vsel %vm446_vm8, 0.0, %v443_v55 }
 0x2d8   : >> { %v428_v58 = vadd.f32 %v426_v53, %v411_v54  ;;  %v427_v59 = vadd.f32 %v426_v53, %v410_v57 }
 0x2da   : >> { %v449_v61 = vadd.f32 %v443_v55, %v428_v58  ;;  %v448_v62 = vadd.f32 %v447_v60, %v427_v59 }
 0x2dc   : >> { %450 = vadd.xlane.f32.xlu0 %v449_v61 }
 0x2e0   : >> { %458 = vadd.xlane.f32.xlu0 %v448_v62 }
 0x365   : >> { %v451_v63 = vpop.xlane.xlu0 %450 }
 0x366   : >> { %v452_v0 = vrot.slane %v451_v63, 4 }
 0x368   : >> { %v453_v1 = vadd.f32 %v452_v0, %v451_v63 }
 0x369   : >> { %v459_v2 = vpop.xlane.xlu0 %458 }
 0x36a   : >> { %v454_v3 = vrot.slane %v453_v1, 2  ;;  %v460_v4 = vrot.slane %v459_v2, 4 }
 0x36c   : >> { %v461_v5 = vadd.f32 %v460_v4, %v459_v2  ;;  %v455_v8 = vadd.f32 %v454_v3, %v453_v1 }
 0x36e   : >> { %v462_v9 = vrot.slane %v461_v5, 2  ;;  %v456_v11 = vrot.slane %v455_v8, 1 }
 0x370   : >> { %v463_v10 = vadd.f32 %v462_v9, %v461_v5  ;;  %v457_v14 = vadd.f32 %v456_v11, %v455_v8 }
 0x372   : >> { %v464_v12 = vrot.slane %v463_v10, 1 }
 0x374   : >> { %v465_v13 = vadd.f32 %v464_v12, %v463_v10 }
 0x376   : >> { %1592 = vpush %v465_v13 }
 0x377   : >> { %1594 = vpush %v457_v14 }
 0x3a7   : >> { %s1593_s20 = spop %1592 }
 0x3a8   : >> { %s1595_s15 = spop %1594 }
 0x3a9   : >> { %s468_s24 = smul.f32 1e-10, %s1595_s15 }
 0x3ab   : >> { %p469_p11 = scmp.le.f32.partialorder %s1593_s20, %s468_s24 }
 0x3ad   : >> { %p471_p12 = por %p470_p10, %p469_p11 }
 0x3af   : > { %919 = sbr.rel (!%p471_p12) target bundleno = 271 (0x10f), region = 473 }
 0x3b4 PF: > { %s924_s23 = smov [#allocation20]  ;;  %v928_v6 = vmov %v1797_v6  ;;  %v931_v7 = vmov %v1799_v7  ;;  %v984_v15 = vld [vmem:[#allocation12] sm:$0x3]  ;;  %v992_v16 = vld [vmem:[#allocation14] sm:$0x3]  ;;  %s2079_s17 = scalar_lea.vmem [#allocation13], %s1793_s28 }
 0x3b5   : > { %v948_v6 = vmov %v1797_v6  ;;  %v951_v7 = vmov %v1799_v7  ;;  %v932_v17 = vld [vmem:[%s924_s23] sm:$0x3]  ;;  %vm935_vm9 = vcmp.eq.s32.totalorder %v931_v7, %v928_v6  ;;  %987 = vst [vmem:[%s2079_s17] sm:$0x3] %v984_v15  ;;  %s2080_s27 = scalar_lea.vmem [#allocation15], %s1793_s28  ;;  %s944_s29 = smov [#allocation23] }
 0x3b6   : > { %vm955_vm10 = vcmp.eq.s32.totalorder %v951_v7, %v948_v6  ;;  %995 = vst [vmem:[%s2080_s27] sm:$0x3] %v992_v16  ;;  %v1000_v18 = vld [vmem:[#allocation16] sm:$0x3]  ;;  %v936_v19 = vsel %vm935_vm9, %v932_v17, 0.0  ;;  %s2081_s16 = scalar_lea.vmem [#allocation17], %s1793_s28  ;;  %s2082_s30 = scalar_lea.vmem [#allocation19], %s1793_s28 }
 0x3b7   : > { %1003 = vst [vmem:[%s2081_s16] sm:$0x3] %v1000_v18  ;;  %v1008_v20 = vld [vmem:[#allocation18] sm:$0x3]  ;;  %v937_v21 = vrot.slane %v936_v19, 4  ;;  %v952_v22 = vld [vmem:[%s944_s29] sm:$0x3] }
 0x3b8   : > { %1011 = vst [vmem:[%s2082_s30] sm:$0x3] %v1008_v20  ;;  %v956_v23 = vsel %vm955_vm10, %v952_v22, 0.0  ;;  %s920_s21 = sand.u32 7, %s1756_s12   ;;  %s2083_s11 = scalar_lea.vmem [#allocation9], %s1795_s18 }
 0x3b9   : > { %v938_v24 = vadd.f32 %v937_v21, %v936_v19  ;;  %v957_v25 = vrot.slane %v956_v23, 4  ;;  %s921_s25 = scalar_lea.vmem [#allocation8], %s920_s21  ;;  %s923_s26 = scalar_lea.vmem [#allocation10], %s920_s21 }
 0x3ba   : > { %s925_s25 = smov %s921_s25  ;;  %s945_s26 = smov %s923_s26 }
 0x3bb   : > { %v939_v26 = vrot.slane %v938_v24, 2  ;;  %v958_v6 = vadd.f32 %v957_v25, %v956_v23  ;;  %s2084_s22 = scalar_lea.vmem [#allocation11], %s1795_s18  ;;  %s1039_s14 = sshrl.u32 (%p1770_p3), %s1756_s12, 3 }
 0x3bc   : > { %s2085_s20 = scalar_lea.vmem (%p1770_p3), [#allocation9], %s1795_s18  ;;  %s1580_s15 = sshll.u32 (%p1770_p3), %s1039_s14, 1 }
 0x3bd   : > { %v940_v7 = vadd.f32 %v939_v26, %v938_v24  ;;  %v959_v27 = vrot.slane %v958_v6, 2  ;;  %s1041_s17 = scalar_lea.vmem (%p1770_p3), %s2070_s4, %s1580_s15 }
 0x3bf   : > { %v941_v28 = vrot.slane %v940_v7, 1  ;;  %v960_v29 = vadd.f32 %v959_v27, %v958_v6 }
 0x3c1   : > { %v942_v30 = vadd.f32 %v941_v28, %v940_v7  ;;  %v961_v31 = vrot.slane %v960_v29, 1 }
 0x3c3   : > { %943 = vst [vmem:[%s925_s25] sm:$0x1] %v942_v30  ;;  %v962_v32 = vadd.f32 %v961_v31, %v960_v29 }
 0x3c5   : > { %963 = vst [vmem:[%s945_s26] sm:$0x1] %v962_v32 }
 0x3c9   : > { %1038 = sbr.rel (!%p1770_p3) target bundleno = 980 (0x3d4), region = 158 }
 0x3ca   : > { %v968_v33 = vld [vmem:[#allocation8] sm:$0x3] }
 0x3cb   : > { %971 = vst [vmem:[%s2083_s11] sm:$0x3] %v968_v33 }
 0x3cc   : > { %v976_v34 = vld [vmem:[#allocation10] sm:$0x3] }
 0x3cd   : > { %979 = vst [vmem:[%s2084_s22] sm:$0x3] %v976_v34 }
 0x3d2   : > { %v1058_v35 = vld [vmem:[%s2085_s20] sm:$0x3] }
 0x3d3   : > { %1059 = vst [vmem:[%s1041_s17] sm:$0x3] %v1058_v35 }
 0x3d4 PF: > { %1077 = sbr.rel (!%p1770_p3) target bundleno = 988 (0x3dc), region = 192  ;;  %s1078_s27 = sshrl.u32 (%p1770_p3), %s1756_s12, 3 }
 0x3d5   : > { %s2086_s29 = scalar_lea.vmem (%p1770_p3), [#allocation11], %s1795_s18  ;;  %s1581_s16 = sshll.u32 (%p1770_p3), %s1078_s27, 1 }
 0x3d6   : > { %s1080_s25 = scalar_lea.vmem (%p1770_p3), %s2071_s5, %s1581_s16 }
 0x3da   : > { %v1097_v36 = vld [vmem:[%s2086_s29] sm:$0x3] }
 0x3db   : > { %1098 = vst [vmem:[%s1080_s25] sm:$0x3] %v1097_v36 }
 0x3dc PF: > { %s1582_s26 = sshll.u32 %s1756_s12, 1  ;;  %s2087_s19 = scalar_lea.vmem [#allocation13], %s1793_s28 }
 0x3dd   : > { %v1132_v37 = vld [vmem:[%s2087_s19] sm:$0x3]  ;;  %s2088_s11 = scalar_lea.vmem [#allocation15], %s1793_s28  ;;  %s1115_s14 = scalar_lea.vmem %s2072_s6, %s1582_s26 }
 0x3de   : > { %v1167_v38 = vld [vmem:[%s2088_s11] sm:$0x3]  ;;  %s1150_s24 = scalar_lea.vmem %s2073_s7, %s1582_s26  ;;  %s2089_s23 = scalar_lea.vmem [#allocation17], %s1793_s28  ;;  %1133 = vst [vmem:[%s1115_s14] sm:$0x3] %v1132_v37 }
 0x3df   : > { %v1202_v39 = vld [vmem:[%s2089_s23] sm:$0x3]  ;;  %s2090_s17 = scalar_lea.vmem [#allocation19], %s1793_s28  ;;  %1168 = vst [vmem:[%s1150_s24] sm:$0x3] %v1167_v38  ;;  %s1185_s29 = scalar_lea.vmem %s2074_s8, %s1582_s26 }
 0x3e0   : > { %v1237_v40 = vld [vmem:[%s2090_s17] sm:$0x3]  ;;  %s1220_s21 = scalar_lea.vmem %s2075_s9, %s1582_s26  ;;  %1203 = vst [vmem:[%s1185_s29] sm:$0x3] %v1202_v39 }
 0x3e1   : > { %1238 = vst [vmem:[%s1220_s21] sm:$0x3] %v1237_v40 }
 0x3e2 PF: > { %s2091_s25 = sld [smem:[#allocation33_spill]]  ;;  %p13_p13 = scmp.ge.s32.totalorder %s1759_s13, 4  }
 0x3e3   : > { %s2092_s30 = smov %s1673_s10  ;;  %s2094_s11 = smov %s1759_s13 }
 0x3e4   :  { %15 = sbr.rel (!%p13_p13) target bundleno = 2 (0x2), region = 484 }
 0x3e8   : > { %s2093_s10 = smov %s2091_s25 }

// kernel: reverse
= control target key start
LH: loop header
LB: loop body
LE: loop exit
PB: predicated region body
PF: predicated region fallthrough
CT: control target
= control target key end

     0   :  { %v2_v0 = vlaneseq  ;;  %s112_s0 = inlined_call_operand.vmem [shape: f32[2,3], index: 0, kind: input, shape index: {}]   ;;  %s113_s1 = inlined_call_operand.vmem [shape: f32[2,3], index: 1, kind: output, shape index: {}]  }
   0x2   :  { %v3_v1 = vsub.s32 2, %v2_v0 }
   0x4   :  { %4 = vset.pattern.permute.xlu0 %v3_v1 }
   0x5   :  { %v21_v2 = vld [vmem:[%s112_s0] sm:$0x3] }
   0x6   :  { %22 = vst [vmem:[#allocation1] sm:$0x3] %v21_v2 }
   0xd   :  { %v41_v3 = vld [vmem:[#allocation1] sm:$0x3] }
   0xe   :  { %42 = vst [vmem:[#allocation0] sm:$0x3] %v41_v3 }
  0x15   :  { %v43_v4 = vld [vmem:[#allocation0] sm:$0xff] }
  0x16   :  { %44 = vperm.xlu0 %4, %v43_v4  }
  0x91   :  { %v45_v5 = vpop.permute.xlu0 %44 }
  0x92   :  { %46 = vst [vmem:[#allocation2] sm:$0xff] %v45_v5 }
  0x99   :  { %v51_v6 = vld [vmem:[#allocation2] sm:$0x3] }
  0x9a   :  { %54 = vst [vmem:[#allocation3] sm:$0x3] %v51_v6 }
  0xa1   :  { %v71_v7 = vld [vmem:[#allocation3] sm:$0x3] }
  0xa2   :  { %72 = vst [vmem:[%s113_s1] sm:$0x3] %v71_v7 }

// kernel: custom-call.16
= control target key start
LH: loop header
LB: loop body
LE: loop exit
PB: predicated region body
PF: predicated region fallthrough
CT: control target
= control target key end

     0   :  { %s664_s9 = smov 0   ;;  %s666_s10 = smov 0   ;;  %s810_s0 = inlined_call_operand.vmem [shape: f32[2,3,3], index: 0, kind: input, shape index: {}]   ;;  %s811_s1 = inlined_call_operand.vmem [shape: f32[2,3,3], index: 1, kind: output, shape index: {0}]   ;;  %s812_s2 = inlined_call_operand.vmem [shape: f32[2,3], index: 2, kind: output, shape index: {1}]  }
   0x1   :  { %s668_s11 = smov 0   ;;  %s670_s12 = smov 0  }
   0x2   :  { %s672_s13 = smov 0  }
   0x3 LB: > { %s28_s14 = sadd.s32 1, %s637_s12  ;;  %s519_s15 = sadd.s32 4294967295, %s641_s13   ;;  %s641_s13 = sphi %s672_s13, %s9_s13   ;;  %s637_s12 = sphi %s670_s12, %s819_s12   ;;  %s633_s11 = sphi %s668_s11, %s818_s11   ;;  %s629_s10 = sphi %s666_s10, %s817_s10   ;;  %s625_s9 = sphi %s664_s9, %s816_s9  }
   0x4   : > { %p30_p0 = scmp.ge.s32.totalorder %s28_s14, 2  ;;  %s33_s16 = ssub.s32 0, %s637_s12 }
   0x5   : > { %s521_s17 = smin.u32 %s637_s12, %s33_s16  ;;  %p57_p1 = scmp.ne.s32.totalorder %s629_s10, %s625_s9 }
   0x6   : > { %s821_s14 = smov (%p30_p0, %s28_s14), 0  ;;  %s35_s18 = sshrl.u32 %s521_s17, 3 }
   0x7   : > { %s39_s19 = ssub.s32 0, %s821_s14  ;;  %p58_p2 = scmp.eq.s32.totalorder %s519_s15, 1 }
   0x8   : > { %s522_s20 = smin.u32 %s39_s19, %s821_s14  ;;  %s47_s24 = sadd.s32 1, %s629_s10 }
   0x9   : > { %s41_s21 = sshrl.u32 %s522_s20, 3  ;;  %p699_p3 = por %p58_p2, %p57_p1 }
   0xa   : > { %s44_s23 = ssub.s32 %s35_s18, %s41_s21  ;;  %p524_p5 = scmp.ge.s32.totalorder %s641_s13, 2 }
   0xb   : > { %p45_p4 = scmp.eq.s32.totalorder %s44_s23, 0  ;;  %s82_s26 = sand.u32 (!%p524_p5), 1, %s641_s13  }
   0xc   : > { %80 = sbr.rel (%p524_p5) target bundleno = 19 (0x13), region = 16  ;;  %s526_s27 = sshll.u32 (!%p524_p5), %s637_s12, 2 }
   0xd   : > { %s705_s25 = scalar_select %p45_p4, %s629_s10, %s47_s24  }
   0xe   : > { %s525_s28 = sshll.u32 (!%p524_p5), %s82_s26, 2  ;;  %s88_s3 = scalar_lea.vmem (!%p524_p5), %s810_s0, %s526_s27 }
   0xf   : > { %s84_s4 = scalar_lea.vmem (!%p524_p5), [#allocation1], %s525_s28 }
  0x11   : > { %v105_v0 = vld [vmem:[%s88_s3] sm:$0xf] }
  0x12   : > { %106 = vst [vmem:[%s84_s4] sm:$0xf] %v105_v0 }
  0x13 PF: > { %p527_p6 = scmp.ge.s32.totalorder %s641_s13, 1  ;;  %p123_p7 = scmp.lt.s32.totalorder %s641_s13, 3 }
  0x15   : > { %p124_p8 = pnand %p527_p6, %p123_p7 }
  0x17   : > { %127 = sbr.rel (%p124_p8) target bundleno = 352 (0x160), region = 50 }
  0x1c   : > { %s134_s5 = sand.u32 1, %s519_s15   ;;  %s144_s6 = sand.u32 1, %s625_s9   ;;  %v647_v2 = vmov 0.0  }
  0x1d   : > { %s528_s7 = sshll.u32 %s134_s5, 2  ;;  %s716_s8 = sshll.u32 %s144_s6, 1 }
  0x1e   : > { %s136_s16 = scalar_lea.vmem [#allocation1], %s528_s7  ;;  %s158_s17 = sand.u32 7, %s633_s11  }
  0x1f   : > { %v150_v1 = vld [vmem:[%s136_s16] sm:$0xf]  ;;  %s719_s18 = scalar_lea.vmem [#allocation4], %s158_s17  ;;  %s722_s19 = scalar_lea.vmem [#allocation3], %s528_s7 }
  0x20   : > { %151 = vst [vmem:[#allocation0] sm:$0xf] %v150_v1  ;;  %162 = vst [vmem:[%s719_s18] sm:$0x1] %v647_v2  ;;  %s146_s15 = scalar_lea.vmem [#allocation5], %s716_s8  ;;  %s725_s20 = smov 0  }
  0x27   : > { %v160_v3 = vld [vmem:[#allocation0] sm:$0xff] }
  0x28   : > { %161 = vst [vmem:[#allocation2] sm:$0xff] %v160_v3 }
  0x29 LB: >> { %v170_v4 = vlaneseq  ;;  %v734_v6 = vstv %s645_s20  ;;  %s197_s9 = scalar_lea.vmem [#allocation2], %s645_s20  ;;  %s233_s21 = smov [#allocation2]  ;;  %v648_v60 = vmov 1.0   ;;  %v268_v61 = vld [vmem:[%s719_s18] ss:$0 sm:$0xff]  ;;  %s645_s20 = sphi %s725_s20, %s168_s20  }
  0x2a   : >> { %s255_s23 = scalar_lea.vmem [#allocation6], %s645_s20  ;;  %s271_s24 = smov [#allocation2] }
  0x2b   : >> { %v731_v5 = vshrl.u32 %v170_v4, 7  ;;  %v249_v49 = vand.u32 127, %v170_v4  ;;  %s272_s26 = smov [#allocation6] }
  0x2d   : >> { %vm174_vm0 = vcmp.gt.s32.totalorder %v731_v5, %v734_v6  ;;  %vm175_vm1 = vcmp.lt.s32.totalorder %v731_v5, 3  ;;  %v236_v5 = vmov %v731_v5  ;;  %vm749_vm12 = vcmp.eq.s32.totalorder %v249_v49, %v734_v6 }
  0x2e   : >> { %vm176_vm2 = vmand %vm174_vm0, %vm175_vm1  ;;  %vm240_vm9 = vcmp.gt.s32.totalorder %v236_v5, %v734_v6  ;;  %vm241_vm10 = vcmp.lt.s32.totalorder %v236_v5, 3  ;;  %v275_v5 = vmov %v731_v5  ;;  %vm301_vm15 = vcmp.gt.s32.totalorder %v249_v49, %v734_v6 }
  0x2f   : >> { %v169_v7 = vld [vmem:[#allocation2] sm:$0xff]  ;;  %v198_v16 = vld [vmem:[%s197_s9] ss:$0 sm:$0xff]  ;;  %vm242_vm11 = vmand %vm240_vm9, %vm241_vm10  ;;  %vm280_vm13 = vcmp.lt.s32.totalorder %v275_v5, 3  ;;  %v292_v5 = vmov %v731_v5 }
  0x30   : >> { %v177_v8 = vsel %vm176_vm2, %v169_v7, 0.0  ;;  %v199_v17 = vand.u32 2147483647, %v198_v16  ;;  %vm224_vm8 = vcmp.lt.f32.partialorder %v198_v16, 0.0  ;;  %v237_v46 = vld [vmem:[%s233_s21] sm:$0xff]  ;;  %vm309_vm14 = vcmp.ge.s32.totalorder %v292_v5, %v734_v6 }
  0x31   : >> { %v178_v9 = vmul.f32 %v177_v8, %v177_v8  ;;  %v243_v50 = vsel %vm242_vm11, %v237_v46, 0.0  ;;  %v278_v0 = vld [vmem:[%s271_s24] sm:$0xff]  ;;  %s288_s24 = smov %s271_s24  ;;  %vm310_vm0 = vmand %vm749_vm12, %vm309_vm14 }
  0x32   : >> { %v200_v22 = vmax.f32 %v199_v17, 0.0  ;;  %s313_s27 = scalar_lea.vmem %s288_s24, %s645_s20  ;;  %s168_s20 = sadd.s32 1, %s645_s20  }
  0x33   : >> { %v179_v10 = vrot.slane %v178_v9, 4  ;;  %p165_p9 = scmp.ge.s32.totalorder %s168_s20, 3  }
  0x34   : > { %s534_s28 = sshll.u32 (%p165_p9), %s633_s11, 2 }
  0x35   : >> { %v180_v11 = vadd.f32 %v179_v10, %v178_v9  ;;  %s348_s3 = scalar_lea.vmem (%p165_p9), %s811_s1, %s534_s28 }
  0x37   : >> { %v181_v12 = vrot.slane %v180_v11, 2 }
  0x39   : >> { %v182_v13 = vadd.f32 %v181_v12, %v180_v11 }
  0x3b   : >> { %v183_v14 = vrot.slane %v182_v13, 1 }
  0x3d   : >> { %v184_v15 = vadd.f32 %v183_v14, %v182_v13  ;;  %v299_v14 = vld [vmem:[%s288_s24] sm:$0xff] }
  0x3f   : >> { %589 = vrsqrt.f32 %v184_v15  ;;  %vm187_vm3 = vcmp.eq.f32.partialorder %v184_v15, inf  ;;  %v190_v19 = vand.u32 2147483648, %v184_v15  ;;  %vm189_vm4 = vcmp.eq.f32.partialorder %v184_v15, 0.0 }
  0x4c   : >> { %v590_v18 = vpop.eup %589 }
  0x4d   : >> { %v186_v20 = vmul.f32 %v590_v18, %v184_v15 }
  0x4f   : >> { %v188_v21 = vsel %vm187_vm3, %v184_v15, %v186_v20 }
  0x50   : >> { %v191_v23 = vsel %vm189_vm4, %v190_v19, %v188_v21 }
  0x51   : >> { %v201_v24 = vand.u32 2147483647, %v191_v23 }
  0x53   : >> { %v202_v25 = vmax.f32 %v200_v22, %v201_v24 }
  0x55   : >> { %591 = vrcp.f32 %v202_v25  ;;  %vm214_vm7 = vcmp.eq.f32.partialorder %v202_v25, 0.0 }
  0x62   : >> { %v592_v26 = vpop.eup %591 }
  0x63   : >> { %v204_v27 = vmul.f32 %v592_v26, %v199_v17  ;;  %v207_v28 = vmul.f32 0.0, %v592_v26  ;;  %v211_v29 = vmul.f32 %v592_v26, %v201_v24 }
  0x65   : >> { %v205_v30 = vmul.f32 %v204_v27, %v204_v27  ;;  %v208_v31 = vmul.f32 %v207_v28, %v207_v28  ;;  %v212_v32 = vmul.f32 %v211_v29, %v211_v29 }
  0x67   : >> { %v209_v33 = vadd.f32 %v208_v31, %v205_v30 }
  0x69   : >> { %v213_v34 = vadd.f32 %v212_v32, %v209_v33 }
  0x6b   : >> { %593 = vrsqrt.f32 %v213_v34  ;;  %vm217_vm5 = vcmp.eq.f32.partialorder %v213_v34, inf  ;;  %v220_v36 = vand.u32 2147483648, %v213_v34  ;;  %vm219_vm6 = vcmp.eq.f32.partialorder %v213_v34, 0.0 }
  0x78   : >> { %v594_v35 = vpop.eup %593 }
  0x79   : >> { %v216_v37 = vmul.f32 %v594_v35, %v213_v34 }
  0x7b   : >> { %v218_v38 = vsel %vm217_vm5, %v213_v34, %v216_v37 }
  0x7c   : >> { %v221_v39 = vsel %vm219_vm6, %v220_v36, %v218_v38 }
  0x7d   : >> { %v222_v40 = vmul.f32 %v221_v39, %v202_v25 }
  0x7f   : >> { %v223_v41 = vsel %vm214_vm7, 0.0, %v222_v40 }
  0x80   : >> { %v225_v42 = vxor.u32 2147483648, %v223_v41 }
  0x82   : >> { %v226_v43 = vsel %vm224_vm8, %v223_v41, %v225_v42 }
  0x83   : >> { %v742_v44 = vsel %vm189_vm4, %v198_v16, %v226_v43  ;;  %595 = vrcp.f32 %v226_v43  ;;  %v227_v47 = vsub.f32 %v226_v43, %v198_v16 }
  0x84   : >> { %v232_v45 = vsub.f32 %v198_v16, %v742_v44 }
  0x86   : >> { %597 = vrcp.f32 %v232_v45 }
  0x90   : >> { %v596_v48 = vpop.eup %595 }
  0x91   : >> { %v229_v51 = vmul.f32 %v596_v48, %v227_v47 }
  0x93   : >> { %v598_v52 = vpop.eup %597  ;;  %v231_v56 = vsel %vm189_vm4, 0.0, %v229_v51 }
  0x94   : >> { %v245_v53 = vmul.f32 %v598_v52, %v243_v50  ;;  %v261_v58 = vsel %vm749_vm12, %v231_v56, 0.0 }
  0x96   : >> { %v246_v55 = vsel %vm189_vm4, 0.0, %v245_v53 }
  0x97   : >> { %v251_v57 = vsel %vm749_vm12, %v246_v55, 0.0 }
  0x98   : >> { %252 = vadd.xlane.f32.xlu0 %v251_v57 }
  0x9c   : >> { %262 = vadd.xlane.f32.xlu0 %v261_v58 }
 0x121   : >> { %v253_v59 = vpop.xlane.xlu0 %252 }
 0x122   : >> { %254 = vst [vmem:[#allocation6] sm:$0xff] %v253_v59 }
 0x123   : >> { %256 = vst [vmem:[%s255_s23] sm:$0x1] %v648_v60 }
 0x125   : >> { %v263_v62 = vpop.xlane.xlu0 %262 }
 0x126   : >> { %v269_v63 = vsel %vm749_vm12, %v263_v62, %v268_v61 }
 0x127   : >> { %270 = vst [vmem:[%s719_s18] sm:$0x1] %v269_v63 }
 0x12a   : >> { %v277_v1 = vld [vmem:[%s272_s26] sm:$0xff]  ;;  %s289_s26 = smov %s272_s26 }
 0x12b   : >> { %v279_v2 = vmul.f32 %v278_v0, %v277_v1  ;;  %v297_v13 = vld [vmem:[%s289_s26] sm:$0xff] }
 0x12d   : >> { %v281_v3 = vsel %vm280_vm13, %v279_v2, 0.0 }
 0x12e   : >> { %v282_v4 = vrot.slane %v281_v3, 4  ;;  %v333_v6 = vld [vmem:[#allocation4] sm:$0x3] (%p165_p9) }
 0x12f   : > { %336 = vst [vmem:[%s146_s15] sm:$0x3] (%p165_p9), %v333_v6 }
 0x130   : >> { %v283_v7 = vadd.f32 %v282_v4, %v281_v3 }
 0x132   : >> { %v284_v8 = vrot.slane %v283_v7, 2 }
 0x134   : >> { %v285_v9 = vadd.f32 %v284_v8, %v283_v7 }
 0x136   : >> { %v286_v10 = vrot.slane %v285_v9, 1 }
 0x138   : >> { %v287_v11 = vadd.f32 %v286_v10, %v285_v9 }
 0x13a   : >> { %v293_v12 = vmul.f32 %v287_v11, %v263_v62 }
 0x13c   : >> { %v298_v15 = vmul.f32 %v297_v13, %v293_v12 }
 0x13e   : >> { %v302_v16 = vsub.f32 %v299_v14, %v298_v15 }
 0x140   : >> { %v303_v17 = vsel %vm301_vm15, %v302_v16, %v299_v14 }
 0x141   : >> { %v311_v18 = vsel %vm310_vm0, %v297_v13, %v303_v17 }
 0x142   : >> { %312 = vst [vmem:[%s288_s24] sm:$0xff] %v311_v18 }
 0x147   : > { %167 = sbr.rel (!%p165_p9) target bundleno = 41 (0x29), region = 167 }
 0x149   : >> { %v314_v19 = vld [vmem:[%s313_s27] ss:$0 sm:$0xff] }
 0x14a   : >> { %v319_v20 = vsel %vm749_vm12, %v742_v44, %v314_v19 }
 0x14b   : >> { %320 = vst [vmem:[%s313_s27] sm:$0x1] %v319_v20 }
 0x14c   : > { %p385_p10 = scmp.lt.s32.totalorder (%p699_p3), %s633_s11, 0  ;;  %s386_s4 = ssub.s32 (%p699_p3), 0, %s633_s11  ;;  %v409_v22 = vld [vmem:[%s146_s15] sm:$0x3] (%p699_p3) }
 0x14d   : > { %s535_s5 = smin.u32 (%p699_p3), %s633_s11, %s386_s4 }
 0x14e   : > { %s388_s6 = sshrl.u32 (%p699_p3), %s535_s5, 3 }
 0x14f   : > { %s389_s7 = ssub.s32 (%p699_p3), 0, %s388_s6 }
 0x152   : > { %v325_v5 = vld [vmem:[#allocation2] sm:$0xf] }
 0x153   : > { %328 = vst [vmem:[%s722_s19] sm:$0xf] %v325_v5 }
 0x157   : > { %384 = sbr.rel (!%p699_p3) target bundleno = 352 (0x160), region = 91 }
 0x15a   : > { %v365_v21 = vld [vmem:[%s722_s19] sm:$0xf] }
 0x15b   : > { %366 = vst [vmem:[%s348_s3] sm:$0xf] %v365_v21 }
 0x15c   : > { %s823_s7 = smov (!%p385_p10, %s389_s7), %s388_s6 }
 0x15d   : > { %s536_s16 = sshll.u32 %s823_s7, 1 }
 0x15e   : > { %s392_s19 = scalar_lea.vmem %s812_s2, %s536_s16 }
 0x15f   : > { %410 = vst [vmem:[%s392_s19] sm:$0x3] %v409_v22 }
 0x160 PF: > { %s9_s13 = sadd.s32 1, %s641_s13   ;;  %s816_s9 = smov %s629_s10 }
 0x161   : > { %p6_p11 = scmp.ge.s32.totalorder %s9_s13, 4   ;;  %s817_s10 = smov %s705_s25 }
 0x162   : > { %s818_s11 = smov %s637_s12  ;;  %s819_s12 = smov %s821_s14 }
 0x163   :  { %8 = sbr.rel (!%p6_p11) target bundleno = 3 (0x3), region = 178 }

</bundles_post_ra>
